<compile_context>
chip_gen: v7x
topology: tpu7x:2x2x1
jax: 0.10.0
libtpu: 0.0.40
codegen_flags: <defaults>
</compile_context>

<pallas_src>
import math
import jax
import jax.numpy as jnp
from jax.experimental import pallas as pl
from jax.experimental.pallas import tpu as pltpu

# ---------------- synthetic SigLIP-like config (small) ----------------
IMAGE_SIZE = 32
PATCH_SIZE = 8
CHANNELS = 3
HIDDEN = 128
NUM_HEADS = 4
HEAD_DIM = HIDDEN // NUM_HEADS
INTERMEDIATE = 256
NUM_LAYERS = 3
SELECT_LAYER = -2           # args.mm_vision_select_layer
SELECT_FEATURE = "patch"    # args.mm_vision_select_feature
LN_EPS = 1e-6
NUM_PATCHES_PER_SIDE = IMAGE_SIZE // PATCH_SIZE
NUM_PATCHES = NUM_PATCHES_PER_SIDE ** 2
PATCH_DIM = CHANNELS * PATCH_SIZE * PATCH_SIZE
VEC_W = 3 * HIDDEN          # width of the packed per-layer vector slab

# rows of the packed per-layer vector slab
_LN1_G, _LN1_B, _QKV_B, _O_B, _LN2_G, _LN2_B, _FC1_B, _FC2_B = range(8)
_N_VEC_ROWS = 8


# ---------------- in-kernel math helpers ----------------
def _gelu_tanh(x):
    # gelu_pytorch_tanh, f32 (tanh -> EUP)
    c = math.sqrt(2.0 / math.pi)
    return 0.5 * x * (1.0 + jnp.tanh(c * (x + 0.044715 * x * x * x)))


def _layernorm(x, g, b):
    # one-pass stats: var = E[x^2] - E[x]^2  (independent cross-lane reductions)
    mu = jnp.mean(x, axis=-1, keepdims=True)
    ms = jnp.mean(x * x, axis=-1, keepdims=True)
    var = ms - mu * mu
    return (x - mu) * jax.lax.rsqrt(var + LN_EPS) * g + b


def _num_used_layers(num_layers, select_layer):
    # hidden_states has num_layers+1 entries; entry k is the state after k layers.
    idx = select_layer if select_layer >= 0 else num_layers + 1 + select_layer
    assert 0 < idx <= num_layers, "select_layer must pick an encoder-layer output"
    return idx


# ---------------- fused tower kernel ----------------
def _make_tower_kernel(batch, seq, n_layers):
    B, S, D, H, Dh, NI = batch, seq, HIDDEN, NUM_HEADS, HEAD_DIM, INTERMEDIATE

    def heads(t):
        # (B*S, D) -> head-major batched (B*H, S, Dh), bf16 for the MXU
        return (t.reshape(B, S, H, Dh).swapaxes(1, 2)
                 .reshape(B * H, S, Dh).astype(jnp.bfloat16))

    def kernel(xp_ref, pw_ref, pos_ref, vec_ref,
               qkvw_ref, ow_ref, f1w_ref, f2w_ref, out_ref):
        # ---- patch embed (conv-as-matmul); patch bias already folded into pos ----
        y = jnp.dot(xp_ref[...].astype(jnp.bfloat16), pw_ref[...],
                    preferred_element_type=jnp.float32)
        x = (y.reshape(B, S, D) + pos_ref[...][None]).reshape(B * S, D)

        # ---- encoder layers (static loop; hidden state never leaves VMEM) ----
        for l in range(n_layers):
            vl = vec_ref[l]                                    # (8, 3*D) f32 slab

            # -- self-attention block --
            h = _layernorm(x, vl[_LN1_G:_LN1_G + 1, :D], vl[_LN1_B:_LN1_B + 1, :D])
            qkv = (jnp.dot(h.astype(jnp.bfloat16), qkvw_ref[l],
                           preferred_element_type=jnp.float32)
                   + vl[_QKV_B:_QKV_B + 1, :])
            # 1/sqrt(Dh) is folded into the Q third of qkv_w/qkv_b at init.
            qh = heads(qkv[:, 0:D])
            kh = heads(qkv[:, D:2 * D])
            vh = heads(qkv[:, 2 * D:3 * D])

            s = jnp.einsum('bqd,bkd->bqk', qh, kh,
                           preferred_element_type=jnp.float32)    # (B*H, S, S)
            m = jnp.max(s, axis=-1, keepdims=True)
            p = jnp.exp(s - m)
            p = p * pl.reciprocal(jnp.sum(p, axis=-1, keepdims=True), approx=True)
            o = jnp.einsum('bqk,bkd->bqd', p.astype(jnp.bfloat16), vh,
                           preferred_element_type=jnp.float32)    # (B*H, S, Dh)
            attn = o.reshape(B, H, S, Dh).swapaxes(1, 2).reshape(B * S, D)

            x = x + (jnp.dot(attn.astype(jnp.bfloat16), ow_ref[l],
                             preferred_element_type=jnp.float32)
                     + vl[_O_B:_O_B + 1, :D])

            # -- MLP block --
            h2 = _layernorm(x, vl[_LN2_G:_LN2_G + 1, :D], vl[_LN2_B:_LN2_B + 1, :D])
            h2 = (jnp.dot(h2.astype(jnp.bfloat16), f1w_ref[l],
                          preferred_element_type=jnp.float32)
                  + vl[_FC1_B:_FC1_B + 1, :NI])
            h2 = _gelu_tanh(h2)
            x = x + (jnp.dot(h2.astype(jnp.bfloat16), f2w_ref[l],
                             preferred_element_type=jnp.float32)
                     + vl[_FC2_B:_FC2_B + 1, :D])

        out_ref[...] = x

    return kernel


# ---------------- parameters ----------------
def init_params(key):
    D, NI, K, L = HIDDEN, INTERMEDIATE, PATCH_DIM, NUM_LAYERS
    scale = 1.0 / math.sqrt(HEAD_DIM)

    def w(k, fan_in, fan_out):
        return jax.random.normal(k, (fan_in, fan_out), jnp.float32) * 0.02

    keys = jax.random.split(key, 2 + L)
    params = {
        "patch_w": w(keys[0], K, D).astype(jnp.bfloat16),
        "patch_b": jnp.zeros((1, D), jnp.float32),
        "pos": jax.random.normal(keys[1], (NUM_PATCHES, D), jnp.float32) * 0.02,
    }

    qkv_w, o_w, f1_w, f2_w, vecs = [], [], [], [], []
    for li in range(L):
        lk = jax.random.split(keys[2 + li], 6)
        # fold 1/sqrt(Dh) into the Q projection before the bf16 cast
        wq = w(lk[0], D, D) * scale
        wk_ = w(lk[1], D, D)
        wv = w(lk[2], D, D)
        qkv_w.append(jnp.concatenate([wq, wk_, wv], axis=1).astype(jnp.bfloat16))
        o_w.append(w(lk[3], D, D).astype(jnp.bfloat16))
        f1_w.append(w(lk[4], D, NI).astype(jnp.bfloat16))
        f2_w.append(w(lk[5], NI, D).astype(jnp.bfloat16))

        # packed per-layer small vectors, padded to width 3*D.
        # NOTE: if loading real weights, the Q third of qkv_b must also be
        # multiplied by `scale` (here biases are zero, so it is trivially true).
        rows = [
            (jnp.ones((D,), jnp.float32), D),        # ln1_g
            (jnp.zeros((D,), jnp.float32), D),       # ln1_b
            (jnp.zeros((3 * D,), jnp.float32), 3 * D),  # qkv_b (Q part pre-scaled)
            (jnp.zeros((D,), jnp.float32), D),       # o_b
            (jnp.ones((D,), jnp.float32), D),        # ln2_g
            (jnp.zeros((D,), jnp.float32), D),       # ln2_b
            (jnp.zeros((NI,), jnp.float32), NI),     # fc1_b
            (jnp.zeros((D,), jnp.float32), D),       # fc2_b
        ]
        packed = jnp.zeros((_N_VEC_ROWS, VEC_W), jnp.float32)
        for r, (v, n) in enumerate(rows):
            packed = packed.at[r, :n].set(v)
        vecs.append(packed)

    params.update({
        "qkv_w": jnp.stack(qkv_w), "o_w": jnp.stack(o_w),
        "fc1_w": jnp.stack(f1_w), "fc2_w": jnp.stack(f2_w),
        "vecs": jnp.stack(vecs),
    })
    return params


# ---------------- forward ----------------
@jax.jit
def siglip_vision_tower_forward(images, params):
    """images: (B, C, H, W) float32, NCHW (PyTorch layout)."""
    B, C, Himg, Wimg = images.shape
    P = PATCH_SIZE
    hp, wp = Himg // P, Wimg // P
    S = hp * wp
    D, K = HIDDEN, C * P * P
    assert S == NUM_PATCHES and K == PATCH_DIM  # see TODO(synk) re pos-embed interp

    # Conv2d(kernel=stride=P) == extract non-overlapping patches + matmul.
    xp = (images.astype(jnp.float32)
          .reshape(B, C, hp, P, wp, P)
          .transpose(0, 2, 4, 1, 3, 5)            # (B, hp, wp, C, P, P)
          .reshape(B * S, K))                     # lane-dense 2-D slab

    # select_layer = -2 -> the last encoder layer's output is dead: skip it,
    # and do not DMA its weights at all.
    n_used = _num_used_layers(NUM_LAYERS, SELECT_LAYER)

    # patch-embed bias is a per-token constant add -> fold into the pos embed.
    pos_eff = params["pos"] + params["patch_b"]

    out2d = pl.pallas_call(
        _make_tower_kernel(B, S, n_used),
        out_shape=jax.ShapeDtypeStruct((B * S, D), jnp.float32),
        compiler_params=pltpu.CompilerParams(vmem_limit_bytes=32 * 1024 * 1024),
    )(xp, params["patch_w"], pos_eff,
      params["vecs"][:n_used], params["qkv_w"][:n_used],
      params["o_w"][:n_used], params["fc1_w"][:n_used], params["fc2_w"][:n_used])

    # feature_select: hidden_states[select_layer]; 'patch' keeps all tokens.
    if SELECT_FEATURE != "patch":
        raise ValueError(f"Unexpected select feature: {SELECT_FEATURE}")
    return out2d.reshape(B, S, D).astype(images.dtype)


if __name__ == "__main__":
    key = jax.random.PRNGKey(0)
    pkey, xkey = jax.random.split(key)
    params = init_params(pkey)

    batch = 2
    images = jax.random.normal(
        xkey, (batch, CHANNELS, IMAGE_SIZE, IMAGE_SIZE), jnp.float32)

    out = siglip_vision_tower_forward(images, params)
    out = jax.block_until_ready(out)
    assert out.shape == (batch, NUM_PATCHES, HIDDEN), out.shape
    assert bool(jnp.all(jnp.isfinite(out)))
    print("KERNEL_OK")
</pallas_src>

<mosaic_0001>
module attributes {stable_mosaic.version = 11 : i64} {
  func.func @kernel(%arg0: memref<32x192xf32, #tpu.memory_space<vmem>>, %arg1: memref<192x128xbf16, #tpu.memory_space<vmem>>, %arg2: memref<16x128xf32, #tpu.memory_space<vmem>>, %arg3: memref<2x8x384xf32, #tpu.memory_space<vmem>>, %arg4: memref<2x128x384xbf16, #tpu.memory_space<vmem>>, %arg5: memref<2x128x128xbf16, #tpu.memory_space<vmem>>, %arg6: memref<2x128x256xbf16, #tpu.memory_space<vmem>>, %arg7: memref<2x256x128xbf16, #tpu.memory_space<vmem>>, %arg8: memref<32x128xf32, #tpu.memory_space<vmem>>) attributes {dimension_semantics = [], scalar_prefetch = 0 : i64, scratch_operands = 0 : i64, tpu.core_type = #tpu.core_type<tc>} {
    %c0 = arith.constant 0 : index
    %c0_0 = arith.constant 0 : index
    %0 = vector.load %arg0[%c0, %c0_0] : memref<32x192xf32, #tpu.memory_space<vmem>>, vector<32x192xf32>
    %1 = arith.truncf %0 : vector<32x192xf32> to vector<32x192xbf16>
    %c0_1 = arith.constant 0 : index
    %c0_2 = arith.constant 0 : index
    %2 = vector.load %arg1[%c0_1, %c0_2] : memref<192x128xbf16, #tpu.memory_space<vmem>>, vector<192x128xbf16>
    %cst = arith.constant dense<0.000000e+00> : vector<32x128xf32>
    %3 = tpu.matmul %1, %2, %cst {dimension_numbers = #tpu.dot_dimension_numbers<[1], [0], [0], [1], [0, 0, 1, 1], [], []>} : vector<32x192xbf16>, vector<192x128xbf16>, vector<32x128xf32> -> vector<32x128xf32>
    %4 = vector.shape_cast %3 : vector<32x128xf32> to vector<2x16x128xf32>
    %c0_3 = arith.constant 0 : index
    %c0_4 = arith.constant 0 : index
    %5 = vector.load %arg2[%c0_3, %c0_4] : memref<16x128xf32, #tpu.memory_space<vmem>>, vector<16x128xf32>
    %6 = vector.shape_cast %5 : vector<16x128xf32> to vector<1x16x128xf32>
    %7 = vector.broadcast %6 : vector<1x16x128xf32> to vector<2x16x128xf32>
    %8 = arith.addf %4, %7 : vector<2x16x128xf32>
    %9 = vector.shape_cast %8 : vector<2x16x128xf32> to vector<32x128xf32>
    %c0_5 = arith.constant 0 : index
    %c0_6 = arith.constant 0 : index
    %c0_7 = arith.constant 0 : index
    %10 = vector.load %arg3[%c0_5, %c0_6, %c0_7] : memref<2x8x384xf32, #tpu.memory_space<vmem>>, vector<1x8x384xf32>
    %11 = vector.shape_cast %10 : vector<1x8x384xf32> to vector<8x384xf32>
    %12 = vector.extract_strided_slice %11 {offsets = [0, 0], sizes = [1, 128], strides = [1, 1]} : vector<8x384xf32> to vector<1x128xf32>
    %13 = vector.extract_strided_slice %11 {offsets = [1, 0], sizes = [1, 128], strides = [1, 1]} : vector<8x384xf32> to vector<1x128xf32>
    %cst_8 = arith.constant dense<0.000000e+00> : vector<32xf32>
    %14 = vector.multi_reduction <add>, %9, %cst_8 [1] : vector<32x128xf32> to vector<32xf32>
    %15 = vector.shape_cast %14 : vector<32xf32> to vector<32x1xf32>
    %cst_9 = arith.constant 1.280000e+02 : f32
    %16 = vector.broadcast %cst_9 : f32 to vector<32x1xf32>
    %17 = arith.divf %15, %16 : vector<32x1xf32>
    %18 = arith.mulf %9, %9 : vector<32x128xf32>
    %cst_10 = arith.constant dense<0.000000e+00> : vector<32xf32>
    %19 = vector.multi_reduction <add>, %18, %cst_10 [1] : vector<32x128xf32> to vector<32xf32>
    %20 = vector.shape_cast %19 : vector<32xf32> to vector<32x1xf32>
    %cst_11 = arith.constant 1.280000e+02 : f32
    %21 = vector.broadcast %cst_11 : f32 to vector<32x1xf32>
    %22 = arith.divf %20, %21 : vector<32x1xf32>
    %23 = arith.mulf %17, %17 : vector<32x1xf32>
    %24 = arith.subf %22, %23 : vector<32x1xf32>
    %25 = vector.broadcast %17 : vector<32x1xf32> to vector<32x128xf32>
    %26 = arith.subf %9, %25 : vector<32x128xf32>
    %cst_12 = arith.constant 9.99999997E-7 : f32
    %27 = vector.broadcast %cst_12 : f32 to vector<32x1xf32>
    %28 = arith.addf %24, %27 : vector<32x1xf32>
    %29 = math.rsqrt %28 : vector<32x1xf32>
    %30 = vector.broadcast %29 : vector<32x1xf32> to vector<32x128xf32>
    %31 = arith.mulf %26, %30 : vector<32x128xf32>
    %32 = vector.broadcast %12 : vector<1x128xf32> to vector<32x128xf32>
    %33 = arith.mulf %31, %32 : vector<32x128xf32>
    %34 = vector.broadcast %13 : vector<1x128xf32> to vector<32x128xf32>
    %35 = arith.addf %33, %34 : vector<32x128xf32>
    %36 = arith.truncf %35 : vector<32x128xf32> to vector<32x128xbf16>
    %c0_13 = arith.constant 0 : index
    %c0_14 = arith.constant 0 : index
    %c0_15 = arith.constant 0 : index
    %37 = vector.load %arg4[%c0_13, %c0_14, %c0_15] : memref<2x128x384xbf16, #tpu.memory_space<vmem>>, vector<1x128x384xbf16>
    %38 = vector.shape_cast %37 : vector<1x128x384xbf16> to vector<128x384xbf16>
    %cst_16 = arith.constant dense<0.000000e+00> : vector<32x384xf32>
    %39 = tpu.matmul %36, %38, %cst_16 {dimension_numbers = #tpu.dot_dimension_numbers<[1], [0], [0], [1], [0, 0, 1, 1], [], []>} : vector<32x128xbf16>, vector<128x384xbf16>, vector<32x384xf32> -> vector<32x384xf32>
    %40 = vector.extract_strided_slice %11 {offsets = [2, 0], sizes = [1, 384], strides = [1, 1]} : vector<8x384xf32> to vector<1x384xf32>
    %41 = vector.broadcast %40 : vector<1x384xf32> to vector<32x384xf32>
    %42 = arith.addf %39, %41 : vector<32x384xf32>
    %43 = vector.extract_strided_slice %42 {offsets = [0, 0], sizes = [32, 128], strides = [1, 1]} : vector<32x384xf32> to vector<32x128xf32>
    %44 = vector.shape_cast %43 : vector<32x128xf32> to vector<2x16x4x32xf32>
    %45 = tpu.transpose %44, [0, 2, 1, 3] : vector<2x16x4x32xf32> -> vector<2x4x16x32xf32>
    %46 = vector.shape_cast %45 : vector<2x4x16x32xf32> to vector<8x16x32xf32>
    %47 = arith.truncf %46 : vector<8x16x32xf32> to vector<8x16x32xbf16>
    %48 = vector.extract_strided_slice %42 {offsets = [0, 128], sizes = [32, 128], strides = [1, 1]} : vector<32x384xf32> to vector<32x128xf32>
    %49 = vector.shape_cast %48 : vector<32x128xf32> to vector<2x16x4x32xf32>
    %50 = tpu.transpose %49, [0, 2, 1, 3] : vector<2x16x4x32xf32> -> vector<2x4x16x32xf32>
    %51 = vector.shape_cast %50 : vector<2x4x16x32xf32> to vector<8x16x32xf32>
    %52 = arith.truncf %51 : vector<8x16x32xf32> to vector<8x16x32xbf16>
    %53 = vector.extract_strided_slice %42 {offsets = [0, 256], sizes = [32, 128], strides = [1, 1]} : vector<32x384xf32> to vector<32x128xf32>
    %54 = vector.shape_cast %53 : vector<32x128xf32> to vector<2x16x4x32xf32>
    %55 = tpu.transpose %54, [0, 2, 1, 3] : vector<2x16x4x32xf32> -> vector<2x4x16x32xf32>
    %56 = vector.shape_cast %55 : vector<2x4x16x32xf32> to vector<8x16x32xf32>
    %57 = arith.truncf %56 : vector<8x16x32xf32> to vector<8x16x32xbf16>
    "tpu.trace_start"() <{level = 10 : i32, message = "bqd,bkd->bqk"}> : () -> ()
    %cst_17 = arith.constant dense<0.000000e+00> : vector<8x16x16xf32>
    %58 = tpu.matmul %47, %52, %cst_17 {dimension_numbers = #tpu.dot_dimension_numbers<[2], [2], [1], [1], [0, 0, 0, 1, 1, 1], [0], [0]>} : vector<8x16x32xbf16>, vector<8x16x32xbf16>, vector<8x16x16xf32> -> vector<8x16x16xf32>
    "tpu.trace_stop"() : () -> ()
    %cst_18 = arith.constant dense<0xFF800000> : vector<8x16xf32>
    %59 = vector.multi_reduction <maximumf>, %58, %cst_18 [2] : vector<8x16x16xf32> to vector<8x16xf32>
    %60 = vector.shape_cast %59 : vector<8x16xf32> to vector<8x16x1xf32>
    %61 = vector.broadcast %60 : vector<8x16x1xf32> to vector<8x16x16xf32>
    %62 = arith.subf %58, %61 : vector<8x16x16xf32>
    %63 = math.exp %62 : vector<8x16x16xf32>
    %cst_19 = arith.constant dense<0.000000e+00> : vector<8x16xf32>
    %64 = vector.multi_reduction <add>, %63, %cst_19 [2] : vector<8x16x16xf32> to vector<8x16xf32>
    %65 = vector.shape_cast %64 : vector<8x16xf32> to vector<8x16x1xf32>
    %66 = tpu.reciprocal %65 {approx = true} : vector<8x16x1xf32> -> vector<8x16x1xf32>
    %67 = vector.broadcast %66 : vector<8x16x1xf32> to vector<8x16x16xf32>
    %68 = arith.mulf %63, %67 : vector<8x16x16xf32>
    %69 = arith.truncf %68 : vector<8x16x16xf32> to vector<8x16x16xbf16>
    "tpu.trace_start"() <{level = 10 : i32, message = "bqk,bkd->bqd"}> : () -> ()
    %cst_20 = arith.constant dense<0.000000e+00> : vector<8x16x32xf32>
    %70 = tpu.matmul %69, %57, %cst_20 {dimension_numbers = #tpu.dot_dimension_numbers<[2], [1], [1], [2], [0, 0, 0, 1, 1, 2], [0], [0]>} : vector<8x16x16xbf16>, vector<8x16x32xbf16>, vector<8x16x32xf32> -> vector<8x16x32xf32>
    "tpu.trace_stop"() : () -> ()
    %71 = vector.shape_cast %70 : vector<8x16x32xf32> to vector<2x4x16x32xf32>
    %72 = tpu.transpose %71, [0, 2, 1, 3] : vector<2x4x16x32xf32> -> vector<2x16x4x32xf32>
    %73 = vector.shape_cast %72 : vector<2x16x4x32xf32> to vector<32x128xf32>
    %74 = arith.truncf %73 : vector<32x128xf32> to vector<32x128xbf16>
    %c0_21 = arith.constant 0 : index
    %c0_22 = arith.constant 0 : index
    %c0_23 = arith.constant 0 : index
    %75 = vector.load %arg5[%c0_21, %c0_22, %c0_23] : memref<2x128x128xbf16, #tpu.memory_space<vmem>>, vector<1x128x128xbf16>
    %76 = vector.shape_cast %75 : vector<1x128x128xbf16> to vector<128x128xbf16>
    %cst_24 = arith.constant dense<0.000000e+00> : vector<32x128xf32>
    %77 = tpu.matmul %74, %76, %cst_24 {dimension_numbers = #tpu.dot_dimension_numbers<[1], [0], [0], [1], [0, 0, 1, 1], [], []>} : vector<32x128xbf16>, vector<128x128xbf16>, vector<32x128xf32> -> vector<32x128xf32>
    %78 = vector.extract_strided_slice %11 {offsets = [3, 0], sizes = [1, 128], strides = [1, 1]} : vector<8x384xf32> to vector<1x128xf32>
    %79 = vector.broadcast %78 : vector<1x128xf32> to vector<32x128xf32>
    %80 = arith.addf %77, %79 : vector<32x128xf32>
    %81 = arith.addf %9, %80 : vector<32x128xf32>
    %82 = vector.extract_strided_slice %11 {offsets = [4, 0], sizes = [1, 128], strides = [1, 1]} : vector<8x384xf32> to vector<1x128xf32>
    %83 = vector.extract_strided_slice %11 {offsets = [5, 0], sizes = [1, 128], strides = [1, 1]} : vector<8x384xf32> to vector<1x128xf32>
    %cst_25 = arith.constant dense<0.000000e+00> : vector<32xf32>
    %84 = vector.multi_reduction <add>, %81, %cst_25 [1] : vector<32x128xf32> to vector<32xf32>
    %85 = vector.shape_cast %84 : vector<32xf32> to vector<32x1xf32>
    %cst_26 = arith.constant 1.280000e+02 : f32
    %86 = vector.broadcast %cst_26 : f32 to vector<32x1xf32>
    %87 = arith.divf %85, %86 : vector<32x1xf32>
    %88 = arith.mulf %81, %81 : vector<32x128xf32>
    %cst_27 = arith.constant dense<0.000000e+00> : vector<32xf32>
    %89 = vector.multi_reduction <add>, %88, %cst_27 [1] : vector<32x128xf32> to vector<32xf32>
    %90 = vector.shape_cast %89 : vector<32xf32> to vector<32x1xf32>
    %cst_28 = arith.constant 1.280000e+02 : f32
    %91 = vector.broadcast %cst_28 : f32 to vector<32x1xf32>
    %92 = arith.divf %90, %91 : vector<32x1xf32>
    %93 = arith.mulf %87, %87 : vector<32x1xf32>
    %94 = arith.subf %92, %93 : vector<32x1xf32>
    %95 = vector.broadcast %87 : vector<32x1xf32> to vector<32x128xf32>
    %96 = arith.subf %81, %95 : vector<32x128xf32>
    %cst_29 = arith.constant 9.99999997E-7 : f32
    %97 = vector.broadcast %cst_29 : f32 to vector<32x1xf32>
    %98 = arith.addf %94, %97 : vector<32x1xf32>
    %99 = math.rsqrt %98 : vector<32x1xf32>
    %100 = vector.broadcast %99 : vector<32x1xf32> to vector<32x128xf32>
    %101 = arith.mulf %96, %100 : vector<32x128xf32>
    %102 = vector.broadcast %82 : vector<1x128xf32> to vector<32x128xf32>
    %103 = arith.mulf %101, %102 : vector<32x128xf32>
    %104 = vector.broadcast %83 : vector<1x128xf32> to vector<32x128xf32>
    %105 = arith.addf %103, %104 : vector<32x128xf32>
    %106 = arith.truncf %105 : vector<32x128xf32> to vector<32x128xbf16>
    %c0_30 = arith.constant 0 : index
    %c0_31 = arith.constant 0 : index
    %c0_32 = arith.constant 0 : index
    %107 = vector.load %arg6[%c0_30, %c0_31, %c0_32] : memref<2x128x256xbf16, #tpu.memory_space<vmem>>, vector<1x128x256xbf16>
    %108 = vector.shape_cast %107 : vector<1x128x256xbf16> to vector<128x256xbf16>
    %cst_33 = arith.constant dense<0.000000e+00> : vector<32x256xf32>
    %109 = tpu.matmul %106, %108, %cst_33 {dimension_numbers = #tpu.dot_dimension_numbers<[1], [0], [0], [1], [0, 0, 1, 1], [], []>} : vector<32x128xbf16>, vector<128x256xbf16>, vector<32x256xf32> -> vector<32x256xf32>
    %110 = vector.extract_strided_slice %11 {offsets = [6, 0], sizes = [1, 256], strides = [1, 1]} : vector<8x384xf32> to vector<1x256xf32>
    %111 = vector.broadcast %110 : vector<1x256xf32> to vector<32x256xf32>
    %112 = arith.addf %109, %111 : vector<32x256xf32>
    %cst_34 = arith.constant 5.000000e-01 : f32
    %113 = vector.broadcast %cst_34 : f32 to vector<32x256xf32>
    %114 = arith.mulf %113, %112 : vector<32x256xf32>
    %cst_35 = arith.constant 4.471500e-02 : f32
    %115 = vector.broadcast %cst_35 : f32 to vector<32x256xf32>
    %116 = arith.mulf %115, %112 : vector<32x256xf32>
    %117 = arith.mulf %116, %112 : vector<32x256xf32>
    %118 = arith.mulf %117, %112 : vector<32x256xf32>
    %119 = arith.addf %112, %118 : vector<32x256xf32>
    %cst_36 = arith.constant 0.797884583 : f32
    %120 = vector.broadcast %cst_36 : f32 to vector<32x256xf32>
    %121 = arith.mulf %120, %119 : vector<32x256xf32>
    %122 = math.tanh %121 : vector<32x256xf32>
    %cst_37 = arith.constant 1.000000e+00 : f32
    %123 = vector.broadcast %cst_37 : f32 to vector<32x256xf32>
    %124 = arith.addf %123, %122 : vector<32x256xf32>
    %125 = arith.mulf %114, %124 : vector<32x256xf32>
    %126 = arith.truncf %125 : vector<32x256xf32> to vector<32x256xbf16>
    %c0_38 = arith.constant 0 : index
    %c0_39 = arith.constant 0 : index
    %c0_40 = arith.constant 0 : index
    %127 = vector.load %arg7[%c0_38, %c0_39, %c0_40] : memref<2x256x128xbf16, #tpu.memory_space<vmem>>, vector<1x256x128xbf16>
    %128 = vector.shape_cast %127 : vector<1x256x128xbf16> to vector<256x128xbf16>
    %cst_41 = arith.constant dense<0.000000e+00> : vector<32x128xf32>
    %129 = tpu.matmul %126, %128, %cst_41 {dimension_numbers = #tpu.dot_dimension_numbers<[1], [0], [0], [1], [0, 0, 1, 1], [], []>} : vector<32x256xbf16>, vector<256x128xbf16>, vector<32x128xf32> -> vector<32x128xf32>
    %130 = vector.extract_strided_slice %11 {offsets = [7, 0], sizes = [1, 128], strides = [1, 1]} : vector<8x384xf32> to vector<1x128xf32>
    %131 = vector.broadcast %130 : vector<1x128xf32> to vector<32x128xf32>
    %132 = arith.addf %129, %131 : vector<32x128xf32>
    %133 = arith.addf %81, %132 : vector<32x128xf32>
    %c1 = arith.constant 1 : index
    %c0_42 = arith.constant 0 : index
    %c0_43 = arith.constant 0 : index
    %134 = vector.load %arg3[%c1, %c0_42, %c0_43] : memref<2x8x384xf32, #tpu.memory_space<vmem>>, vector<1x8x384xf32>
    %135 = vector.shape_cast %134 : vector<1x8x384xf32> to vector<8x384xf32>
    %136 = vector.extract_strided_slice %135 {offsets = [0, 0], sizes = [1, 128], strides = [1, 1]} : vector<8x384xf32> to vector<1x128xf32>
    %137 = vector.extract_strided_slice %135 {offsets = [1, 0], sizes = [1, 128], strides = [1, 1]} : vector<8x384xf32> to vector<1x128xf32>
    %cst_44 = arith.constant dense<0.000000e+00> : vector<32xf32>
    %138 = vector.multi_reduction <add>, %133, %cst_44 [1] : vector<32x128xf32> to vector<32xf32>
    %139 = vector.shape_cast %138 : vector<32xf32> to vector<32x1xf32>
    %cst_45 = arith.constant 1.280000e+02 : f32
    %140 = vector.broadcast %cst_45 : f32 to vector<32x1xf32>
    %141 = arith.divf %139, %140 : vector<32x1xf32>
    %142 = arith.mulf %133, %133 : vector<32x128xf32>
    %cst_46 = arith.constant dense<0.000000e+00> : vector<32xf32>
    %143 = vector.multi_reduction <add>, %142, %cst_46 [1] : vector<32x128xf32> to vector<32xf32>
    %144 = vector.shape_cast %143 : vector<32xf32> to vector<32x1xf32>
    %cst_47 = arith.constant 1.280000e+02 : f32
    %145 = vector.broadcast %cst_47 : f32 to vector<32x1xf32>
    %146 = arith.divf %144, %145 : vector<32x1xf32>
    %147 = arith.mulf %141, %141 : vector<32x1xf32>
    %148 = arith.subf %146, %147 : vector<32x1xf32>
    %149 = vector.broadcast %141 : vector<32x1xf32> to vector<32x128xf32>
    %150 = arith.subf %133, %149 : vector<32x128xf32>
    %cst_48 = arith.constant 9.99999997E-7 : f32
    %151 = vector.broadcast %cst_48 : f32 to vector<32x1xf32>
    %152 = arith.addf %148, %151 : vector<32x1xf32>
    %153 = math.rsqrt %152 : vector<32x1xf32>
    %154 = vector.broadcast %153 : vector<32x1xf32> to vector<32x128xf32>
    %155 = arith.mulf %150, %154 : vector<32x128xf32>
    %156 = vector.broadcast %136 : vector<1x128xf32> to vector<32x128xf32>
    %157 = arith.mulf %155, %156 : vector<32x128xf32>
    %158 = vector.broadcast %137 : vector<1x128xf32> to vector<32x128xf32>
    %159 = arith.addf %157, %158 : vector<32x128xf32>
    %160 = arith.truncf %159 : vector<32x128xf32> to vector<32x128xbf16>
    %c1_49 = arith.constant 1 : index
    %c0_50 = arith.constant 0 : index
    %c0_51 = arith.constant 0 : index
    %161 = vector.load %arg4[%c1_49, %c0_50, %c0_51] : memref<2x128x384xbf16, #tpu.memory_space<vmem>>, vector<1x128x384xbf16>
    %162 = vector.shape_cast %161 : vector<1x128x384xbf16> to vector<128x384xbf16>
    %cst_52 = arith.constant dense<0.000000e+00> : vector<32x384xf32>
    %163 = tpu.matmul %160, %162, %cst_52 {dimension_numbers = #tpu.dot_dimension_numbers<[1], [0], [0], [1], [0, 0, 1, 1], [], []>} : vector<32x128xbf16>, vector<128x384xbf16>, vector<32x384xf32> -> vector<32x384xf32>
    %164 = vector.extract_strided_slice %135 {offsets = [2, 0], sizes = [1, 384], strides = [1, 1]} : vector<8x384xf32> to vector<1x384xf32>
    %165 = vector.broadcast %164 : vector<1x384xf32> to vector<32x384xf32>
    %166 = arith.addf %163, %165 : vector<32x384xf32>
    %167 = vector.extract_strided_slice %166 {offsets = [0, 0], sizes = [32, 128], strides = [1, 1]} : vector<32x384xf32> to vector<32x128xf32>
    %168 = vector.shape_cast %167 : vector<32x128xf32> to vector<2x16x4x32xf32>
    %169 = tpu.transpose %168, [0, 2, 1, 3] : vector<2x16x4x32xf32> -> vector<2x4x16x32xf32>
    %170 = vector.shape_cast %169 : vector<2x4x16x32xf32> to vector<8x16x32xf32>
    %171 = arith.truncf %170 : vector<8x16x32xf32> to vector<8x16x32xbf16>
    %172 = vector.extract_strided_slice %166 {offsets = [0, 128], sizes = [32, 128], strides = [1, 1]} : vector<32x384xf32> to vector<32x128xf32>
    %173 = vector.shape_cast %172 : vector<32x128xf32> to vector<2x16x4x32xf32>
    %174 = tpu.transpose %173, [0, 2, 1, 3] : vector<2x16x4x32xf32> -> vector<2x4x16x32xf32>
    %175 = vector.shape_cast %174 : vector<2x4x16x32xf32> to vector<8x16x32xf32>
    %176 = arith.truncf %175 : vector<8x16x32xf32> to vector<8x16x32xbf16>
    %177 = vector.extract_strided_slice %166 {offsets = [0, 256], sizes = [32, 128], strides = [1, 1]} : vector<32x384xf32> to vector<32x128xf32>
    %178 = vector.shape_cast %177 : vector<32x128xf32> to vector<2x16x4x32xf32>
    %179 = tpu.transpose %178, [0, 2, 1, 3] : vector<2x16x4x32xf32> -> vector<2x4x16x32xf32>
    %180 = vector.shape_cast %179 : vector<2x4x16x32xf32> to vector<8x16x32xf32>
    %181 = arith.truncf %180 : vector<8x16x32xf32> to vector<8x16x32xbf16>
    "tpu.trace_start"() <{level = 10 : i32, message = "bqd,bkd->bqk"}> : () -> ()
    %cst_53 = arith.constant dense<0.000000e+00> : vector<8x16x16xf32>
    %182 = tpu.matmul %171, %176, %cst_53 {dimension_numbers = #tpu.dot_dimension_numbers<[2], [2], [1], [1], [0, 0, 0, 1, 1, 1], [0], [0]>} : vector<8x16x32xbf16>, vector<8x16x32xbf16>, vector<8x16x16xf32> -> vector<8x16x16xf32>
    "tpu.trace_stop"() : () -> ()
    %cst_54 = arith.constant dense<0xFF800000> : vector<8x16xf32>
    %183 = vector.multi_reduction <maximumf>, %182, %cst_54 [2] : vector<8x16x16xf32> to vector<8x16xf32>
    %184 = vector.shape_cast %183 : vector<8x16xf32> to vector<8x16x1xf32>
    %185 = vector.broadcast %184 : vector<8x16x1xf32> to vector<8x16x16xf32>
    %186 = arith.subf %182, %185 : vector<8x16x16xf32>
    %187 = math.exp %186 : vector<8x16x16xf32>
    %cst_55 = arith.constant dense<0.000000e+00> : vector<8x16xf32>
    %188 = vector.multi_reduction <add>, %187, %cst_55 [2] : vector<8x16x16xf32> to vector<8x16xf32>
    %189 = vector.shape_cast %188 : vector<8x16xf32> to vector<8x16x1xf32>
    %190 = tpu.reciprocal %189 {approx = true} : vector<8x16x1xf32> -> vector<8x16x1xf32>
    %191 = vector.broadcast %190 : vector<8x16x1xf32> to vector<8x16x16xf32>
    %192 = arith.mulf %187, %191 : vector<8x16x16xf32>
    %193 = arith.truncf %192 : vector<8x16x16xf32> to vector<8x16x16xbf16>
    "tpu.trace_start"() <{level = 10 : i32, message = "bqk,bkd->bqd"}> : () -> ()
    %cst_56 = arith.constant dense<0.000000e+00> : vector<8x16x32xf32>
    %194 = tpu.matmul %193, %181, %cst_56 {dimension_numbers = #tpu.dot_dimension_numbers<[2], [1], [1], [2], [0, 0, 0, 1, 1, 2], [0], [0]>} : vector<8x16x16xbf16>, vector<8x16x32xbf16>, vector<8x16x32xf32> -> vector<8x16x32xf32>
    "tpu.trace_stop"() : () -> ()
    %195 = vector.shape_cast %194 : vector<8x16x32xf32> to vector<2x4x16x32xf32>
    %196 = tpu.transpose %195, [0, 2, 1, 3] : vector<2x4x16x32xf32> -> vector<2x16x4x32xf32>
    %197 = vector.shape_cast %196 : vector<2x16x4x32xf32> to vector<32x128xf32>
    %198 = arith.truncf %197 : vector<32x128xf32> to vector<32x128xbf16>
    %c1_57 = arith.constant 1 : index
    %c0_58 = arith.constant 0 : index
    %c0_59 = arith.constant 0 : index
    %199 = vector.load %arg5[%c1_57, %c0_58, %c0_59] : memref<2x128x128xbf16, #tpu.memory_space<vmem>>, vector<1x128x128xbf16>
    %200 = vector.shape_cast %199 : vector<1x128x128xbf16> to vector<128x128xbf16>
    %cst_60 = arith.constant dense<0.000000e+00> : vector<32x128xf32>
    %201 = tpu.matmul %198, %200, %cst_60 {dimension_numbers = #tpu.dot_dimension_numbers<[1], [0], [0], [1], [0, 0, 1, 1], [], []>} : vector<32x128xbf16>, vector<128x128xbf16>, vector<32x128xf32> -> vector<32x128xf32>
    %202 = vector.extract_strided_slice %135 {offsets = [3, 0], sizes = [1, 128], strides = [1, 1]} : vector<8x384xf32> to vector<1x128xf32>
    %203 = vector.broadcast %202 : vector<1x128xf32> to vector<32x128xf32>
    %204 = arith.addf %201, %203 : vector<32x128xf32>
    %205 = arith.addf %133, %204 : vector<32x128xf32>
    %206 = vector.extract_strided_slice %135 {offsets = [4, 0], sizes = [1, 128], strides = [1, 1]} : vector<8x384xf32> to vector<1x128xf32>
    %207 = vector.extract_strided_slice %135 {offsets = [5, 0], sizes = [1, 128], strides = [1, 1]} : vector<8x384xf32> to vector<1x128xf32>
    %cst_61 = arith.constant dense<0.000000e+00> : vector<32xf32>
    %208 = vector.multi_reduction <add>, %205, %cst_61 [1] : vector<32x128xf32> to vector<32xf32>
    %209 = vector.shape_cast %208 : vector<32xf32> to vector<32x1xf32>
    %cst_62 = arith.constant 1.280000e+02 : f32
    %210 = vector.broadcast %cst_62 : f32 to vector<32x1xf32>
    %211 = arith.divf %209, %210 : vector<32x1xf32>
    %212 = arith.mulf %205, %205 : vector<32x128xf32>
    %cst_63 = arith.constant dense<0.000000e+00> : vector<32xf32>
    %213 = vector.multi_reduction <add>, %212, %cst_63 [1] : vector<32x128xf32> to vector<32xf32>
    %214 = vector.shape_cast %213 : vector<32xf32> to vector<32x1xf32>
    %cst_64 = arith.constant 1.280000e+02 : f32
    %215 = vector.broadcast %cst_64 : f32 to vector<32x1xf32>
    %216 = arith.divf %214, %215 : vector<32x1xf32>
    %217 = arith.mulf %211, %211 : vector<32x1xf32>
    %218 = arith.subf %216, %217 : vector<32x1xf32>
    %219 = vector.broadcast %211 : vector<32x1xf32> to vector<32x128xf32>
    %220 = arith.subf %205, %219 : vector<32x128xf32>
    %cst_65 = arith.constant 9.99999997E-7 : f32
    %221 = vector.broadcast %cst_65 : f32 to vector<32x1xf32>
    %222 = arith.addf %218, %221 : vector<32x1xf32>
    %223 = math.rsqrt %222 : vector<32x1xf32>
    %224 = vector.broadcast %223 : vector<32x1xf32> to vector<32x128xf32>
    %225 = arith.mulf %220, %224 : vector<32x128xf32>
    %226 = vector.broadcast %206 : vector<1x128xf32> to vector<32x128xf32>
    %227 = arith.mulf %225, %226 : vector<32x128xf32>
    %228 = vector.broadcast %207 : vector<1x128xf32> to vector<32x128xf32>
    %229 = arith.addf %227, %228 : vector<32x128xf32>
    %230 = arith.truncf %229 : vector<32x128xf32> to vector<32x128xbf16>
    %c1_66 = arith.constant 1 : index
    %c0_67 = arith.constant 0 : index
    %c0_68 = arith.constant 0 : index
    %231 = vector.load %arg6[%c1_66, %c0_67, %c0_68] : memref<2x128x256xbf16, #tpu.memory_space<vmem>>, vector<1x128x256xbf16>
    %232 = vector.shape_cast %231 : vector<1x128x256xbf16> to vector<128x256xbf16>
    %cst_69 = arith.constant dense<0.000000e+00> : vector<32x256xf32>
    %233 = tpu.matmul %230, %232, %cst_69 {dimension_numbers = #tpu.dot_dimension_numbers<[1], [0], [0], [1], [0, 0, 1, 1], [], []>} : vector<32x128xbf16>, vector<128x256xbf16>, vector<32x256xf32> -> vector<32x256xf32>
    %234 = vector.extract_strided_slice %135 {offsets = [6, 0], sizes = [1, 256], strides = [1, 1]} : vector<8x384xf32> to vector<1x256xf32>
    %235 = vector.broadcast %234 : vector<1x256xf32> to vector<32x256xf32>
    %236 = arith.addf %233, %235 : vector<32x256xf32>
    %cst_70 = arith.constant 5.000000e-01 : f32
    %237 = vector.broadcast %cst_70 : f32 to vector<32x256xf32>
    %238 = arith.mulf %237, %236 : vector<32x256xf32>
    %cst_71 = arith.constant 4.471500e-02 : f32
    %239 = vector.broadcast %cst_71 : f32 to vector<32x256xf32>
    %240 = arith.mulf %239, %236 : vector<32x256xf32>
    %241 = arith.mulf %240, %236 : vector<32x256xf32>
    %242 = arith.mulf %241, %236 : vector<32x256xf32>
    %243 = arith.addf %236, %242 : vector<32x256xf32>
    %cst_72 = arith.constant 0.797884583 : f32
    %244 = vector.broadcast %cst_72 : f32 to vector<32x256xf32>
    %245 = arith.mulf %244, %243 : vector<32x256xf32>
    %246 = math.tanh %245 : vector<32x256xf32>
    %cst_73 = arith.constant 1.000000e+00 : f32
    %247 = vector.broadcast %cst_73 : f32 to vector<32x256xf32>
    %248 = arith.addf %247, %246 : vector<32x256xf32>
    %249 = arith.mulf %238, %248 : vector<32x256xf32>
    %250 = arith.truncf %249 : vector<32x256xf32> to vector<32x256xbf16>
    %c1_74 = arith.constant 1 : index
    %c0_75 = arith.constant 0 : index
    %c0_76 = arith.constant 0 : index
    %251 = vector.load %arg7[%c1_74, %c0_75, %c0_76] : memref<2x256x128xbf16, #tpu.memory_space<vmem>>, vector<1x256x128xbf16>
    %252 = vector.shape_cast %251 : vector<1x256x128xbf16> to vector<256x128xbf16>
    %cst_77 = arith.constant dense<0.000000e+00> : vector<32x128xf32>
    %253 = tpu.matmul %250, %252, %cst_77 {dimension_numbers = #tpu.dot_dimension_numbers<[1], [0], [0], [1], [0, 0, 1, 1], [], []>} : vector<32x256xbf16>, vector<256x128xbf16>, vector<32x128xf32> -> vector<32x128xf32>
    %254 = vector.extract_strided_slice %135 {offsets = [7, 0], sizes = [1, 128], strides = [1, 1]} : vector<8x384xf32> to vector<1x128xf32>
    %255 = vector.broadcast %254 : vector<1x128xf32> to vector<32x128xf32>
    %256 = arith.addf %253, %255 : vector<32x128xf32>
    %257 = arith.addf %205, %256 : vector<32x128xf32>
    %c0_78 = arith.constant 0 : index
    %c0_79 = arith.constant 0 : index
    %258 = vector.load %arg8[%c0_78, %c0_79] : memref<32x128xf32, #tpu.memory_space<vmem>>, vector<32x128xf32>
    tpu.vector_store %arg8[%c0_78, %c0_79], %257 {strides = array<i32>} : memref<32x128xf32, #tpu.memory_space<vmem>>, vector<32x128xf32>,
    return
  }
}

</mosaic_0001>

<bundles_post_ra>
// kernel: siglip_vision_tower_forward.1
= control target key start
LH: loop header
LB: loop body
LE: loop exit
PB: predicated region body
PF: predicated region fallthrough
CT: control target
= control target key end

     0   :  { %v12816_v1 = vmov 0   ;;  %vm139_vm0 = vcmask 523264   ;;  %s12805_s0 = inlined_call_operand.vmem [shape: f32[32,192], index: 0, kind: input, shape index: {}]   ;;  %s12806_s1 = inlined_call_operand.vmem [shape: bf16[192,128], index: 1, kind: input, shape index: {}]   ;;  %s12807_s2 = inlined_call_operand.vmem [shape: f32[16,128], index: 2, kind: input, shape index: {}]   ;;  %s12808_s3 = inlined_call_operand.vmem [shape: f32[2,8,384], index: 3, kind: input, shape index: {}]   ;;  %s12809_s4 = inlined_call_operand.vmem [shape: bf16[2,128,384], index: 4, kind: input, shape index: {}]   ;;  %s12810_s5 = inlined_call_operand.vmem [shape: bf16[2,128,128], index: 5, kind: input, shape index: {}]   ;;  %s12811_s6 = inlined_call_operand.vmem [shape: bf16[2,128,256], index: 6, kind: input, shape index: {}]   ;;  %s12812_s7 = inlined_call_operand.vmem [shape: bf16[2,256,128], index: 7, kind: input, shape index: {}]   ;;  %s12813_s8 = inlined_call_operand.hbm [shape: f32[32,128], index: 8, kind: output, shape index: {}]  }
   0x1   :  { %v9570_v0 = vld [vmem:[%s12806_s1] sm:$0xff]   ;;  %146 = vmatprep.subr.bf16.mxu0 %v12816_v1  ;;  %479 = vmatprep.mubr.bf16.mxu1 %v12816_v1  ;;  %v9571_v2 = vld [vmem:[%s12806_s1 + $0x8] sm:$0xff]   ;;  %v9572_v3 = vld [vmem:[%s12806_s1 + $0x10] sm:$0xff]  }
   0x2   :  { %147 = vmatpush1.bf16.msra.mxu0 %v9570_v0  ;;  %v9573_v4 = vld [vmem:[%s12806_s1 + $0x18] sm:$0xff]   ;;  %v32_v5 = vld [vmem:[%s12805_s0 + $0x8] sm:$0xff]  ;;  %v9574_v8 = vld [vmem:[%s12806_s1 + $0x20] sm:$0xff]  }
   0x3   :  { %148 = vmatprep.subr.bf16.mxu0 %v12816_v1  ;;  %v34_v6 = vld [vmem:[%s12805_s0 + $0x18] sm:$0xff]  ;;  %v9575_v9 = vld [vmem:[%s12806_s1 + $0x28] sm:$0xff]   ;;  %v9576_v10 = vld [vmem:[%s12806_s1 + $0x30] sm:$0xff]  }
   0x4   :  { %v40_v7 = vpack.c.bf16 %v34_v6, %v32_v5  ;;  %v9577_v11 = vld [vmem:[%s12806_s1 + $0x38] sm:$0xff]   ;;  %v9578_v12 = vld [vmem:[%s12806_s1 + $0x40] sm:$0xff]   ;;  %v9579_v13 = vld [vmem:[%s12806_s1 + $0x48] sm:$0xff]  }
   0x5   :  { %v9580_v14 = vld [vmem:[%s12806_s1 + $0x50] sm:$0xff]   ;;  %v9581_v15 = vld [vmem:[%s12806_s1 + $0x58] sm:$0xff]   ;;  %v31_v16 = vld [vmem:[%s12805_s0] sm:$0xff] }
   0x6   :  { %149 = vmatpush1.bf16.msra.mxu0 %v9571_v2  ;;  %8742 = vmatprep.mubr.msk.bf16.mxu0 %vm139_vm0, %v40_v7  ;;  %v33_v17 = vld [vmem:[%s12805_s0 + $0x10] sm:$0xff]  ;;  %v36_v18 = vld [vmem:[%s12805_s0 + $0x28] sm:$0xff]  ;;  %v38_v19 = vld [vmem:[%s12805_s0 + $0x38] sm:$0xff] }
   0x7   :  { %150 = vmatprep.subr.bf16.mxu0 %v12816_v1  ;;  %v39_v20 = vpack.c.bf16 %v33_v17, %v31_v16  ;;  %v42_v21 = vpack.c.bf16 %v38_v19, %v36_v18  ;;  %v35_v22 = vld [vmem:[%s12805_s0 + $0x20] sm:$0xff]  ;;  %v37_v23 = vld [vmem:[%s12805_s0 + $0x30] sm:$0xff] }
   0x8   :  { %v41_v24 = vpack.c.bf16 %v37_v23, %v35_v22 }
   0xa   :  { %151 = vmatpush1.bf16.msra.mxu0 %v9572_v3 }
   0xb   :  { %152 = vmatprep.subr.bf16.mxu0 %v12816_v1 }
   0xe   :  { %153 = vmatpush1.bf16.msra.mxu0 %v9573_v4 }
   0xf   :  { %154 = vmatprep.subr.bf16.mxu0 %v12816_v1 }
  0x12   :  { %155 = vmatpush1.bf16.msra.mxu0 %v9574_v8 }
  0x13   :  { %156 = vmatprep.subr.bf16.mxu0 %v12816_v1 }
  0x16   :  { %157 = vmatpush1.bf16.msra.mxu0 %v9575_v9 }
  0x17   :  { %158 = vmatprep.subr.bf16.mxu0 %v12816_v1 }
  0x1a   :  { %159 = vmatpush1.bf16.msra.mxu0 %v9576_v10 }
  0x1b   :  { %160 = vmatprep.subr.bf16.mxu0 %v12816_v1 }
  0x1e   :  { %161 = vmatpush1.bf16.msra.mxu0 %v9577_v11 }
  0x1f   :  { %162 = vmatprep.subr.bf16.mxu0 %v12816_v1 }
  0x22   :  { %163 = vmatpush1.bf16.msra.mxu0 %v9578_v12 }
  0x23   :  { %164 = vmatprep.subr.bf16.mxu0 %v12816_v1 }
  0x26   :  { %165 = vmatpush1.bf16.msra.mxu0 %v9579_v13 }
  0x27   :  { %166 = vmatprep.subr.bf16.mxu0 %v12816_v1 }
  0x2a   :  { %167 = vmatpush1.bf16.msra.mxu0 %v9580_v14 }
  0x2b   :  { %168 = vmatprep.subr.bf16.mxu0 %v12816_v1 }
  0x2e   :  { %169 = vmatpush1.bf16.msra.mxu0 %v9581_v15 }
  0x31   :  { %179 = vmatmul.mubr.bf16.vlgmr.msra.gmra.mrb[0].mxu0 %v39_v20 }
  0x32   :  { %8743 = vmatprep.mubr.msk.bf16.mxu0 %vm139_vm0, %v42_v21 }
  0x39   :  { %187 = vmatmul.mubr.bf16.gmra.mrb[4].mxu0 %v41_v24 }
  0x3a   :  { %13 = vsyncpa [#allocation3], 0  ;;  %v9582_v25 = vld [vmem:[%s12809_s4 + $0x4] ss:$12 sps:$4 sm:$0xff]   ;;  %v9584_v26 = vld [vmem:[%s12809_s4] ss:$12 sps:$4 sm:$0xff]   ;;  %v257_v10 = vlaneseq }
  0x3b   :  { %447 = vmatprep.subr.bf16.mxu1 %v9582_v25  ;;  %v195_v27 = vld [vmem:[%s12807_s2] sm:$0xff]  ;;  %v196_v29 = vld [vmem:[%s12807_s2 + $0x8] sm:$0xff]  ;;  %v9590_v48 = vld [vmem:[%s12809_s4 + $0x30] ss:$12 sps:$4 sm:$0xff]   ;;  %s9963_s0 = smov 96   ;;  %s9964_s28 = smov 64  }
  0x3c   :  { %448 = vmatpush1.bf16.msra.mxu1 %v9584_v26  ;;  %v9585_v45 = vld [vmem:[%s12809_s4 + $0x1c] ss:$12 sps:$4 sm:$0xff]   ;;  %v9587_v46 = vld [vmem:[%s12809_s4 + $0x18] ss:$12 sps:$4 sm:$0xff]   ;;  %v9588_v47 = vld [vmem:[%s12809_s4 + $0x34] ss:$12 sps:$4 sm:$0xff]  }
  0x3d   :  { %449 = vmatprep.subr.bf16.mxu1 %v9585_v45  ;;  %v9591_v49 = vld [vmem:[%s12809_s4 + $0x4c] ss:$12 sps:$4 sm:$0xff]   ;;  %v9593_v50 = vld [vmem:[%s12809_s4 + $0x48] ss:$12 sps:$4 sm:$0xff]   ;;  %v9594_v51 = vld [vmem:[%s12809_s4 + $0x64] ss:$12 sps:$4 sm:$0xff]  }
  0x3e   :  { %v9596_v52 = vld [vmem:[%s12809_s4 + $0x60] ss:$12 sps:$4 sm:$0xff]   ;;  %v9597_v53 = vld [vmem:[%s12809_s4 + $0x7c] ss:$12 sps:$4 sm:$0xff]   ;;  %v9599_v54 = vld [vmem:[%s12809_s4 + $0x78] ss:$12 sps:$4 sm:$0xff]  }
  0x3f   :  { %v9600_v55 = vld [vmem:[%s12809_s4 + $0x94] ss:$12 sps:$4 sm:$0xff]   ;;  %v9602_v56 = vld [vmem:[%s12809_s4 + $0x90] ss:$12 sps:$4 sm:$0xff]   ;;  %v9603_v57 = vld [vmem:[%s12809_s4 + $0xac] ss:$12 sps:$4 sm:$0xff]  }
  0x40   :  { %450 = vmatpush1.bf16.msra.mxu1 %v9587_v46  ;;  %v9605_v58 = vld [vmem:[%s12809_s4 + $0xa8] ss:$12 sps:$4 sm:$0xff]   ;;  %v10170_v18 = vshrl.u32 %v257_v10, 7  ;;  %s9965_s2 = smov 32   ;;  %vm9967_vm1 = vmmov 0   ;;  %vm2325_vm2 = vcmask 261120  }
  0x41   :  { %451 = vmatprep.subr.bf16.mxu1 %v9588_v47  ;;  %v9606_v59 = vld [vmem:[%s12809_s4 + $0x8] ss:$12 sps:$4 sm:$0xff]   ;;  %vm2702_vm3 = vcmask 130048   ;;  %vm3839_vm4 = vcmask 785408  }
  0x42   :  { %v12815_v24 = vsub.s32 0, %v10170_v18 }
  0x44   :  { %452 = vmatpush1.bf16.msra.mxu1 %v9590_v48 }
  0x45   :  { %453 = vmatprep.subr.bf16.mxu1 %v9591_v49 }
  0x48   :  { %454 = vmatpush1.bf16.msra.mxu1 %v9593_v50  ;;  %v9607_v50 = vld [vmem:[%s12809_s4 + $0x20] ss:$12 sps:$4 sm:$0xff]  }
  0x49   :  { %455 = vmatprep.subr.bf16.mxu1 %v9594_v51 }
  0x4c   :  { %456 = vmatpush1.bf16.msra.mxu1 %v9596_v52 }
  0x4d   :  { %457 = vmatprep.subr.bf16.mxu1 %v9597_v53 }
  0x50   :  { %458 = vmatpush1.bf16.msra.mxu1 %v9599_v54 }
  0x51   :  { %459 = vmatprep.subr.bf16.mxu1 %v9600_v55  ;;  %v9608_v55 = vld [vmem:[%s12809_s4 + $0x38] ss:$12 sps:$4 sm:$0xff]  }
  0x54   :  { %460 = vmatpush1.bf16.msra.mxu1 %v9602_v56 }
  0x55   :  { %461 = vmatprep.subr.bf16.mxu1 %v9603_v57 }
  0x58   :  { %462 = vmatpush1.bf16.msra.mxu1 %v9605_v58 }
  0x59   :  { %9227 = vmatprep.subr.bf16.mxu1 %v9606_v59 }
 0x104   :  { %v180_v28 = vpop.f32.mrb[0].mxu0 }
 0x105   :  { %v10105_v30 = vadd.f32 %v195_v27, %v180_v28  ;;  %v182_v31 = vpop.f32.mrb[1].mxu0 }
 0x106   :  { %v183_v32 = vpop.f32.mrb[2].mxu0 }
 0x107   :  { %v10107_v33 = vadd.f32 %v196_v29, %v183_v32  ;;  %204 = vadd.xlane.f32.xlu0 %v10105_v30  ;;  %v185_v34 = vpop.f32.mrb[3].mxu0  ;;  %v217_v35 = vmul.f32 %v10105_v30, %v10105_v30 }
 0x109   :  { %221 = vadd.xlane.f32.xlu1 %v217_v35  ;;  %v218_v36 = vmul.f32 %v10107_v33, %v10107_v33  ;;  %v12814_v35 = vsub.s32 1, %v10170_v18 }
 0x10b   :  { %206 = vadd.xlane.f32.xlu0 %v10107_v33 }
 0x10c   :  { %v188_v37 = vpop.f32.mrb[4].mxu0 }
 0x10d   :  { %v10115_v38 = vadd.f32 %v195_v27, %v188_v37  ;;  %223 = vadd.xlane.f32.xlu1 %v218_v36  ;;  %v190_v39 = vpop.f32.mrb[5].mxu0  ;;  %v201_v27 = vld [vmem:[%s12808_s3] sm:$0xff] }
 0x10e   :  { %v191_v40 = vpop.f32.mrb[6].mxu0  ;;  %v260_v34 = vrot.slane %v201_v27, %v12815_v24 }
 0x10f   :  { %v10117_v41 = vadd.f32 %v196_v29, %v191_v40  ;;  %208 = vadd.xlane.f32.xlu0 %v10115_v38  ;;  %v219_v42 = vmul.f32 %v10115_v38, %v10115_v38  ;;  %v193_v43 = vpop.f32.mrb[7].mxu0 }
 0x111   :  { %210 = vadd.xlane.f32.xlu1 %v10117_v41  ;;  %v220_v44 = vmul.f32 %v10117_v41, %v10117_v41 }
 0x113   :  { %225 = vadd.xlane.f32.xlu0 %v219_v42  ;;  %v268_v42 = vrot.slane %v201_v27, %v12814_v35 }
 0x115   :  { %227 = vadd.xlane.f32.xlu1 %v220_v44 }
 0x194   :  { %v205_v60 = vpop.xlane.xlu0 %204 }
 0x195   :  { %v213_v61 = vmul.f32 0.0078125, %v205_v60 }
 0x196   :  { %v222_v62 = vpop.xlane.xlu1 %221 }
 0x197   :  { %v233_v63 = vmul.f32 %v213_v61, %v213_v61  ;;  %v229_v0 = vmul.f32 0.0078125, %v222_v62  ;;  %v241_v28 = vsub.f32 %v10105_v30, %v213_v61  ;;  %v9609_v61 = vld [vmem:[%s12809_s4 + $0x50] ss:$12 sps:$4 sm:$0xff]   ;;  %v9611_v62 = vld [vmem:[%s12809_s4 + $0x80] ss:$12 sps:$4 sm:$0xff]  }
 0x198   :  { %v207_v2 = vpop.xlane.xlu0 %206 }
 0x199   :  { %v237_v3 = vsub.f32 %v229_v0, %v233_v63  ;;  %v214_v4 = vmul.f32 0.0078125, %v207_v2  ;;  %v9612_v63 = vld [vmem:[%s12809_s4 + $0x98] ss:$12 sps:$4 sm:$0xff]   ;;  %v9613_v0 = vld [vmem:[%s12809_s4 + $0xb0] ss:$12 sps:$4 sm:$0xff]   ;;  %v10208_v2 = vsub.s32 2, %v10170_v18 }
 0x19a   :  { %v224_v5 = vpop.xlane.xlu1 %223 }
 0x19b   :  { %v245_v6 = vadd.f32 1e-06, %v237_v3  ;;  %v234_v7 = vmul.f32 %v214_v4, %v214_v4  ;;  %v230_v8 = vmul.f32 0.0078125, %v224_v5  ;;  %v242_v36 = vsub.f32 %v10107_v33, %v214_v4  ;;  %v202_v3 = vld [vmem:[%s12808_s3 + $0x8] sm:$0xff] }
 0x19c   :  { %v209_v9 = vpop.xlane.xlu0 %208  ;;  %v310_v4 = vrot.slane %v201_v27, %v10208_v2  ;;  %v314_v5 = vrot.slane %v202_v3, %v10208_v2 }
 0x19d   :  { %9742 = vrsqrt.f32 %v245_v6  ;;  %v238_v11 = vsub.f32 %v230_v8, %v234_v7  ;;  %v215_v12 = vmul.f32 0.0078125, %v209_v9 }
 0x19e   :  { %v211_v13 = vpop.xlane.xlu1 %210 }
 0x19f   :  { %v246_v14 = vadd.f32 1e-06, %v238_v11  ;;  %v235_v15 = vmul.f32 %v215_v12, %v215_v12  ;;  %v216_v16 = vmul.f32 0.0078125, %v211_v13  ;;  %v243_v44 = vsub.f32 %v10115_v38, %v215_v12 }
 0x1a0   :  { %v226_v17 = vpop.xlane.xlu0 %225 }
 0x1a1   :  { %9744 = vrsqrt.f32 %v246_v14  ;;  %v236_v19 = vmul.f32 %v216_v16, %v216_v16  ;;  %v231_v20 = vmul.f32 0.0078125, %v226_v17  ;;  %v244_v48 = vsub.f32 %v10117_v41, %v216_v16 }
 0x1a2   :  { %v228_v21 = vpop.xlane.xlu1 %227 }
 0x1a3   :  { %v239_v22 = vsub.f32 %v231_v20, %v235_v15  ;;  %v232_v23 = vmul.f32 0.0078125, %v228_v21  ;;  %v203_v21 = vld [vmem:[%s12808_s3 + $0x10] sm:$0xff] }
 0x1a5   :  { %v247_v25 = vadd.f32 1e-06, %v239_v22  ;;  %v240_v26 = vsub.f32 %v232_v23, %v236_v19  ;;  %v318_v22 = vrot.slane %v203_v21, %v10208_v2 }
 0x1a7   :  { %v9743_v29 = vpop.eup %9742  ;;  %9746 = vrsqrt.f32 %v247_v25  ;;  %v248_v31 = vadd.f32 1e-06, %v240_v26 }
 0x1a8   :  { %v253_v32 = vmul.f32 %v9743_v29, %v241_v28 }
 0x1a9   :  { %9748 = vrsqrt.f32 %v248_v31  ;;  %v12818_v31 = vmov 0.0  }
 0x1aa   :  { %v261_v40 = vmul.f32 %v260_v34, %v253_v32  ;;  %9265 = vmatprep.subr.bf16.mxu0 %v12818_v31  ;;  %9267 = vmatprep.mubr.msk.bf16.mxu0 %vm9967_vm1, %v12818_v31 }
 0x1ab   :  { %v9745_v37 = vpop.eup %9744 }
 0x1ac   :  { %v254_v39 = vmul.f32 %v9745_v37, %v242_v36  ;;  %v269_v45 = vadd.f32 %v268_v42, %v261_v40 }
 0x1ae   :  { %v262_v43 = vmul.f32 %v260_v34, %v254_v39  ;;  %v9968_v39 = vmov 1983009808  }
 0x1af   :  { %v592_v40 = vunpack.c.l.s4 %v9968_v39 }
 0x1b0   :  { %v270_v46 = vadd.f32 %v268_v42, %v262_v43 }
 0x1b1   :  { %v9747_v47 = vpop.eup %9746 }
 0x1b2   :  { %v273_v49 = vpack.c.bf16 %v270_v46, %v269_v45  ;;  %v255_v51 = vmul.f32 %v9747_v47, %v243_v44  ;;  %v9969_v44 = vmov 1934713408   ;;  %v593_v46 = vunpack.c.0.s8 %v592_v40 }
 0x1b3   :  { %v9749_v52 = vpop.eup %9748  ;;  %v624_v45 = vunpack.c.l.s4 %v9969_v44 }
 0x1b4   :  { %480 = vmatmul.mubr.bf16.vlgmr.msra.gmra.mrb[0].mxu1 %v273_v49  ;;  %v256_v53 = vmul.f32 %v9749_v52, %v244_v48  ;;  %v263_v54 = vmul.f32 %v260_v34, %v255_v51 }
 0x1b5   :  { %9228 = vmatpush3.bf16.msra.mxu1 %v9606_v59  ;;  %489 = vmatprep.mubr.bf16.mxu1 %v12816_v1  ;;  %v9610_v59 = vld [vmem:[%s12809_s4 + $0x68] ss:$12 sps:$4 sm:$0xff]  }
 0x1b6   :  { %9229 = vmatprep.subr.bf16.mxu1 %v9607_v50  ;;  %v264_v56 = vmul.f32 %v260_v34, %v256_v53  ;;  %v271_v57 = vadd.f32 %v268_v42, %v263_v54 }
 0x1b8   :  { %v272_v58 = vadd.f32 %v268_v42, %v264_v56 }
 0x1b9   :  { %9230 = vmatpush3.bf16.msra.mxu1 %v9607_v50  ;;  %v10312_v50 = vsub.s32 %v593_v46, %v10170_v18 }
 0x1ba   :  { %9231 = vmatprep.subr.bf16.mxu1 %v9608_v55  ;;  %v274_v60 = vpack.c.bf16 %v272_v58, %v271_v57 }
 0x1bc   :  { %490 = vmatmul.mubr.bf16.gmra.mrb[4].mxu1 %v274_v60 }
 0x1bd   :  { %9232 = vmatpush3.bf16.msra.mxu1 %v9608_v55  ;;  %9243 = vmatprep.mubr.bf16.mxu1 %v273_v49  ;;  %v625_v49 = vunpack.c.0.s8 %v624_v45 }
 0x1be   :  { %9233 = vmatprep.subr.bf16.mxu1 %v9609_v61 }
 0x1bf   :  { %v10317_v57 = vsub.s32 %v625_v49, %v10170_v18 }
 0x1c1   :  { %9234 = vmatpush3.bf16.msra.mxu1 %v9609_v61 }
 0x1c2   :  { %9235 = vmatprep.subr.bf16.mxu1 %v9610_v59 }
 0x1c5   :  { %9236 = vmatpush3.bf16.msra.mxu1 %v9610_v59 }
 0x1c6   :  { %9237 = vmatprep.subr.bf16.mxu1 %v9611_v62 }
 0x1c9   :  { %9238 = vmatpush3.bf16.msra.mxu1 %v9611_v62 }
 0x1ca   :  { %9239 = vmatprep.subr.bf16.mxu1 %v9612_v63 }
 0x1cd   :  { %9240 = vmatpush3.bf16.msra.mxu1 %v9612_v63 }
 0x1ce   :  { %9241 = vmatprep.subr.bf16.mxu1 %v9613_v0 }
 0x1d1   :  { %9242 = vmatpush3.bf16.msra.mxu1 %v9613_v0 }
 0x1d2   :  { %9247 = vmatprep.subr.bf16.mxu1 %v12818_v31 }
 0x1d4   :  { %9244 = vmatmul.mubr.bf16.vlgmr.msra.gmra.mrb[8].mxu1 %v274_v60 }
 0x1d5   :  { %9249 = vmatprep.mubr.msk.bf16.mxu1 %vm9967_vm1, %v12818_v31 }
 0x287   :  { %v481_v6 = vpop.f32.mrb[0].mxu1 }
 0x288   :  { %v10215_v7 = vadd.f32 %v481_v6, %v310_v4  ;;  %v483_v8 = vpop.f32.mrb[1].mxu1 }
 0x289   :  { %v10217_v9 = vadd.f32 %v483_v8, %v314_v5  ;;  %v485_v10 = vpop.f32.mrb[2].mxu1 }
 0x28a   :  { %v487_v11 = vpop.f32.mrb[3].mxu1  ;;  %553 = vrot.lane.b32.xlu0 %v10215_v7, %s9963_s0  ;;  %v10223_v12 = vadd.f32 %v485_v10, %v310_v4 }
 0x28b   :  { %1157 = vrot.lane.b32.xlu1 %v10217_v9, %s9964_s28  ;;  %v10229_v15 = vadd.f32 %v487_v11, %v314_v5 }
 0x28e   :  { %1145 = vrot.lane.b32.xlu0 %v10217_v9, %s9963_s0 }
 0x28f   :  { %555 = vrot.lane.b32.xlu1 %v10223_v12, %s9963_s0  ;;  %v491_v13 = vpop.f32.mrb[4].mxu1 }
 0x290   :  { %v493_v14 = vpop.f32.mrb[5].mxu1  ;;  %v10243_v19 = vadd.f32 %v491_v13, %v310_v4 }
 0x291   :  { %v495_v16 = vpop.f32.mrb[6].mxu1  ;;  %v10249_v20 = vadd.f32 %v493_v14, %v314_v5 }
 0x292   :  { %1169 = vrot.lane.b32.xlu0 %v10217_v9, %s9965_s2  ;;  %v497_v17 = vpop.f32.mrb[7].mxu1  ;;  %v10259_v23 = vadd.f32 %v495_v16, %v310_v4 }
 0x293   :  { %1147 = vrot.lane.b32.xlu1 %v10229_v15, %s9963_s0  ;;  %v10267_v28 = vadd.f32 %v497_v17, %v314_v5 }
 0x296   :  { %565 = vrot.lane.b32.xlu0 %v10215_v7, %s9964_s28 }
 0x297   :  { %1159 = vrot.lane.b32.xlu1 %v10229_v15, %s9964_s28 }
 0x29a   :  { %577 = vrot.lane.b32.xlu0 %v10215_v7, %s9965_s2 }
 0x29b   :  { %1171 = vrot.lane.b32.xlu1 %v10229_v15, %s9965_s2 }
 0x29e   :  { %557 = vrot.lane.b32.xlu0 %v10243_v19, %s9963_s0 }
 0x29f   :  { %567 = vrot.lane.b32.xlu1 %v10223_v12, %s9964_s28 }
 0x2a2   :  { %1149 = vrot.lane.b32.xlu0 %v10249_v20, %s9963_s0 }
 0x2a3   :  { %579 = vrot.lane.b32.xlu1 %v10223_v12, %s9965_s2 }
 0x2a6   :  { %1161 = vrot.lane.b32.xlu0 %v10249_v20, %s9964_s28 }
 0x2a7   :  { %v9245_v25 = vpop.f32.mrb[8].mxu1  ;;  %559 = vrot.lane.b32.xlu1 %v10259_v23, %s9963_s0 }
 0x2a8   :  { %v10265_v26 = vadd.f32 %v9245_v25, %v318_v22  ;;  %v534_v27 = vpop.f32.mrb[9].mxu1 }
 0x2a9   :  { %v9246_v29 = vpop.f32.mrb[10].mxu1  ;;  %v10285_v36 = vadd.f32 %v534_v27, %v318_v22 }
 0x2aa   :  { %v10271_v32 = vadd.f32 %v9246_v29, %v318_v22  ;;  %v537_v34 = vpop.f32.mrb[11].mxu1  ;;  %1173 = vrot.lane.b32.xlu0 %v10249_v20, %s9965_s2 }
 0x2ab   :  { %1151 = vrot.lane.b32.xlu1 %v10267_v28, %s9963_s0  ;;  %v10301_v37 = vadd.f32 %v537_v34, %v318_v22 }
 0x2ae   :  { %569 = vrot.lane.b32.xlu0 %v10243_v19, %s9964_s28 }
 0x2af   :  { %1163 = vrot.lane.b32.xlu1 %v10267_v28, %s9964_s28 }
 0x2b2   :  { %581 = vrot.lane.b32.xlu0 %v10243_v19, %s9965_s2 }
 0x2b3   :  { %1175 = vrot.lane.b32.xlu1 %v10267_v28, %s9965_s2 }
 0x2b6   :  { %1737 = vrot.lane.b32.xlu0 %v10285_v36, %s9963_s0 }
 0x2b7   :  { %571 = vrot.lane.b32.xlu1 %v10259_v23, %s9964_s28 }
 0x2ba   :  { %1761 = vrot.lane.b32.xlu0 %v10285_v36, %s9965_s2 }
 0x2bb   :  { %583 = vrot.lane.b32.xlu1 %v10259_v23, %s9965_s2 }
 0x2bf   :  { %1749 = vrot.lane.b32.xlu1 %v10285_v36, %s9964_s28 }
 0x2c3   :  { %1739 = vrot.lane.b32.xlu1 %v10301_v37, %s9963_s0 }
 0x2c7   :  { %1751 = vrot.lane.b32.xlu1 %v10301_v37, %s9964_s28 }
 0x2cb   :  { %1763 = vrot.lane.b32.xlu1 %v10301_v37, %s9965_s2 }
 0x2fc   :  { %v554_v42 = vpop.permute.xlu0 %553 }
 0x2fd   :  { %v1158_v43 = vpop.permute.xlu1 %1157 }
 0x2fe   :  { %v1181_v51 = vcombine.low %v10217_v9, %v1158_v43  ;;  %v1182_v52 = vcombine.high %v10217_v9, %v1158_v43 }
 0x300   :  { %v1146_v47 = vpop.permute.xlu0 %1145  ;;  %v1189_v58 = vrot.slane %v1181_v51, %v10312_v50  ;;  %v1196_v60 = vrot.slane %v1182_v52, %v10312_v50 }
 0x301   :  { %v10309_v48 = vpop.permute.xlu1 %555 }
 0x304   :  { %v1170_v53 = vpop.permute.xlu0 %1169 }
 0x305   :  { %v1197_v54 = vcombine.low %v1146_v47, %v1170_v53  ;;  %v1198_v55 = vcombine.high %v1146_v47, %v1170_v53  ;;  %v1148_v56 = vpop.permute.xlu1 %1147 }
 0x307   :  { %v1205_v61 = vrot.slane %v1197_v54, %v10312_v50  ;;  %v1212_v59 = vrot.slane %v1198_v55, %v10312_v50 }
 0x308   :  { %v566_v62 = vpop.permute.xlu0 %565 }
 0x309   :  { %v1213_v63 = vcombine.low %v1189_v58, %v1205_v61  ;;  %v1214_v0 = vcombine.high %v1189_v58, %v1205_v61  ;;  %v1229_v3 = vcombine.low %v1196_v60, %v1212_v59  ;;  %v1230_v4 = vcombine.high %v1196_v60, %v1212_v59  ;;  %v1160_v5 = vpop.permute.xlu1 %1159 }
 0x30a   :  { %v589_v6 = vcombine.low %v10215_v7, %v566_v62  ;;  %v590_v8 = vcombine.high %v10215_v7, %v566_v62  ;;  %v1249_v9 = vcombine.low %v10229_v15, %v1160_v5  ;;  %v1250_v10 = vcombine.high %v10229_v15, %v1160_v5 }
 0x30b   :  { %v1221_v11 = vrot.slane %v1213_v63, %v10317_v57  ;;  %v1228_v13 = vrot.slane %v1214_v0, %v10317_v57  ;;  %v1237_v14 = vrot.slane %v1229_v3, %v10317_v57  ;;  %v1244_v16 = vrot.slane %v1230_v4, %v10317_v57 }
 0x30c   :  { %v578_v17 = vpop.permute.xlu0 %577  ;;  %v597_v15 = vrot.slane %v589_v6, %v10312_v50  ;;  %v604_v43 = vrot.slane %v590_v8, %v10312_v50  ;;  %v1257_v44 = vrot.slane %v1249_v9, %v10312_v50  ;;  %v1264_v45 = vrot.slane %v1250_v10, %v10312_v50 }
 0x30d   :  { %v1453_v21 = vcombine.low %v1221_v11, %v1228_v13  ;;  %v8776_v22 = vcombine.high %v1221_v11, %v1228_v13  ;;  %v1469_v25 = vcombine.low %v1237_v14, %v1244_v16  ;;  %v8777_v27 = vcombine.high %v1237_v14, %v1244_v16  ;;  %v1172_v29 = vpop.permute.xlu1 %1171 }
 0x30e   :  { %v605_v34 = vcombine.low %v554_v42, %v578_v17  ;;  %v606_v7 = vcombine.high %v554_v42, %v578_v17  ;;  %v1265_v39 = vcombine.low %v1148_v56, %v1172_v29  ;;  %v1266_v40 = vcombine.high %v1148_v56, %v1172_v29 }
 0x30f   :  { %v10342_v53 = vrot.slane %v1453_v21, %v10312_v50  ;;  %v10345_v54 = vrot.slane %v8776_v22, %v10312_v50  ;;  %v10348_v55 = vrot.slane %v1469_v25, %v10312_v50  ;;  %v10351_v56 = vrot.slane %v8777_v27, %v10312_v50 }
 0x310   :  { %v613_v46 = vrot.slane %v605_v34, %v10312_v50  ;;  %v620_v47 = vrot.slane %v606_v7, %v10312_v50  ;;  %v1273_v49 = vrot.slane %v1265_v39, %v10312_v50  ;;  %v1280_v51 = vrot.slane %v1266_v40, %v10312_v50  ;;  %v10339_v52 = vpop.permute.xlu0 %557 }
 0x311   :  { %v568_v42 = vpop.permute.xlu1 %567  ;;  %v1485_v27 = vcombine.low %v10342_v53, %v10345_v54  ;;  %v1501_v29 = vcombine.low %v10348_v55, %v10351_v56  ;;  %v1486_v34 = vcombine.high %v10342_v53, %v10345_v54  ;;  %v1502_v7 = vcombine.high %v10348_v55, %v10351_v56 }
 0x312   :  { %v621_v58 = vcombine.low %v597_v15, %v613_v46  ;;  %v622_v60 = vcombine.high %v597_v15, %v613_v46  ;;  %v637_v61 = vcombine.low %v604_v43, %v620_v47  ;;  %v638_v59 = vcombine.high %v604_v43, %v620_v47 }
 0x313   :  { %v1281_v62 = vcombine.low %v1257_v44, %v1273_v49  ;;  %v1282_v63 = vcombine.high %v1257_v44, %v1273_v49  ;;  %v1297_v0 = vcombine.low %v1264_v45, %v1280_v51  ;;  %v1298_v3 = vcombine.high %v1264_v45, %v1280_v51 }
 0x314   :  { %v629_v4 = vrot.slane %v621_v58, %v10317_v57  ;;  %v636_v5 = vrot.slane %v622_v60, %v10317_v57  ;;  %v645_v6 = vrot.slane %v637_v61, %v10317_v57  ;;  %v652_v8 = vrot.slane %v638_v59, %v10317_v57  ;;  %v1150_v9 = vpop.permute.xlu0 %1149 }
 0x315   :  { %v10358_v10 = vrot.slane %v1281_v62, %v10317_v57  ;;  %v10361_v11 = vrot.slane %v1282_v63, %v10317_v57  ;;  %v10364_v13 = vrot.slane %v1297_v0, %v10317_v57  ;;  %v10367_v14 = vrot.slane %v1298_v3, %v10317_v57  ;;  %v580_v16 = vpop.permute.xlu1 %579 }
 0x316   :  { %v861_v17 = vcombine.low %v629_v4, %v636_v5  ;;  %v8768_v21 = vcombine.high %v629_v4, %v636_v5  ;;  %v877_v22 = vcombine.low %v645_v6, %v652_v8  ;;  %v8769_v25 = vcombine.high %v645_v6, %v652_v8 }
 0x317   :  { %v1521_v15 = vcombine.low %v10358_v10, %v10361_v11  ;;  %v8778_v43 = vcombine.high %v10358_v10, %v10361_v11  ;;  %v657_v45 = vcombine.low %v10223_v12, %v568_v42  ;;  %v658_v46 = vcombine.high %v10223_v12, %v568_v42 }
 0x318   :  { %v10378_v39 = vrot.slane %v861_v17, %v10312_v50  ;;  %v10381_v40 = vrot.slane %v8768_v21, %v10312_v50  ;;  %v1162_v44 = vpop.permute.xlu0 %1161  ;;  %v673_v47 = vcombine.low %v10309_v48, %v580_v16  ;;  %v674_v49 = vcombine.high %v10309_v48, %v580_v16 }
 0x319   :  { %v10391_v51 = vpop.permute.xlu1 %559  ;;  %v10394_v58 = vrot.slane %v877_v22, %v10312_v50  ;;  %v10397_v60 = vrot.slane %v8769_v25, %v10312_v50  ;;  %v1537_v61 = vcombine.low %v10364_v13, %v10367_v14  ;;  %v8779_v59 = vcombine.high %v10364_v13, %v10367_v14 }
 0x31a   :  { %v665_v12 = vrot.slane %v657_v45, %v10312_v50  ;;  %v672_v42 = vrot.slane %v658_v46, %v10312_v50  ;;  %v681_v48 = vrot.slane %v673_v47, %v10312_v50  ;;  %v688_v62 = vrot.slane %v674_v49, %v10312_v50 }
 0x31b   :  { %v894_v0 = vcombine.high %v10378_v39, %v10381_v40  ;;  %v1317_v3 = vcombine.low %v10249_v20, %v1162_v44  ;;  %v1318_v4 = vcombine.high %v10249_v20, %v1162_v44  ;;  %v910_v25 = vcombine.high %v10394_v58, %v10397_v60 }
 0x31c   :  { %v1174_v5 = vpop.permute.xlu0 %1173  ;;  %v689_v6 = vcombine.low %v665_v12, %v681_v48  ;;  %v690_v8 = vcombine.high %v665_v12, %v681_v48  ;;  %v705_v16 = vcombine.low %v672_v42, %v688_v62  ;;  %v706_v17 = vcombine.high %v672_v42, %v688_v62 }
 0x31d   :  { %v10413_v21 = vpop.permute.xlu1 %1151  ;;  %v1333_v45 = vcombine.low %v1150_v9, %v1174_v5  ;;  %v1334_v46 = vcombine.high %v1150_v9, %v1174_v5  ;;  %v1325_v12 = vrot.slane %v1317_v3, %v10312_v50  ;;  %v1332_v42 = vrot.slane %v1318_v4, %v10312_v50 }
 0x31e   :  { %v697_v47 = vrot.slane %v689_v6, %v10317_v57  ;;  %v704_v49 = vrot.slane %v690_v8, %v10317_v57  ;;  %v713_v20 = vrot.slane %v705_v16, %v10317_v57  ;;  %v720_v44 = vrot.slane %v706_v17, %v10317_v57 }
 0x31f   :  { %v1341_v48 = vrot.slane %v1333_v45, %v10312_v50  ;;  %v1348_v62 = vrot.slane %v1334_v46, %v10312_v50  ;;  %v10512_v10 = vrot.slane %v1486_v34, %v10317_v57 }
 0x320   :  { %v929_v35 = vcombine.low %v697_v47, %v704_v49  ;;  %v8770_v24 = vcombine.high %v697_v47, %v704_v49  ;;  %v945_v1 = vcombine.low %v713_v20, %v720_v44  ;;  %v8771_v9 = vcombine.high %v713_v20, %v720_v44  ;;  %v570_v63 = vpop.permute.xlu0 %569 }
 0x321   :  { %v1349_v5 = vcombine.low %v1325_v12, %v1341_v48  ;;  %v1350_v6 = vcombine.high %v1325_v12, %v1341_v48  ;;  %v1365_v22 = vcombine.low %v1332_v42, %v1348_v62  ;;  %v1366_v8 = vcombine.high %v1332_v42, %v1348_v62  ;;  %v1164_v16 = vpop.permute.xlu1 %1163 }
 0x322   :  { %v10428_v17 = vrot.slane %v929_v35, %v10312_v50  ;;  %v10431_v3 = vrot.slane %v8770_v24, %v10312_v50  ;;  %v10434_v4 = vrot.slane %v945_v1, %v10312_v50  ;;  %v10437_v45 = vrot.slane %v8771_v9, %v10312_v50 }
 0x323   :  { %v10440_v46 = vrot.slane %v1349_v5, %v10317_v57  ;;  %v10443_v47 = vrot.slane %v1350_v6, %v10317_v57  ;;  %v10446_v49 = vrot.slane %v1365_v22, %v10317_v57  ;;  %v10449_v35 = vrot.slane %v1366_v8, %v10317_v57 }
 0x324   :  { %v10452_v24 = vrot.slane %v894_v0, %v10317_v57  ;;  %v10455_v1 = vrot.slane %v910_v25, %v10317_v57  ;;  %v10461_v20 = vrot.slane %v1485_v27, %v10317_v57  ;;  %v10467_v22 = vrot.slane %v1501_v29, %v10317_v57  ;;  %v582_v8 = vpop.permute.xlu0 %581 }
 0x325   :  { %v725_v29 = vcombine.low %v10243_v19, %v570_v63  ;;  %v726_v48 = vcombine.high %v10243_v19, %v570_v63  ;;  %v1385_v9 = vcombine.low %v10267_v28, %v1164_v16  ;;  %v1386_v5 = vcombine.high %v10267_v28, %v1164_v16  ;;  %v1176_v27 = vpop.permute.xlu1 %1175 }
 0x326   :  { %v1528_v6 = vrot.slane %v1521_v15, %v10312_v50  ;;  %v1517_v25 = vcombine.low %v10461_v20, %v10467_v22  ;;  %v1536_v19 = vrot.slane %v8778_v43, %v10312_v50  ;;  %v1544_v28 = vrot.slane %v1537_v61, %v10312_v50 }
 0x327   :  { %v733_v42 = vrot.slane %v725_v29, %v10312_v50  ;;  %v740_v15 = vrot.slane %v726_v48, %v10312_v50  ;;  %v1393_v63 = vrot.slane %v1385_v9, %v10312_v50  ;;  %v1552_v16 = vrot.slane %v8779_v59, %v10312_v50 }
 0x328   :  { %v1553_v11 = vcombine.low %v1528_v6, %v1536_v19  ;;  %v10518_v43 = vrot.slane %v1502_v7, %v10317_v57  ;;  %v1554_v61 = vcombine.high %v1528_v6, %v1536_v19  ;;  %v741_v29 = vcombine.low %v10339_v52, %v582_v8 }
 0x329   :  { %v1569_v48 = vcombine.low %v1544_v28, %v1552_v16  ;;  %v1570_v9 = vcombine.high %v1544_v28, %v1552_v16  ;;  %v742_v13 = vcombine.high %v10339_v52, %v582_v8  ;;  %v1401_v14 = vcombine.low %v10413_v21, %v1176_v27  ;;  %v572_v6 = vpop.permute.xlu1 %571 }
 0x32a   :  { %v1400_v53 = vrot.slane %v1386_v5, %v10312_v50  ;;  %v10525_v54 = vrot.slane %v1553_v11, %v10317_v57  ;;  %v10528_v34 = vrot.slane %v1554_v61, %v10317_v57  ;;  %v749_v55 = vrot.slane %v741_v29, %v10312_v50 }
 0x32b   :  { %v10532_v56 = vrot.slane %v1569_v48, %v10317_v57  ;;  %v10535_v7 = vrot.slane %v1570_v9, %v10317_v57  ;;  %v756_v52 = vrot.slane %v742_v13, %v10312_v50  ;;  %v1402_v59 = vcombine.high %v10413_v21, %v1176_v27 }
 0x32c   :  { %v1520_v5 = vcombine.high %v10512_v10, %v10518_v43  ;;  %v757_v8 = vcombine.low %v733_v42, %v749_v55  ;;  %v758_v19 = vcombine.high %v733_v42, %v749_v55  ;;  %v1409_v28 = vrot.slane %v1401_v14, %v10312_v50 }
 0x32d   :  { %v1585_v16 = vcombine.low %v10525_v54, %v10532_v56  ;;  %v1588_v11 = vcombine.high %v10528_v34, %v10535_v7  ;;  %v773_v61 = vcombine.low %v740_v15, %v756_v52  ;;  %v774_v29 = vcombine.high %v740_v15, %v756_v52  ;;  %v1738_v15 = vpop.permute.xlu0 %1737  ;;  %v584_v31 = vpop.permute.xlu1 %583 }
 0x32e   :  { %v765_v48 = vrot.slane %v757_v8, %v10317_v57  ;;  %v772_v21 = vrot.slane %v758_v19, %v10317_v57  ;;  %v1416_v27 = vrot.slane %v1402_v59, %v10312_v50  ;;  %v1417_v9 = vcombine.low %v1393_v63, %v1409_v28 }
 0x32f   :  { %v1725_v13 = vpack.c.bf16 %v1585_v16, %v1517_v25  ;;  %v1728_v62 = vpack.c.bf16 %v1588_v11, %v1520_v5  ;;  %v781_v42 = vrot.slane %v773_v61, %v10317_v57  ;;  %v788_v14 = vrot.slane %v774_v29, %v10317_v57 }
 0x330   :  { %v997_v55 = vcombine.low %v765_v48, %v772_v21  ;;  %v8772_v44 = vcombine.high %v765_v48, %v772_v21  ;;  %v1418_v12 = vcombine.high %v1393_v63, %v1409_v28  ;;  %v10552_v0 = vrot.slane %v1417_v9, %v10317_v57 }
 0x331   :  { %v2330_v52 = vsel %vm2325_vm2, %v1725_v13, 0  ;;  %v2471_v8 = vsel %vm2325_vm2, %v1728_v62, 0  ;;  %v1013_v19 = vcombine.low %v781_v42, %v788_v14  ;;  %v8773_v59 = vcombine.high %v781_v42, %v788_v14 }
 0x332   :  { %9248 = vmatpush3.bf16.xpose.msra.mxu1 %v2330_v52  ;;  %9266 = vmatpush3.bf16.xpose.msra.mxu0 %v2471_v8  ;;  %v10557_v25 = vrot.slane %v997_v55, %v10312_v50  ;;  %v10560_v5 = vrot.slane %v8772_v44, %v10312_v50  ;;  %v10563_v63 = vrot.slane %v1418_v12, %v10317_v57  ;;  %v12824_v61 = vmov 0.0  }
 0x333   :  { %v8781_v28 = vcombine.high %v10446_v49, %v10449_v35  ;;  %v1433_v16 = vcombine.low %v1400_v53, %v1416_v27  ;;  %v1434_v11 = vcombine.high %v1400_v53, %v1416_v27  ;;  %v793_v62 = vcombine.low %v10259_v23, %v572_v6  ;;  %9253 = vmatprep.subr.bf16.mxu1 %v12824_v61 }
 0x334   :  { %v12825_v29 = vcombine.high %v10428_v17, %v10431_v3  ;;  %v12826_v44 = vcombine.high %v10434_v4, %v10437_v45  ;;  %v10582_v21 = vrot.slane %v1013_v19, %v10312_v50  ;;  %v10585_v53 = vrot.slane %v8773_v59, %v10312_v50  ;;  %9277 = vmatprep.subr.bf16.mxu0 %v12824_v61 }
 0x335   :  { %v10597_v14 = vrot.slane %v1433_v16, %v10317_v57  ;;  %v794_v55 = vcombine.high %v10259_v23, %v572_v6  ;;  %v12827_v52 = vcombine.low %v10378_v39, %v10381_v40  ;;  %v12828_v19 = vcombine.low %v10394_v58, %v10397_v60  ;;  %v1750_v16 = vpop.permute.xlu1 %1749 }
 0x336   :  { %v10573_v48 = vrot.slane %v12825_v29, %v10317_v57  ;;  %v10579_v12 = vrot.slane %v12826_v44, %v10317_v57  ;;  %v1762_v29 = vpop.permute.xlu0 %1761  ;;  %v10609_v44 = vrot.slane %v1434_v11, %v10317_v57  ;;  %v801_v9 = vrot.slane %v793_v62, %v10312_v50 }
 0x337   :  { %v901_v8 = vrot.slane %v12827_v52, %v10317_v57  ;;  %v917_v59 = vrot.slane %v12828_v19, %v10317_v57  ;;  %v12829_v23 = vcombine.low %v10428_v17, %v10431_v3  ;;  %v12830_v39 = vcombine.low %v10434_v4, %v10437_v45 }
 0x338   :  { %v808_v58 = vrot.slane %v794_v55, %v10312_v50  ;;  %v928_v11 = vcombine.high %v10452_v24, %v10455_v1  ;;  %v996_v62 = vcombine.high %v10573_v48, %v10579_v12  ;;  %v1518_v17 = vcombine.high %v10461_v20, %v10467_v22 }
 0x339   :  { %v969_v6 = vrot.slane %v12829_v23, %v10317_v57  ;;  %v985_v40 = vrot.slane %v12830_v39, %v10317_v57  ;;  %v925_v60 = vcombine.low %v901_v8, %v917_v59  ;;  %v1586_v3 = vcombine.high %v10525_v54, %v10532_v56 }
 0x33a   :  { %v1789_v19 = vcombine.low %v1738_v15, %v1762_v29  ;;  %v1136_v4 = vpack.c.bf16 %v996_v62, %v928_v11  ;;  %v1790_v45 = vcombine.high %v1738_v15, %v1762_v29  ;;  %v809_v23 = vcombine.low %v10391_v51, %v584_v31 }
 0x33b   :  { %v993_v52 = vcombine.low %v969_v6, %v985_v40  ;;  %v810_v55 = vcombine.high %v10391_v51, %v584_v31  ;;  %v1726_v27 = vpack.c.bf16 %v1586_v3, %v1518_v17  ;;  %v1773_v13 = vcombine.low %v10285_v36, %v1750_v16 }
 0x33c   :  { %v1797_v42 = vrot.slane %v1789_v19, %v10312_v50  ;;  %9268 = vmatmul.mubr.msk.bf16.vlgmr.msra.gmra.mrb[8].mxu0 %vm2325_vm2, %v1136_v4  ;;  %v1804_v20 = vrot.slane %v1790_v45, %v10312_v50  ;;  %v817_v22 = vrot.slane %v809_v23, %v10312_v50  ;;  %v1774_v56 = vcombine.high %v10285_v36, %v1750_v16 }
 0x33d   :  { %v1133_v39 = vpack.c.bf16 %v993_v52, %v925_v60  ;;  %v824_v54 = vrot.slane %v810_v55, %v10312_v50  ;;  %v2377_v31 = vsel %vm2325_vm2, %v1726_v27, 0  ;;  %v1781_v51 = vrot.slane %v1773_v13, %v10312_v50  ;;  %v10641_v60 = vpop.permute.xlu1 %1739  ;;  %9279 = vmatprep.mubr.msk.bf16.mxu0 %vm9967_vm1, %v12824_v61 }
 0x33e   :  { %v926_v15 = vcombine.high %v901_v8, %v917_v59  ;;  %v994_v29 = vcombine.high %v969_v6, %v985_v40  ;;  %v825_v11 = vcombine.low %v801_v9, %v817_v22  ;;  %v826_v62 = vcombine.high %v801_v9, %v817_v22 }
 0x33f   :  { %9250 = vmatmul.mubr.msk.bf16.vlgmr.msra.gmra.mrb[12].mxu1 %vm2325_vm2, %v1133_v39  ;;  %v841_v52 = vcombine.low %v808_v58, %v824_v54  ;;  %v842_v17 = vcombine.high %v808_v58, %v824_v54  ;;  %v1788_v36 = vrot.slane %v1774_v56, %v10312_v50  ;;  %v1805_v27 = vcombine.low %v1781_v51, %v1797_v42 }
 0x340   :  { %9254 = vmatpush3.bf16.xpose.msra.mxu1 %v2377_v31  ;;  %9255 = vmatprep.mubr.msk.bf16.mxu1 %vm9967_vm1, %v12824_v61  ;;  %v1806_v16 = vcombine.high %v1781_v51, %v1797_v42  ;;  %v1134_v13 = vpack.c.bf16 %v994_v29, %v926_v15  ;;  %v833_v8 = vrot.slane %v825_v11, %v10317_v57 }
 0x341   :  { %v840_v59 = vrot.slane %v826_v62, %v10317_v57  ;;  %v849_v6 = vrot.slane %v841_v52, %v10317_v57  ;;  %v856_v40 = vrot.slane %v842_v17, %v10317_v57  ;;  %9259 = vmatprep.subr.bf16.mxu1 %v12824_v61  ;;  %v1813_v9 = vrot.slane %v1805_v27, %v10317_v57  ;;  %v1752_v56 = vpop.permute.xlu1 %1751 }
 0x342   :  { %v1820_v58 = vrot.slane %v1806_v16, %v10317_v57  ;;  %v1821_v3 = vcombine.low %v1788_v36, %v1804_v20  ;;  %v1822_v19 = vcombine.high %v1788_v36, %v1804_v20  ;;  %v1045_v29 = vcombine.low %v10582_v21, %v10585_v53 }
 0x343   :  { %v1065_v4 = vcombine.low %v833_v8, %v840_v59  ;;  %v8774_v45 = vcombine.high %v833_v8, %v840_v59  ;;  %v1081_v42 = vcombine.low %v849_v6, %v856_v40  ;;  %v8775_v23 = vcombine.high %v849_v6, %v856_v40 }
 0x344   :  { %v10656_v55 = vrot.slane %v1821_v3, %v10317_v57  ;;  %v10659_v39 = vrot.slane %v1822_v19, %v10317_v57  ;;  %v2045_v22 = vcombine.low %v1813_v9, %v1820_v58  ;;  %v8784_v54 = vcombine.high %v1813_v9, %v1820_v58 }
 0x345   :  { %v10662_v31 = vrot.slane %v1065_v4, %v10312_v50  ;;  %v10665_v51 = vrot.slane %v8774_v45, %v10312_v50  ;;  %v10668_v20 = vrot.slane %v1081_v42, %v10312_v50  ;;  %v10671_v15 = vrot.slane %v8775_v23, %v10312_v50 }
 0x346   :  { %v1046_v11 = vcombine.high %v10582_v21, %v10585_v53  ;;  %v1673_v62 = vcombine.low %v10597_v14, %v10609_v44  ;;  %v8783_v52 = vcombine.high %v10597_v14, %v10609_v44  ;;  %v10683_v17 = vrot.slane %v2045_v22, %v10312_v50 }
 0x347   :  { %9256 = vmatmul.mubr.msk.bf16.vlgmr.msra.gmra.mrb[16].mxu1 %vm2325_vm2, %v1134_v13  ;;  %v10686_v36 = vrot.slane %v8784_v54, %v10312_v50  ;;  %v2061_v27 = vcombine.low %v10656_v55, %v10659_v39  ;;  %v8785_v16 = vcombine.high %v10656_v55, %v10659_v39  ;;  %v1097_v14 = vcombine.low %v10662_v31, %v10665_v51 }
 0x348   :  { %9261 = vmatprep.mubr.msk.bf16.mxu1 %vm9967_vm1, %v12824_v61  ;;  %v1098_v44 = vcombine.high %v10662_v31, %v10665_v51  ;;  %v1519_v13 = vcombine.low %v10512_v10, %v10518_v43  ;;  %v1587_v8 = vcombine.low %v10528_v34, %v10535_v7  ;;  %v1113_v59 = vcombine.low %v10668_v20, %v10671_v15 }
 0x349   :  { %v1114_v6 = vcombine.high %v10668_v20, %v10671_v15  ;;  %v1841_v40 = vcombine.low %v10301_v37, %v1752_v56  ;;  %v1842_v9 = vcombine.high %v10301_v37, %v1752_v56  ;;  %v12831_v3 = vcombine.low %v10440_v46, %v10443_v47  ;;  %v1764_v37 = vpop.permute.xlu1 %1763 }
 0x34a   :  { %v1727_v58 = vpack.c.bf16 %v1587_v8, %v1519_v13  ;;  %v12832_v10 = vcombine.high %v10440_v46, %v10443_v47  ;;  %v12833_v34 = vcombine.low %v10446_v49, %v10449_v35  ;;  %v927_v45 = vcombine.low %v10452_v24, %v10455_v1 }
 0x34b   :  { %v10712_v19 = vrot.slane %v12831_v3, %v10312_v50  ;;  %v1849_v4 = vrot.slane %v1841_v40, %v10312_v50  ;;  %v995_v42 = vcombine.low %v10573_v48, %v10579_v12  ;;  %v10735_v46 = vrot.slane %v8781_v28, %v10312_v50 }
 0x34c   :  { %v10718_v43 = vrot.slane %v12832_v10, %v10312_v50  ;;  %v10724_v7 = vrot.slane %v12833_v34, %v10312_v50  ;;  %v2424_v47 = vsel %vm2325_vm2, %v1727_v58, 0  ;;  %v12834_v22 = vcombine.low %v10552_v0, %v10563_v63 }
 0x34d   :  { %v12835_v24 = vcombine.high %v10552_v0, %v10563_v63  ;;  %9260 = vmatpush3.bf16.xpose.msra.mxu1 %v2424_v47  ;;  %v10755_v35 = vrot.slane %v1673_v62, %v10312_v50  ;;  %v10758_v28 = vrot.slane %v8783_v52, %v10312_v50  ;;  %v1857_v48 = vcombine.low %v10641_v60, %v1764_v37 }
 0x34e   :  { %v1621_v23 = vcombine.low %v10712_v19, %v10718_v43  ;;  %v10744_v54 = vrot.slane %v12834_v22, %v10312_v50  ;;  %v1637_v49 = vcombine.low %v10724_v7, %v10735_v46  ;;  %v1856_v12 = vrot.slane %v1842_v9, %v10312_v50  ;;  %9271 = vmatprep.subr.bf16.mxu1 %v12824_v61 }
 0x34f   :  { %v10750_v1 = vrot.slane %v12835_v24, %v10312_v50  ;;  %v1858_v56 = vcombine.high %v10641_v60, %v1764_v37  ;;  %v1135_v13 = vpack.c.bf16 %v995_v42, %v927_v45  ;;  %v1705_v52 = vcombine.low %v10755_v35, %v10758_v28 }
 0x350   :  { %v1629_v0 = vrot.slane %v1621_v23, %v10317_v57  ;;  %v1645_v62 = vrot.slane %v1637_v49, %v10317_v57  ;;  %v1865_v8 = vrot.slane %v1857_v48, %v10312_v50  ;;  %v1105_v58 = vrot.slane %v1097_v14, %v10317_v57 }
 0x351   :  { %v1689_v63 = vcombine.low %v10744_v54, %v10750_v1  ;;  %v1872_v9 = vrot.slane %v1858_v56, %v10312_v50  ;;  %v1121_v3 = vrot.slane %v1113_v59, %v10317_v57  ;;  %v1713_v10 = vrot.slane %v1705_v52, %v10317_v57 }
 0x352   :  { %v1873_v34 = vcombine.low %v1849_v4, %v1865_v8  ;;  %v12836_v60 = vcombine.low %v10557_v25, %v10560_v5  ;;  %v1053_v45 = vrot.slane %v1045_v29, %v10317_v57  ;;  %v1653_v42 = vcombine.low %v1629_v0, %v1645_v62 }
 0x353   :  { %v1697_v40 = vrot.slane %v1689_v63, %v10317_v57  ;;  %v1874_v47 = vcombine.high %v1849_v4, %v1865_v8  ;;  %v1889_v23 = vcombine.low %v1856_v12, %v1872_v9  ;;  %v1890_v22 = vcombine.high %v1856_v12, %v1872_v9 }
 0x354   :  { %v1037_v37 = vrot.slane %v12836_v60, %v10317_v57  ;;  %v1654_v49 = vcombine.high %v1629_v0, %v1645_v62  ;;  %v1881_v14 = vrot.slane %v1873_v34, %v10317_v57  ;;  %9262 = vmatmul.mubr.msk.bf16.vlgmr.msra.gmra.mrb[20].mxu1 %vm2325_vm2, %v1135_v13  ;;  %v1129_v52 = vcombine.low %v1105_v58, %v1121_v3 }
 0x355   :  { %v1721_v24 = vcombine.low %v1697_v40, %v1713_v10  ;;  %v1722_v48 = vcombine.high %v1697_v40, %v1713_v10  ;;  %v1888_v59 = vrot.slane %v1874_v47, %v10317_v57  ;;  %v1897_v63 = vrot.slane %v1889_v23, %v10317_v57  ;;  %9273 = vmatprep.mubr.msk.bf16.mxu1 %vm9967_vm1, %v12824_v61 }
 0x356   :  { %v1904_v56 = vrot.slane %v1890_v22, %v10317_v57  ;;  %v10787_v29 = vrot.slane %v2061_v27, %v10312_v50  ;;  %v1130_v12 = vcombine.high %v1105_v58, %v1121_v3  ;;  %v2076_v0 = vrot.slane %v8785_v16, %v10312_v50 }
 0x357   :  { %v1729_v4 = vpack.c.bf16 %v1721_v24, %v1653_v42  ;;  %v1730_v8 = vpack.c.bf16 %v1722_v48, %v1654_v49  ;;  %v2113_v13 = vcombine.low %v1881_v14, %v1888_v59  ;;  %v8786_v62 = vcombine.high %v1881_v14, %v1888_v59 }
 0x358   :  { %v1061_v40 = vcombine.low %v1037_v37, %v1053_v45  ;;  %v1062_v27 = vcombine.high %v1037_v37, %v1053_v45  ;;  %v1622_v34 = vcombine.high %v10712_v19, %v10718_v43  ;;  %v2129_v60 = vcombine.low %v1897_v63, %v1904_v56 }
 0x359   :  { %v2518_v9 = vsel %vm2325_vm2, %v1729_v4, 0  ;;  %v2565_v10 = vsel %vm2325_vm2, %v1730_v8, 0  ;;  %v8787_v58 = vcombine.high %v1897_v63, %v1904_v56  ;;  %v1638_v39 = vcombine.high %v10724_v7, %v10735_v46 }
 0x35a   :  { %9272 = vmatpush3.bf16.xpose.msra.mxu1 %v2518_v9  ;;  %9278 = vmatpush3.bf16.xpose.msra.mxu0 %v2565_v10  ;;  %v1137_v3 = vpack.c.bf16 %v1129_v52, %v1061_v40  ;;  %v1138_v42 = vpack.c.bf16 %v1130_v12, %v1062_v27  ;;  %v1636_v55 = vrot.slane %v1622_v34, %v10317_v57 }
 0x35b   :  { %9283 = vmatprep.subr.bf16.mxu1 %v12824_v61  ;;  %9289 = vmatprep.subr.bf16.mxu0 %v12824_v61  ;;  %v2120_v16 = vrot.slane %v2113_v13, %v10312_v50  ;;  %v2128_v37 = vrot.slane %v8786_v62, %v10312_v50  ;;  %v1690_v19 = vcombine.high %v10744_v54, %v10750_v1 }
 0x35c   :  { %v1706_v43 = vcombine.high %v10755_v35, %v10758_v28  ;;  %v1652_v45 = vrot.slane %v1638_v39, %v10317_v57  ;;  %v1112_v47 = vrot.slane %v1098_v44, %v10317_v57  ;;  %v1128_v7 = vrot.slane %v1114_v6, %v10317_v57 }
 0x35d   :  { %v2077_v46 = vcombine.low %v10683_v17, %v10686_v36  ;;  %v2136_v54 = vrot.slane %v2129_v60, %v10312_v50  ;;  %v1704_v1 = vrot.slane %v1690_v19, %v10317_v57  ;;  %v2144_v28 = vrot.slane %v8787_v58, %v10312_v50 }
 0x35e   :  { %v1720_v35 = vrot.slane %v1706_v43, %v10317_v57  ;;  %v1655_v23 = vcombine.low %v1636_v55, %v1652_v45  ;;  %v1656_v22 = vcombine.high %v1636_v55, %v1652_v45  ;;  %v12837_v31 = vcombine.high %v10557_v25, %v10560_v5 }
 0x35f   :  { %v2085_v44 = vrot.slane %v2077_v46, %v10317_v57  ;;  %v2093_v6 = vcombine.low %v10787_v29, %v2076_v0  ;;  %v1060_v24 = vrot.slane %v1046_v11, %v10317_v57  ;;  %v1131_v49 = vcombine.low %v1112_v47, %v1128_v7 }
 0x360   :  { %v1044_v51 = vrot.slane %v12837_v31, %v10317_v57  ;;  %v1723_v20 = vcombine.low %v1704_v1, %v1720_v35  ;;  %v1724_v15 = vcombine.high %v1704_v1, %v1720_v35  ;;  %v2145_v48 = vcombine.low %v2120_v16, %v2128_v37 }
 0x361   :  { %9274 = vmatmul.mubr.msk.bf16.vlgmr.msra.gmra.mrb[24].mxu1 %vm2325_vm2, %v1137_v3  ;;  %9280 = vmatmul.mubr.msk.bf16.vlgmr.msra.gmra.mrb[12].mxu0 %vm2325_vm2, %v1138_v42  ;;  %v2101_v5 = vrot.slane %v2093_v6, %v10317_v57  ;;  %v2161_v63 = vcombine.low %v2136_v54, %v2144_v28  ;;  %v2078_v56 = vcombine.high %v10683_v17, %v10686_v36 }
 0x362   :  { %v1731_v14 = vpack.c.bf16 %v1723_v20, %v1655_v23  ;;  %v1732_v25 = vpack.c.bf16 %v1724_v15, %v1656_v22  ;;  %9285 = vmatprep.mubr.msk.bf16.mxu1 %vm9967_vm1, %v12824_v61  ;;  %9291 = vmatprep.mubr.msk.bf16.mxu0 %vm9967_vm1, %v12824_v61  ;;  %v2153_v59 = vrot.slane %v2145_v48, %v10317_v57 }
 0x363   :  { %v2094_v21 = vcombine.high %v10787_v29, %v2076_v0  ;;  %v1132_v52 = vcombine.high %v1112_v47, %v1128_v7  ;;  %v2109_v4 = vcombine.low %v2085_v44, %v2101_v5  ;;  %v2169_v8 = vrot.slane %v2161_v63, %v10317_v57 }
 0x364   :  { %v2612_v53 = vsel %vm2325_vm2, %v1731_v14, 0  ;;  %v2659_v11 = vsel %vm2325_vm2, %v1732_v25, 0  ;;  %v2092_v12 = vrot.slane %v2078_v56, %v10317_v57  ;;  %v2110_v17 = vcombine.high %v2085_v44, %v2101_v5 }
 0x365   :  { %9284 = vmatpush3.bf16.xpose.msra.mxu1 %v2612_v53  ;;  %9290 = vmatpush3.bf16.xpose.msra.mxu0 %v2659_v11  ;;  %v2108_v13 = vrot.slane %v2094_v21, %v10317_v57  ;;  %v2146_v36 = vcombine.high %v2120_v16, %v2128_v37  ;;  %v2162_v29 = vcombine.high %v2136_v54, %v2144_v28 }
 0x366   :  { %9295 = vmatprep.subr.bf16.mxu1 %v12824_v61  ;;  %9301 = vmatprep.subr.bf16.mxu0 %v12824_v61  ;;  %v2177_v0 = vcombine.low %v2153_v59, %v2169_v8  ;;  %v2178_v62 = vcombine.high %v2153_v59, %v2169_v8  ;;  %v1063_v10 = vcombine.low %v1044_v51, %v1060_v24 }
 0x367   :  { %v2111_v40 = vcombine.low %v2092_v12, %v2108_v13  ;;  %v2112_v9 = vcombine.high %v2092_v12, %v2108_v13  ;;  %v1064_v27 = vcombine.high %v1044_v51, %v1060_v24  ;;  %v2160_v34 = vrot.slane %v2146_v36, %v10317_v57 }
 0x368   :  { %v2176_v60 = vrot.slane %v2162_v29, %v10317_v57  ;;  %v2317_v58 = vpack.c.bf16 %v2177_v0, %v2109_v4  ;;  %v2318_v3 = vpack.c.bf16 %v2178_v62, %v2110_v17  ;;  %v1139_v42 = vpack.c.bf16 %v1131_v49, %v1063_v10 }
 0x369   :  { %v1140_v55 = vpack.c.bf16 %v1132_v52, %v1064_v27 }
 0x36a   :  { %v2179_v39 = vcombine.low %v2160_v34, %v2176_v60  ;;  %v2180_v19 = vcombine.high %v2160_v34, %v2176_v60 }
 0x36c   :  { %9286 = vmatmul.mubr.msk.bf16.vlgmr.msra.gmra.mrb[28].mxu1 %vm2325_vm2, %v1139_v42  ;;  %9292 = vmatmul.mubr.msk.bf16.vlgmr.msra.gmra.mrb[16].mxu0 %vm2325_vm2, %v1140_v55  ;;  %v10857_v16 = vpack.c.bf16 %v2179_v39, %v2111_v40  ;;  %v10859_v37 = vpack.c.bf16 %v2180_v19, %v2112_v9 }
 0x36d   :  { %9296 = vmatpush3.bf16.msra.mxu1 %v2317_v58  ;;  %9302 = vmatpush3.bf16.msra.mxu0 %v2318_v3 }
 0x36e   :  { %9297 = vmatprep.mubr.msk.bf16.mxu1 %vm9967_vm1, %v12824_v61  ;;  %9307 = vmatprep.subr.bf16.mxu1 %v12824_v61 }
 0x36f   :  { %9303 = vmatprep.mubr.msk.bf16.mxu0 %vm9967_vm1, %v12824_v61  ;;  %9313 = vmatprep.subr.bf16.mxu0 %v12824_v61 }
 0x40f   :  { %v10867_v43 = vpop.f32.mrb[8].mxu0 }
 0x410   :  { %v9269_v47 = vpop.f32.mrb[9].mxu0  ;;  %v2721_v22 = vsel %vm2702_vm3, %v10867_v43, -inf }
 0x411   :  { %v10873_v54 = vpop.f32.mrb[10].mxu0 }
 0x412   :  { %v10869_v45 = vpop.f32.mrb[12].mxu1  ;;  %v9270_v35 = vpop.f32.mrb[11].mxu0  ;;  %v2724_v31 = vsel %vm2702_vm3, %v10873_v54, -inf }
 0x413   :  { %v9251_v7 = vpop.f32.mrb[13].mxu1  ;;  %v2703_v46 = vsel %vm2702_vm3, %v10869_v45, -inf }
 0x414   :  { %2704 = vmax.xlane.f32.xlu0 %v2703_v46  ;;  %v10875_v1 = vpop.f32.mrb[14].mxu1 }
 0x415   :  { %v9252_v28 = vpop.f32.mrb[15].mxu1  ;;  %v2706_v23 = vsel %vm2702_vm3, %v10875_v1, -inf }
 0x416   :  { %2707 = vmax.xlane.f32.xlu1 %v2706_v23 }
 0x418   :  { %2722 = vmax.xlane.f32.xlu0 %v2721_v22 }
 0x41a   :  { %v10883_v51 = vpop.f32.mrb[16].mxu1  ;;  %2725 = vmax.xlane.f32.xlu1 %v2724_v31 }
 0x41b   :  { %v9257_v20 = vpop.f32.mrb[17].mxu1  ;;  %v2709_v15 = vsel %vm2702_vm3, %v10883_v51, -inf }
 0x41c   :  { %v10887_v44 = vpop.f32.mrb[18].mxu1  ;;  %2710 = vmax.xlane.f32.xlu0 %v2709_v15 }
 0x41d   :  { %v9258_v6 = vpop.f32.mrb[19].mxu1  ;;  %v2712_v8 = vsel %vm2702_vm3, %v10887_v44, -inf }
 0x427   :  { %v10889_v24 = vpop.f32.mrb[20].mxu1 }
 0x428   :  { %v9263_v49 = vpop.f32.mrb[21].mxu1  ;;  %v2715_v13 = vsel %vm2702_vm3, %v10889_v24, -inf }
 0x429   :  { %v10891_v48 = vpop.f32.mrb[22].mxu1 }
 0x42a   :  { %v9264_v14 = vpop.f32.mrb[23].mxu1  ;;  %v2718_v12 = vsel %vm2702_vm3, %v10891_v48, -inf }
 0x434   :  { %v10893_v25 = vpop.f32.mrb[24].mxu1  ;;  %v10895_v5 = vpop.f32.mrb[12].mxu0 }
 0x435   :  { %v9275_v59 = vpop.f32.mrb[25].mxu1  ;;  %v9281_v63 = vpop.f32.mrb[13].mxu0  ;;  %v2733_v56 = vsel %vm2702_vm3, %v10895_v5, -inf  ;;  %v2727_v60 = vsel %vm2702_vm3, %v10893_v25, -inf }
 0x436   :  { %v10899_v21 = vpop.f32.mrb[26].mxu1  ;;  %2734 = vmax.xlane.f32.xlu0 %v2733_v56  ;;  %v10901_v53 = vpop.f32.mrb[14].mxu0 }
 0x437   :  { %v9276_v11 = vpop.f32.mrb[27].mxu1  ;;  %v9282_v52 = vpop.f32.mrb[15].mxu0  ;;  %v2736_v4 = vsel %vm2702_vm3, %v10901_v53, -inf  ;;  %v2730_v3 = vsel %vm2702_vm3, %v10899_v21, -inf }
 0x438   :  { %2737 = vmax.xlane.f32.xlu1 %v2736_v4 }
 0x43a   :  { %2713 = vmax.xlane.f32.xlu0 %v2712_v8 }
 0x43c   :  { %2719 = vmax.xlane.f32.xlu1 %v2718_v12 }
 0x43e   :  { %2716 = vmax.xlane.f32.xlu0 %v2715_v13 }
 0x43f   :  { %v10911_v17 = vpop.f32.mrb[28].mxu1  ;;  %v10913_v36 = vpop.f32.mrb[16].mxu0 }
 0x440   :  { %v9287_v29 = vpop.f32.mrb[29].mxu1  ;;  %v9293_v0 = vpop.f32.mrb[17].mxu0  ;;  %v2745_v9 = vsel %vm2702_vm3, %v10913_v36, -inf  ;;  %v2739_v58 = vsel %vm2702_vm3, %v10911_v17, -inf }
 0x441   :  { %v10915_v62 = vpop.f32.mrb[30].mxu1  ;;  %v10917_v40 = vpop.f32.mrb[18].mxu0 }
 0x442   :  { %v9288_v10 = vpop.f32.mrb[31].mxu1  ;;  %v9294_v27 = vpop.f32.mrb[19].mxu0  ;;  %v2748_v34 = vsel %vm2702_vm3, %v10917_v40, -inf  ;;  %2746 = vmax.xlane.f32.xlu0 %v2745_v9  ;;  %v2742_v42 = vsel %vm2702_vm3, %v10915_v62, -inf }
 0x443   :  { %2749 = vmax.xlane.f32.xlu1 %v2748_v34 }
 0x446   :  { %2728 = vmax.xlane.f32.xlu0 %v2727_v60 }
 0x454   :  { %1743 = vrot.lane.b32.xlu1 %v10271_v32, %s9963_s0 }
 0x458   :  { %1753 = vrot.lane.b32.xlu1 %v10265_v26, %s9964_s28 }
 0x45c   :  { %1741 = vrot.lane.b32.xlu0 %v10265_v26, %s9963_s0 }
 0x47b   :  { %2740 = vmax.xlane.f32.xlu0 %v2739_v58 }
 0x47c   :  { %2731 = vmax.xlane.f32.xlu1 %v2730_v3 }
 0x480   :  { %2743 = vmax.xlane.f32.xlu1 %v2742_v42 }
 0x491   :  { %1755 = vrot.lane.b32.xlu1 %v10271_v32, %s9964_s28  ;;  %1765 = vrot.lane.b32.xlu0 %v10265_v26, %s9965_s2 }
 0x4a1   :  { %v2705_v55 = vpop.xlane.xlu0 %2704 }
 0x4a2   :  { %v2751_v39 = vsub.f32 %v10869_v45, %v2705_v55 }
 0x4a3   :  { %v2708_v19 = vpop.xlane.xlu1 %2707 }
 0x4a4   :  { %v2767_v47 = vmul.f32 1.442695, %v2751_v39  ;;  %v2752_v7 = vsub.f32 %v10875_v1, %v2708_v19 }
 0x4a5   :  { %v2723_v46 = vpop.xlane.xlu0 %2722 }
 0x4a6   :  { %9750 = vpow2.f32 %v2767_v47  ;;  %v2769_v35 = vmul.f32 1.442695, %v2752_v7  ;;  %v2757_v28 = vsub.f32 %v10867_v43, %v2723_v46 }
 0x4a7   :  { %v2726_v23 = vpop.xlane.xlu1 %2725 }
 0x4a8   :  { %9752 = vpow2.f32 %v2769_v35  ;;  %v2779_v22 = vmul.f32 1.442695, %v2757_v28  ;;  %v2758_v31 = vsub.f32 %v10873_v54, %v2726_v23 }
 0x4a9   :  { %v2711_v20 = vpop.xlane.xlu0 %2710 }
 0x4aa   :  { %9754 = vpow2.f32 %v2779_v22  ;;  %v2781_v15 = vmul.f32 1.442695, %v2758_v31  ;;  %v2753_v6 = vsub.f32 %v10883_v51, %v2711_v20 }
 0x4ac   :  { %9756 = vpow2.f32 %v2781_v15  ;;  %v2771_v45 = vmul.f32 1.442695, %v2753_v6 }
 0x4ae   :  { %9758 = vpow2.f32 %v2771_v45 }
 0x4b0   :  { %v10946_v49 = vpop.eup %9750 }
 0x4b1   :  { %v2799_v1 = vsel %vm2702_vm3, %v10946_v49, 0.0 }
 0x4b2   :  { %v10950_v14 = vpop.eup %9752  ;;  %2800 = vadd.xlane.f32.xlu0 %v2799_v1 }
 0x4b3   :  { %v2802_v43 = vsel %vm2702_vm3, %v10950_v14, 0.0 }
 0x4b4   :  { %v10954_v54 = vpop.eup %9754 }
 0x4b5   :  { %2803 = vadd.xlane.f32.xlu1 %v2802_v43  ;;  %v2817_v51 = vsel %vm2702_vm3, %v10954_v54, 0.0 }
 0x4b6   :  { %v10958_v59 = vpop.eup %9756  ;;  %2818 = vadd.xlane.f32.xlu0 %v2817_v51 }
 0x4b7   :  { %v2820_v63 = vsel %vm2702_vm3, %v10958_v59, 0.0 }
 0x4b8   :  { %v10962_v56 = vpop.eup %9758 }
 0x4b9   :  { %v2805_v11 = vsel %vm2702_vm3, %v10962_v56, 0.0 }
 0x4ba   :  { %2821 = vadd.xlane.f32.xlu0 %v2820_v63 }
 0x4be   :  { %2806 = vadd.xlane.f32.xlu0 %v2805_v11 }
 0x4c3   :  { %v2735_v52 = vpop.xlane.xlu0 %2734 }
 0x4c4   :  { %v2761_v4 = vsub.f32 %v10895_v5, %v2735_v52 }
 0x4c5   :  { %v2738_v8 = vpop.xlane.xlu1 %2737 }
 0x4c6   :  { %v2787_v12 = vmul.f32 1.442695, %v2761_v4  ;;  %v2762_v13 = vsub.f32 %v10901_v53, %v2738_v8 }
 0x4c7   :  { %v2714_v29 = vpop.xlane.xlu0 %2713 }
 0x4c8   :  { %9760 = vpow2.f32 %v2787_v12  ;;  %v2754_v0 = vsub.f32 %v10887_v44, %v2714_v29  ;;  %v2789_v10 = vmul.f32 1.442695, %v2762_v13 }
 0x4c9   :  { %v2720_v9 = vpop.xlane.xlu1 %2719 }
 0x4ca   :  { %v2773_v27 = vmul.f32 1.442695, %v2754_v0  ;;  %v2756_v34 = vsub.f32 %v10891_v48, %v2720_v9 }
 0x4cb   :  { %v2717_v60 = vpop.xlane.xlu0 %2716 }
 0x4cc   :  { %9762 = vpow2.f32 %v2773_v27  ;;  %v2755_v58 = vsub.f32 %v10889_v24, %v2717_v60  ;;  %v2777_v3 = vmul.f32 1.442695, %v2756_v34 }
 0x4cd   :  { %9764 = vpow2.f32 %v2789_v10 }
 0x4ce   :  { %v2775_v5 = vmul.f32 1.442695, %v2755_v58 }
 0x4cf   :  { %v2747_v42 = vpop.xlane.xlu0 %2746 }
 0x4d0   :  { %9766 = vpow2.f32 %v2775_v5  ;;  %v2750_v31 = vpop.xlane.xlu1 %2749  ;;  %v2765_v45 = vsub.f32 %v10913_v36, %v2747_v42 }
 0x4d1   :  { %9768 = vpow2.f32 %v2777_v3  ;;  %v2766_v11 = vsub.f32 %v10917_v40, %v2750_v31 }
 0x4d2   :  { %v10971_v55 = vpop.eup %9760  ;;  %v2795_v52 = vmul.f32 1.442695, %v2765_v45 }
 0x4d3   :  { %v2729_v53 = vpop.xlane.xlu0 %2728  ;;  %v2829_v44 = vsel %vm2702_vm3, %v10971_v55, 0.0  ;;  %v2797_v12 = vmul.f32 1.442695, %v2766_v11 }
 0x4d4   :  { %v2759_v39 = vsub.f32 %v10893_v25, %v2729_v53  ;;  %2830 = vadd.xlane.f32.xlu0 %v2829_v44  ;;  %v10996_v20 = vpop.permute.xlu1 %1743 }
 0x4d6   :  { %v10976_v48 = vpop.eup %9762  ;;  %v2783_v19 = vmul.f32 1.442695, %v2759_v39 }
 0x4d7   :  { %v2808_v24 = vsel %vm2702_vm3, %v10976_v48, 0.0  ;;  %v10980_v47 = vpop.eup %9764  ;;  %v10998_v15 = vpop.permute.xlu0 %1741 }
 0x4d8   :  { %9770 = vpow2.f32 %v2783_v19  ;;  %2809 = vadd.xlane.f32.xlu1 %v2808_v24  ;;  %v2832_v35 = vsel %vm2702_vm3, %v10980_v47, 0.0  ;;  %v11000_v6 = vpop.permute.xlu1 %1753 }
 0x4da   :  { %v10982_v7 = vpop.eup %9766 }
 0x4db   :  { %v2811_v46 = vsel %vm2702_vm3, %v10982_v7, 0.0  ;;  %v10988_v25 = vpop.eup %9768 }
 0x4dc   :  { %2812 = vadd.xlane.f32.xlu0 %v2811_v46  ;;  %2833 = vadd.xlane.f32.xlu1 %v2832_v35  ;;  %v2814_v28 = vsel %vm2702_vm3, %v10988_v25, 0.0 }
 0x4e0   :  { %2815 = vadd.xlane.f32.xlu1 %v2814_v28 }
 0x4e2   :  { %v10992_v23 = vpop.eup %9770 }
 0x4e3   :  { %v2823_v22 = vsel %vm2702_vm3, %v10992_v23, 0.0 }
 0x4e4   :  { %2824 = vadd.xlane.f32.xlu0 %v2823_v22 }
 0x508   :  { %v2741_v1 = vpop.xlane.xlu0 %2740 }
 0x509   :  { %v2732_v43 = vpop.xlane.xlu1 %2731  ;;  %v2763_v51 = vsub.f32 %v10911_v17, %v2741_v1 }
 0x50a   :  { %v2760_v63 = vsub.f32 %v10899_v21, %v2732_v43 }
 0x50b   :  { %v2791_v4 = vmul.f32 1.442695, %v2763_v51 }
 0x50c   :  { %v2785_v8 = vmul.f32 1.442695, %v2760_v63  ;;  %v11025_v60 = vpop.permute.xlu0 %1765 }
 0x50d   :  { %9772 = vpow2.f32 %v2791_v4  ;;  %v2744_v10 = vpop.xlane.xlu1 %2743 }
 0x50e   :  { %9774 = vpow2.f32 %v2785_v8  ;;  %v2764_v27 = vsub.f32 %v10915_v62, %v2744_v10 }
 0x50f   :  { %9776 = vpow2.f32 %v2795_v52 }
 0x510   :  { %9778 = vpow2.f32 %v2797_v12  ;;  %v2793_v34 = vmul.f32 1.442695, %v2764_v27 }
 0x511   :  { %v11027_v58 = vpop.permute.xlu1 %1755 }
 0x512   :  { %9780 = vpow2.f32 %v2793_v34 }
 0x517   :  { %v11006_v13 = vpop.eup %9772 }
 0x518   :  { %v11008_v29 = vpop.eup %9774  ;;  %v2835_v36 = vsel %vm2702_vm3, %v11006_v13, 0.0 }
 0x519   :  { %v11012_v17 = vpop.eup %9776  ;;  %v2826_v21 = vsel %vm2702_vm3, %v11008_v29, 0.0  ;;  %2836 = vadd.xlane.f32.xlu0 %v2835_v36 }
 0x51a   :  { %2827 = vadd.xlane.f32.xlu1 %v2826_v21  ;;  %v2841_v40 = vsel %vm2702_vm3, %v11012_v17, 0.0  ;;  %v11018_v0 = vpop.eup %9778 }
 0x51b   :  { %v2844_v9 = vsel %vm2702_vm3, %v11018_v0, 0.0 }
 0x51c   :  { %v11029_v42 = vpop.eup %9780 }
 0x51d   :  { %2842 = vadd.xlane.f32.xlu0 %v2841_v40  ;;  %v2838_v62 = vsel %vm2702_vm3, %v11029_v42, 0.0 }
 0x521   :  { %2845 = vadd.xlane.f32.xlu0 %v2844_v9 }
 0x52b   :  { %1767 = vrot.lane.b32.xlu1 %v10271_v32, %s9965_s2 }
 0x53f   :  { %v2801_v3 = vpop.xlane.xlu0 %2800 }
 0x540   :  { %9782 = vrcp.f32 %v2801_v3 }
 0x542   :  { %v2804_v5 = vpop.xlane.xlu1 %2803 }
 0x543   :  { %9784 = vrcp.f32 %v2804_v5  ;;  %v2819_v46 = vpop.xlane.xlu0 %2818 }
 0x547   :  { %v2822_v35 = vpop.xlane.xlu0 %2821 }
 0x54a   :  { %v9783_v53 = vpop.eup %9782 }
 0x54b   :  { %v2863_v39 = vmul.f32 %v9783_v53, %v10946_v49  ;;  %v2807_v28 = vpop.xlane.xlu0 %2806 }
 0x54c   :  { %9786 = vrcp.f32 %v2807_v28 }
 0x54d   :  { %v9785_v44 = vpop.eup %9784 }
 0x54e   :  { %v2864_v19 = vmul.f32 %v9785_v44, %v10950_v14 }
 0x54f   :  { %2839 = vadd.xlane.f32.xlu1 %v2838_v62  ;;  %v1978_v62 = vcombine.high %v10271_v32, %v11027_v58 }
 0x550   :  { %v2879_v24 = vpack.c.bf16 %v2864_v19, %v2863_v39  ;;  %v1977_v19 = vcombine.low %v10271_v32, %v11027_v58 }
 0x552   :  { %9298 = vmatmul.mubr.msk.bf16.vlgmr.msra.gmra.mrb[32].mxu1 %vm2702_vm3, %v2879_v24 }
 0x553   :  { %9308 = vmatpush3.bf16.msra.mxu1 %v10857_v16  ;;  %9309 = vmatprep.mubr.msk.bf16.mxu1 %vm9967_vm1, %v12824_v61 }
 0x554   :  { %9319 = vmatprep.subr.bf16.mxu1 %v12824_v61 }
 0x556   :  { %v9787_v45 = vpop.eup %9786 }
 0x557   :  { %v2865_v43 = vmul.f32 %v9787_v45, %v10962_v56 }
 0x561   :  { %v11040_v49 = vpop.xlane.xlu0 %2830 }
 0x565   :  { %v2810_v14 = vpop.xlane.xlu1 %2809 }
 0x566   :  { %9788 = vrcp.f32 %v2810_v14 }
 0x567   :  { %9790 = vrcp.f32 %v2822_v35 }
 0x568   :  { %9792 = vrcp.f32 %v2819_v46 }
 0x569   :  { %v2813_v22 = vpop.xlane.xlu0 %2812  ;;  %v11042_v31 = vpop.xlane.xlu1 %2833 }
 0x56a   :  { %9794 = vrcp.f32 %v2813_v22 }
 0x56d   :  { %v2816_v16 = vpop.xlane.xlu1 %2815 }
 0x56e   :  { %9796 = vrcp.f32 %v2816_v16 }
 0x56f   :  { %9798 = vrcp.f32 %v11042_v31 }
 0x570   :  { %v9789_v1 = vpop.eup %9788 }
 0x571   :  { %v2866_v51 = vmul.f32 %v9789_v1, %v10976_v48  ;;  %v9791_v11 = vpop.eup %9790  ;;  %v2825_v44 = vpop.xlane.xlu0 %2824  ;;  %v1985_v1 = vrot.slane %v1977_v19, %v10312_v50 }
 0x572   :  { %v9793_v52 = vpop.eup %9792  ;;  %v2870_v8 = vmul.f32 %v9791_v11, %v10958_v59  ;;  %v1926_v59 = vcombine.high %v10998_v15, %v11025_v60 }
 0x573   :  { %v2880_v63 = vpack.c.bf16 %v2866_v51, %v2865_v43  ;;  %v2869_v56 = vmul.f32 %v9793_v52, %v10954_v54  ;;  %v1909_v54 = vcombine.low %v10265_v26, %v11000_v6  ;;  %v1992_v43 = vrot.slane %v1978_v62, %v10312_v50 }
 0x574   :  { %v9795_v4 = vpop.eup %9794  ;;  %v1940_v10 = vrot.slane %v1926_v59, %v10312_v50 }
 0x575   :  { %9304 = vmatmul.mubr.msk.bf16.vlgmr.msra.gmra.mrb[20].mxu0 %vm2702_vm3, %v2880_v63  ;;  %v2867_v48 = vmul.f32 %v9795_v4, %v10982_v7  ;;  %v2882_v40 = vpack.c.bf16 %v2870_v8, %v2869_v56  ;;  %v1910_v7 = vcombine.high %v10265_v26, %v11000_v6  ;;  %v1917_v9 = vrot.slane %v1909_v54, %v10312_v50 }
 0x576   :  { %9314 = vmatpush3.bf16.msra.mxu0 %v10859_v37  ;;  %9315 = vmatprep.mubr.msk.bf16.mxu0 %vm9967_vm1, %v12824_v61  ;;  %v1925_v37 = vcombine.low %v10998_v15, %v11025_v60 }
 0x577   :  { %9325 = vmatprep.subr.bf16.mxu0 %v12824_v61  ;;  %v1924_v27 = vrot.slane %v1910_v7, %v10312_v50 }
 0x578   :  { %v9797_v12 = vpop.eup %9796 }
 0x579   :  { %v2868_v36 = vmul.f32 %v9797_v12, %v10988_v25  ;;  %v1933_v25 = vrot.slane %v1925_v37, %v10312_v50  ;;  %v1957_v5 = vcombine.low %v1924_v27, %v1940_v10  ;;  %v1958_v53 = vcombine.high %v1924_v27, %v1940_v10 }
 0x57b   :  { %v2881_v21 = vpack.c.bf16 %v2868_v36, %v2867_v48  ;;  %v1941_v34 = vcombine.low %v1917_v9, %v1933_v25  ;;  %v1942_v3 = vcombine.high %v1917_v9, %v1933_v25  ;;  %v1965_v26 = vrot.slane %v1957_v5, %v10317_v57 }
 0x57c   :  { %v1972_v6 = vrot.slane %v1958_v53, %v10317_v57 }
 0x57d   :  { %9310 = vmatmul.mubr.msk.bf16.vlgmr.msra.gmra.mrb[36].mxu1 %vm2702_vm3, %v2881_v21  ;;  %9316 = vmatmul.mubr.msk.bf16.vlgmr.msra.gmra.mrb[24].mxu0 %vm2702_vm3, %v2882_v40  ;;  %v1949_v39 = vrot.slane %v1941_v34, %v10317_v57  ;;  %v1956_v15 = vrot.slane %v1942_v3, %v10317_v57 }
 0x57e   :  { %9321 = vmatprep.mubr.msk.bf16.mxu1 %vm9967_vm1, %v12824_v61  ;;  %9327 = vmatprep.mubr.msk.bf16.mxu0 %vm9967_vm1, %v12824_v61  ;;  %v2197_v16 = vcombine.low %v1965_v26, %v1972_v6  ;;  %v8789_v45 = vcombine.high %v1965_v26, %v1972_v6 }
 0x57f   :  { %v2181_v46 = vcombine.low %v1949_v39, %v1956_v15  ;;  %v8788_v35 = vcombine.high %v1949_v39, %v1956_v15  ;;  %v9799_v15 = vpop.eup %9798 }
 0x580   :  { %v2204_v12 = vrot.slane %v2197_v16, %v10312_v50  ;;  %v2212_v56 = vrot.slane %v8789_v45, %v10312_v50 }
 0x581   :  { %v2188_v32 = vrot.slane %v2181_v46, %v10312_v50  ;;  %v2196_v58 = vrot.slane %v8788_v35, %v10312_v50 }
 0x582   :  { %v2229_v25 = vcombine.low %v2204_v12, %v2212_v56 }
 0x583   :  { %v2213_v54 = vcombine.low %v2188_v32, %v2196_v58  ;;  %v2214_v3 = vcombine.high %v2188_v32, %v2196_v58  ;;  %v2874_v32 = vmul.f32 %v9799_v15, %v10980_v47 }
 0x585   :  { %v2221_v5 = vrot.slane %v2213_v54, %v10317_v57  ;;  %v12838_v54 = vmov 0  }
 0x5a6   :  { %v11081_v24 = vpop.xlane.xlu0 %2836 }
 0x5a7   :  { %v2828_v60 = vpop.xlane.xlu1 %2827 }
 0x5a8   :  { %9800 = vrcp.f32 %v2828_v60  ;;  %v2237_v60 = vrot.slane %v2229_v25, %v10317_v57 }
 0x5a9   :  { %9802 = vrcp.f32 %v11040_v49 }
 0x5aa   :  { %v2843_v8 = vpop.xlane.xlu0 %2842  ;;  %9804 = vrcp.f32 %v2825_v44  ;;  %v2230_v44 = vcombine.high %v2204_v12, %v2212_v56 }
 0x5ab   :  { %v1768_v28 = vpop.permute.xlu1 %1767 }
 0x5ac   :  { %v1993_v14 = vcombine.low %v10996_v20, %v1768_v28  ;;  %v1994_v22 = vcombine.high %v10996_v20, %v1768_v28  ;;  %v2244_v16 = vrot.slane %v2230_v44, %v10317_v57 }
 0x5ae   :  { %v2001_v51 = vrot.slane %v1993_v14, %v10312_v50  ;;  %v2008_v63 = vrot.slane %v1994_v22, %v10312_v50  ;;  %v2846_v49 = vpop.xlane.xlu0 %2845  ;;  %v2228_v22 = vrot.slane %v2214_v3, %v10317_v57 }
 0x5af   :  { %9806 = vrcp.f32 %v2846_v49 }
 0x5b0   :  { %v2009_v11 = vcombine.low %v1985_v1, %v2001_v51  ;;  %v2010_v52 = vcombine.high %v1985_v1, %v2001_v51  ;;  %v2025_v4 = vcombine.low %v1992_v43, %v2008_v63  ;;  %v2026_v20 = vcombine.high %v1992_v43, %v2008_v63 }
 0x5b1   :  { %9808 = vrcp.f32 %v2843_v8  ;;  %v2245_v1 = vcombine.low %v2221_v5, %v2237_v60  ;;  %v2246_v51 = vcombine.high %v2221_v5, %v2237_v60  ;;  %v2247_v56 = vcombine.low %v2228_v22, %v2244_v16 }
 0x5b2   :  { %v2017_v48 = vrot.slane %v2009_v11, %v10317_v57  ;;  %v2024_v36 = vrot.slane %v2010_v52, %v10317_v57  ;;  %v2033_v21 = vrot.slane %v2025_v4, %v10317_v57  ;;  %v2040_v31 = vrot.slane %v2026_v20, %v10317_v57  ;;  %v9801_v62 = vpop.eup %9800 }
 0x5b3   :  { %v9803_v14 = vpop.eup %9802  ;;  %v2872_v58 = vmul.f32 %v9801_v62, %v11008_v29  ;;  %9810 = vrcp.f32 %v11081_v24 }
 0x5b4   :  { %v2249_v40 = vcombine.low %v2017_v48, %v2024_v36  ;;  %v8790_v37 = vcombine.high %v2017_v48, %v2024_v36  ;;  %v2265_v59 = vcombine.low %v2033_v21, %v2040_v31  ;;  %v8791_v7 = vcombine.high %v2033_v21, %v2040_v31  ;;  %v9805_v45 = vpop.eup %9804 }
 0x5b5   :  { %v2873_v8 = vmul.f32 %v9803_v14, %v10971_v55  ;;  %v2871_v12 = vmul.f32 %v9805_v45, %v10992_v23  ;;  %v2248_v48 = vcombine.high %v2228_v22, %v2244_v16 }
 0x5b6   :  { %v2256_v9 = vrot.slane %v2249_v40, %v10312_v50  ;;  %v2264_v10 = vrot.slane %v8790_v37, %v10312_v50  ;;  %v2272_v27 = vrot.slane %v2265_v59, %v10312_v50  ;;  %v2280_v34 = vrot.slane %v8791_v7, %v10312_v50 }
 0x5b7   :  { %v2883_v36 = vpack.c.bf16 %v2872_v58, %v2871_v12  ;;  %v2884_v21 = vpack.c.bf16 %v2874_v32, %v2873_v8 }
 0x5b8   :  { %v2281_v53 = vcombine.low %v2256_v9, %v2264_v10  ;;  %v2282_v39 = vcombine.high %v2256_v9, %v2264_v10  ;;  %v2297_v26 = vcombine.low %v2272_v27, %v2280_v34  ;;  %v2298_v6 = vcombine.high %v2272_v27, %v2280_v34 }
 0x5b9   :  { %v9807_v47 = vpop.eup %9806 }
 0x5ba   :  { %v2289_v19 = vrot.slane %v2281_v53, %v10317_v57  ;;  %v2305_v46 = vrot.slane %v2297_v26, %v10317_v57  ;;  %v2296_v35 = vrot.slane %v2282_v39, %v10317_v57  ;;  %v2312_v28 = vrot.slane %v2298_v6, %v10317_v57 }
 0x5bb   :  { %v9809_v55 = vpop.eup %9808  ;;  %v2878_v23 = vmul.f32 %v9807_v47, %v11018_v0 }
 0x5bc   :  { %v2313_v43 = vcombine.low %v2289_v19, %v2305_v46  ;;  %v2314_v63 = vcombine.high %v2289_v19, %v2305_v46  ;;  %v2315_v4 = vcombine.low %v2296_v35, %v2312_v28  ;;  %v2316_v20 = vcombine.high %v2296_v35, %v2312_v28 }
 0x5bd   :  { %v2877_v40 = vmul.f32 %v9809_v55, %v11012_v17  ;;  %v9811_v7 = vpop.eup %9810 }
 0x5be   :  { %v2321_v11 = vpack.c.bf16 %v2313_v43, %v2245_v1  ;;  %v2322_v52 = vpack.c.bf16 %v2314_v63, %v2246_v51  ;;  %v2323_v29 = vpack.c.bf16 %v2315_v4, %v2247_v56  ;;  %v2324_v31 = vpack.c.bf16 %v2316_v20, %v2248_v48 }
 0x5bf   :  { %v2886_v37 = vpack.c.bf16 %v2878_v23, %v2877_v40  ;;  %v2875_v0 = vmul.f32 %v9811_v7, %v11006_v13 }
 0x5c0   :  { %9320 = vmatpush3.bf16.msra.mxu1 %v2321_v11  ;;  %9326 = vmatpush3.bf16.msra.mxu0 %v2322_v52 }
 0x5c1   :  { %9331 = vmatprep.subr.bf16.mxu1 %v12824_v61  ;;  %9337 = vmatprep.subr.bf16.mxu0 %v12824_v61 }
 0x5c3   :  { %9322 = vmatmul.mubr.msk.bf16.vlgmr.msra.gmra.mrb[40].mxu1 %vm2702_vm3, %v2883_v36  ;;  %9328 = vmatmul.mubr.msk.bf16.vlgmr.msra.gmra.mrb[28].mxu0 %vm2702_vm3, %v2884_v21 }
 0x5c4   :  { %9332 = vmatpush3.bf16.msra.mxu1 %v2323_v29  ;;  %9338 = vmatpush3.bf16.msra.mxu0 %v2324_v31 }
 0x5c5   :  { %9339 = vmatprep.mubr.msk.bf16.mxu0 %vm9967_vm1, %v12824_v61  ;;  %9333 = vmatprep.mubr.msk.bf16.mxu1 %vm9967_vm1, %v12824_v61 }
 0x5cb   :  { %9340 = vmatmul.mubr.msk.bf16.vlgmr.msra.gmra.mrb[32].mxu0 %vm2702_vm3, %v2886_v37 }
 0x5cc   :  { %4173 = vmatprep.mubr.bf16.mxu0 %v12838_v54 }
 0x5dc   :  { %v2840_v59 = vpop.xlane.xlu1 %2839 }
 0x5dd   :  { %9812 = vrcp.f32 %v2840_v59 }
 0x5e7   :  { %v9813_v25 = vpop.eup %9812 }
 0x5e8   :  { %v2876_v9 = vmul.f32 %v9813_v25, %v11029_v42 }
 0x5ea   :  { %v2885_v10 = vpack.c.bf16 %v2876_v9, %v2875_v0 }
 0x5ec   :  { %9334 = vmatmul.mubr.msk.bf16.vlgmr.msra.gmra.mrb[44].mxu1 %vm2702_vm3, %v2885_v10 }
 0x625   :  { %v2924_v49 = vpop.f32.mrb[32].mxu1 }
 0x626   :  { %v9299_v17 = vpop.f32.mrb[33].mxu1 }
 0x627   :  { %v2927_v27 = vpop.f32.mrb[34].mxu1 }
 0x628   :  { %v9300_v34 = vpop.f32.mrb[35].mxu1 }
 0x648   :  { %v2968_v3 = vpop.f32.mrb[20].mxu0 }
 0x649   :  { %v9305_v5 = vpop.f32.mrb[21].mxu0 }
 0x64a   :  { %v2971_v53 = vpop.f32.mrb[22].mxu0 }
 0x64b   :  { %v9306_v44 = vpop.f32.mrb[23].mxu0 }
 0x650   :  { %v3012_v24 = vpop.f32.mrb[36].mxu1  ;;  %v3056_v39 = vpop.f32.mrb[24].mxu0 }
 0x651   :  { %v3239_v15 = vcombine.low %v2924_v49, %v3012_v24  ;;  %v3240_v60 = vcombine.high %v2924_v49, %v3012_v24  ;;  %v3255_v26 = vcombine.low %v2968_v3, %v3056_v39  ;;  %v3256_v6 = vcombine.high %v2968_v3, %v3056_v39  ;;  %v9311_v13 = vpop.f32.mrb[37].mxu1  ;;  %v9317_v19 = vpop.f32.mrb[25].mxu0 }
 0x652   :  { %v3015_v42 = vpop.f32.mrb[38].mxu1  ;;  %v3059_v62 = vpop.f32.mrb[26].mxu0 }
 0x653   :  { %v3247_v46 = vrot.slane %v3239_v15, %v10312_v50  ;;  %v3254_v35 = vrot.slane %v3240_v60, %v10312_v50  ;;  %v3263_v28 = vrot.slane %v3255_v26, %v10312_v50  ;;  %v3270_v14 = vrot.slane %v3256_v6, %v10312_v50  ;;  %v9312_v22 = vpop.f32.mrb[39].mxu1  ;;  %v9318_v16 = vpop.f32.mrb[27].mxu0 }
 0x654   :  { %v3307_v45 = vcombine.low %v2927_v27, %v3015_v42  ;;  %v3308_v1 = vcombine.high %v2927_v27, %v3015_v42  ;;  %v3323_v43 = vcombine.low %v2971_v53, %v3059_v62  ;;  %v3324_v51 = vcombine.high %v2971_v53, %v3059_v62 }
 0x655   :  { %v3271_v63 = vcombine.low %v3247_v46, %v3263_v28  ;;  %v3272_v32 = vcombine.high %v3247_v46, %v3263_v28  ;;  %v3287_v58 = vcombine.low %v3254_v35, %v3270_v14  ;;  %v3288_v11 = vcombine.high %v3254_v35, %v3270_v14 }
 0x656   :  { %v3315_v52 = vrot.slane %v3307_v45, %v10312_v50  ;;  %v3322_v4 = vrot.slane %v3308_v1, %v10312_v50  ;;  %v3331_v20 = vrot.slane %v3323_v43, %v10312_v50  ;;  %v3338_v8 = vrot.slane %v3324_v51, %v10312_v50 }
 0x657   :  { %v3279_v12 = vrot.slane %v3271_v63, %v10317_v57  ;;  %v3286_v56 = vrot.slane %v3272_v32, %v10317_v57  ;;  %v3295_v48 = vrot.slane %v3287_v58, %v10317_v57  ;;  %v3302_v36 = vrot.slane %v3288_v11, %v10317_v57 }
 0x658   :  { %v3339_v21 = vcombine.low %v3315_v52, %v3331_v20  ;;  %v3340_v47 = vcombine.high %v3315_v52, %v3331_v20  ;;  %v3355_v29 = vcombine.low %v3322_v4, %v3338_v8  ;;  %v3356_v31 = vcombine.high %v3322_v4, %v3338_v8  ;;  %v9614_v20 = vld [vmem:[%s12810_s5] sm:$0xff]   ;;  %v9615_v8 = vld [vmem:[%s12810_s5 + $0x8] sm:$0xff]  }
 0x659   :  { %v3511_v55 = vcombine.low %v3279_v12, %v3286_v56  ;;  %v8808_v23 = vcombine.high %v3279_v12, %v3286_v56  ;;  %v3527_v40 = vcombine.low %v3295_v48, %v3302_v36  ;;  %v8809_v37 = vcombine.high %v3295_v48, %v3302_v36  ;;  %9343 = vmatprep.subr.bf16.mxu1 %v9614_v20  ;;  %v9616_v36 = vld [vmem:[%s12810_s5 + $0x10] sm:$0xff]  }
 0x65a   :  { %v3347_v59 = vrot.slane %v3339_v21, %v10317_v57  ;;  %v3354_v7 = vrot.slane %v3340_v47, %v10317_v57  ;;  %v3363_v25 = vrot.slane %v3355_v29, %v10317_v57  ;;  %v3370_v0 = vrot.slane %v3356_v31, %v10317_v57  ;;  %9344 = vmatpush3.bf16.msra.mxu1 %v9614_v20  ;;  %v9617_v21 = vld [vmem:[%s12810_s5 + $0x18] sm:$0xff]   ;;  %v9618_v47 = vld [vmem:[%s12810_s5 + $0x20] sm:$0xff]  }
 0x65b   :  { %v3518_v9 = vrot.slane %v3511_v55, %v10312_v50  ;;  %v3526_v10 = vrot.slane %v8808_v23, %v10312_v50  ;;  %v3534_v49 = vrot.slane %v3527_v40, %v10312_v50  ;;  %v3542_v17 = vrot.slane %v8809_v37, %v10312_v50  ;;  %9345 = vmatprep.subr.bf16.mxu1 %v9615_v8 }
 0x65c   :  { %v3579_v27 = vcombine.low %v3347_v59, %v3354_v7  ;;  %v8810_v34 = vcombine.high %v3347_v59, %v3354_v7  ;;  %v3595_v3 = vcombine.low %v3363_v25, %v3370_v0  ;;  %v8811_v5 = vcombine.high %v3363_v25, %v3370_v0 }
 0x65d   :  { %v3544_v53 = vcombine.high %v3518_v9, %v3526_v10  ;;  %v3560_v44 = vcombine.high %v3534_v49, %v3542_v17  ;;  %v3543_v24 = vcombine.low %v3518_v9, %v3526_v10  ;;  %v3559_v39 = vcombine.low %v3534_v49, %v3542_v17 }
 0x65e   :  { %v3586_v15 = vrot.slane %v3579_v27, %v10312_v50  ;;  %v3594_v60 = vrot.slane %v8810_v34, %v10312_v50  ;;  %v3602_v26 = vrot.slane %v3595_v3, %v10312_v50  ;;  %v3610_v6 = vrot.slane %v8811_v5, %v10312_v50  ;;  %9346 = vmatpush3.bf16.msra.mxu1 %v9615_v8 }
 0x65f   :  { %v3558_v13 = vrot.slane %v3544_v53, %v10317_v57  ;;  %v3574_v19 = vrot.slane %v3560_v44, %v10317_v57  ;;  %v11158_v42 = vrot.slane %v3543_v24, %v10317_v57  ;;  %v11161_v62 = vrot.slane %v3559_v39, %v10317_v57  ;;  %9347 = vmatprep.subr.bf16.mxu1 %v9616_v36 }
 0x660   :  { %v3612_v46 = vcombine.high %v3586_v15, %v3594_v60  ;;  %v3628_v35 = vcombine.high %v3602_v26, %v3610_v6  ;;  %v3611_v28 = vcombine.low %v3586_v15, %v3594_v60  ;;  %v3627_v14 = vcombine.low %v3602_v26, %v3610_v6 }
 0x661   :  { %v3577_v22 = vcombine.low %v3558_v13, %v3574_v19  ;;  %v3575_v16 = vcombine.low %v11158_v42, %v11161_v62  ;;  %v3576_v45 = vcombine.high %v11158_v42, %v11161_v62  ;;  %v3578_v1 = vcombine.high %v3558_v13, %v3574_v19 }
 0x662   :  { %v3626_v43 = vrot.slane %v3612_v46, %v10317_v57  ;;  %v3642_v51 = vrot.slane %v3628_v35, %v10317_v57  ;;  %v11170_v63 = vrot.slane %v3611_v28, %v10317_v57  ;;  %v11173_v32 = vrot.slane %v3627_v14, %v10317_v57  ;;  %9348 = vmatpush3.bf16.msra.mxu1 %v9616_v36 }
 0x663   :  { %9349 = vmatprep.subr.bf16.mxu1 %v9617_v21 }
 0x664   :  { %v3645_v58 = vcombine.low %v3626_v43, %v3642_v51  ;;  %v3644_v11 = vcombine.high %v11170_v63, %v11173_v32  ;;  %v3643_v52 = vcombine.low %v11170_v63, %v11173_v32  ;;  %v3646_v4 = vcombine.high %v3626_v43, %v3642_v51 }
 0x666   :  { %v9515_v12 = vpack.i.bf16 %v3645_v58, %v3577_v22  ;;  %v9510_v56 = vpack.i.bf16 %v3644_v11, %v3576_v45  ;;  %v9520_v48 = vpack.i.bf16 %v3646_v4, %v3578_v1  ;;  %9350 = vmatpush3.bf16.msra.mxu1 %v9617_v21 }
 0x667   :  { %9351 = vmatprep.subr.bf16.mxu1 %v9618_v47 }
 0x668   :  { %9516 = vrot.lane.b32.xlu1 %v9515_v12, %s9964_s28  ;;  %9511 = vrot.lane.b32.xlu0 %v9510_v56, %s9965_s2 }
 0x66a   :  { %9352 = vmatpush3.bf16.msra.mxu1 %v9618_v47 }
 0x66c   :  { %9521 = vrot.lane.b32.xlu0 %v9520_v48, %s9963_s0 }
 0x696   :  { %v3100_v29 = vpop.f32.mrb[40].mxu1  ;;  %v3144_v31 = vpop.f32.mrb[28].mxu0 }
 0x697   :  { %v9323_v55 = vpop.f32.mrb[41].mxu1  ;;  %v9329_v23 = vpop.f32.mrb[29].mxu0 }
 0x698   :  { %v3103_v40 = vpop.f32.mrb[42].mxu1  ;;  %v3147_v37 = vpop.f32.mrb[30].mxu0 }
 0x699   :  { %v9324_v59 = vpop.f32.mrb[43].mxu1  ;;  %v9330_v7 = vpop.f32.mrb[31].mxu0 }
 0x69e   :  { %v3232_v25 = vpop.f32.mrb[32].mxu0 }
 0x69f   :  { %v3391_v0 = vcombine.low %v3144_v31, %v3232_v25  ;;  %v3392_v9 = vcombine.high %v3144_v31, %v3232_v25  ;;  %v9341_v10 = vpop.f32.mrb[33].mxu0 }
 0x6a0   :  { %v3235_v49 = vpop.f32.mrb[34].mxu0 }
 0x6a1   :  { %v3459_v17 = vcombine.low %v3147_v37, %v3235_v49  ;;  %v3460_v27 = vcombine.high %v3147_v37, %v3235_v49  ;;  %v9342_v34 = vpop.f32.mrb[35].mxu0  ;;  %v3399_v24 = vrot.slane %v3391_v0, %v10312_v50  ;;  %v3406_v39 = vrot.slane %v3392_v9, %v10312_v50 }
 0x6a3   :  { %v3467_v22 = vrot.slane %v3459_v17, %v10312_v50  ;;  %v3474_v45 = vrot.slane %v3460_v27, %v10312_v50 }
 0x6bf   :  { %v3188_v3 = vpop.f32.mrb[44].mxu1 }
 0x6c0   :  { %v3375_v5 = vcombine.low %v3100_v29, %v3188_v3  ;;  %v3376_v53 = vcombine.high %v3100_v29, %v3188_v3  ;;  %v9335_v44 = vpop.f32.mrb[45].mxu1  ;;  %v9619_v3 = vld [vmem:[%s12810_s5 + $0x28] sm:$0xff]  }
 0x6c1   :  { %v3191_v15 = vpop.f32.mrb[46].mxu1  ;;  %9353 = vmatprep.subr.bf16.mxu1 %v9619_v3 }
 0x6c2   :  { %v3383_v60 = vrot.slane %v3375_v5, %v10312_v50  ;;  %v3390_v26 = vrot.slane %v3376_v53, %v10312_v50  ;;  %v3443_v6 = vcombine.low %v3103_v40, %v3191_v15  ;;  %v3444_v13 = vcombine.high %v3103_v40, %v3191_v15  ;;  %v9336_v19 = vpop.f32.mrb[47].mxu1  ;;  %9354 = vmatpush3.bf16.msra.mxu1 %v9619_v3 }
 0x6c4   :  { %v3407_v46 = vcombine.low %v3383_v60, %v3399_v24  ;;  %v3408_v35 = vcombine.high %v3383_v60, %v3399_v24  ;;  %v3423_v28 = vcombine.low %v3390_v26, %v3406_v39  ;;  %v3424_v14 = vcombine.high %v3390_v26, %v3406_v39 }
 0x6c5   :  { %v3451_v1 = vrot.slane %v3443_v6, %v10312_v50  ;;  %v3458_v43 = vrot.slane %v3444_v13, %v10312_v50 }
 0x6c6   :  { %v3415_v51 = vrot.slane %v3407_v46, %v10317_v57  ;;  %v3422_v58 = vrot.slane %v3408_v35, %v10317_v57  ;;  %v3431_v11 = vrot.slane %v3423_v28, %v10317_v57  ;;  %v3438_v4 = vrot.slane %v3424_v14, %v10317_v57 }
 0x6c7   :  { %v3475_v20 = vcombine.low %v3451_v1, %v3467_v22  ;;  %v3476_v8 = vcombine.high %v3451_v1, %v3467_v22  ;;  %v3491_v12 = vcombine.low %v3458_v43, %v3474_v45  ;;  %v3492_v56 = vcombine.high %v3458_v43, %v3474_v45  ;;  %v9620_v45 = vld [vmem:[%s12810_s5 + $0x30] sm:$0xff]  }
 0x6c8   :  { %v3647_v48 = vcombine.low %v3415_v51, %v3422_v58  ;;  %v8812_v36 = vcombine.high %v3415_v51, %v3422_v58  ;;  %v3663_v21 = vcombine.low %v3431_v11, %v3438_v4  ;;  %v8813_v47 = vcombine.high %v3431_v11, %v3438_v4  ;;  %9355 = vmatprep.subr.bf16.mxu1 %v9620_v45 }
 0x6c9   :  { %v3483_v29 = vrot.slane %v3475_v20, %v10317_v57  ;;  %v3490_v31 = vrot.slane %v3476_v8, %v10317_v57  ;;  %v3499_v55 = vrot.slane %v3491_v12, %v10317_v57  ;;  %v3506_v23 = vrot.slane %v3492_v56, %v10317_v57  ;;  %9356 = vmatpush3.bf16.msra.mxu1 %v9620_v45 }
 0x6ca   :  { %v3654_v40 = vrot.slane %v3647_v48, %v10312_v50  ;;  %v3662_v37 = vrot.slane %v8812_v36, %v10312_v50  ;;  %v3670_v59 = vrot.slane %v3663_v21, %v10312_v50  ;;  %v3678_v7 = vrot.slane %v8813_v47, %v10312_v50  ;;  %v9621_v36 = vld [vmem:[%s12810_s5 + $0x38] sm:$0xff]  }
 0x6cb   :  { %v3715_v25 = vcombine.low %v3483_v29, %v3490_v31  ;;  %v8814_v0 = vcombine.high %v3483_v29, %v3490_v31  ;;  %v3731_v9 = vcombine.low %v3499_v55, %v3506_v23  ;;  %v8815_v10 = vcombine.high %v3499_v55, %v3506_v23  ;;  %9357 = vmatprep.subr.bf16.mxu1 %v9621_v36 }
 0x6cc   :  { %v3679_v49 = vcombine.low %v3654_v40, %v3662_v37  ;;  %v3695_v17 = vcombine.low %v3670_v59, %v3678_v7  ;;  %v3680_v27 = vcombine.high %v3654_v40, %v3662_v37  ;;  %v3696_v34 = vcombine.high %v3670_v59, %v3678_v7 }
 0x6cd   :  { %v3722_v5 = vrot.slane %v3715_v25, %v10312_v50  ;;  %v3730_v53 = vrot.slane %v8814_v0, %v10312_v50  ;;  %v3738_v44 = vrot.slane %v3731_v9, %v10312_v50  ;;  %v3746_v24 = vrot.slane %v8815_v10, %v10312_v50  ;;  %9358 = vmatpush3.bf16.msra.mxu1 %v9621_v36  ;;  %v9633_v36 = vld [vmem:[%s12811_s6 + $0x34] ss:$8 sps:$4 sm:$0xff]  }
 0x6ce   :  { %v3687_v39 = vrot.slane %v3679_v49, %v10317_v57  ;;  %v3703_v15 = vrot.slane %v3695_v17, %v10317_v57  ;;  %v3694_v60 = vrot.slane %v3680_v27, %v10317_v57  ;;  %v3710_v26 = vrot.slane %v3696_v34, %v10317_v57 }
 0x6cf   :  { %v3747_v6 = vcombine.low %v3722_v5, %v3730_v53  ;;  %v3763_v13 = vcombine.low %v3738_v44, %v3746_v24  ;;  %v3748_v19 = vcombine.high %v3722_v5, %v3730_v53  ;;  %v3764_v46 = vcombine.high %v3738_v44, %v3746_v24 }
 0x6d0   :  { %v3711_v35 = vcombine.low %v3687_v39, %v3703_v15  ;;  %v3712_v28 = vcombine.high %v3687_v39, %v3703_v15  ;;  %v3713_v14 = vcombine.low %v3694_v60, %v3710_v26  ;;  %v3714_v22 = vcombine.high %v3694_v60, %v3710_v26 }
 0x6d1   :  { %v3755_v1 = vrot.slane %v3747_v6, %v10317_v57  ;;  %v3771_v43 = vrot.slane %v3763_v13, %v10317_v57  ;;  %v3762_v51 = vrot.slane %v3748_v19, %v10317_v57  ;;  %v3778_v58 = vrot.slane %v3764_v46, %v10317_v57  ;;  %v11263_v6 = vld [vmem:[%s12808_s3] sm:$0xff] }
 0x6d2   :  { %v12823_v26 = vsub.s32 3, %v10170_v18 }
 0x6d3   :  { %v3780_v11 = vcombine.high %v3755_v1, %v3771_v43  ;;  %v3779_v4 = vcombine.low %v3755_v1, %v3771_v43  ;;  %v3781_v20 = vcombine.low %v3762_v51, %v3778_v58  ;;  %v3782_v8 = vcombine.high %v3762_v51, %v3778_v58 }
 0x6d4   :  { %v3865_v13 = vrot.slane %v11263_v6, %v12823_v26 }
 0x6d5   :  { %v9525_v12 = vpack.i.bf16 %v3780_v11, %v3712_v28  ;;  %v9530_v56 = vpack.i.bf16 %v3781_v20, %v3713_v14  ;;  %v9535_v48 = vpack.i.bf16 %v3782_v8, %v3714_v22  ;;  %v9622_v20 = vld [vmem:[%s12811_s6] ss:$8 sps:$4 sm:$0xff]   ;;  %v9624_v8 = vld [vmem:[%s12811_s6 + $0x4] ss:$8 sps:$4 sm:$0xff]  }
 0x6d6   :  { %4141 = vmatprep.subr.bf16.mxu0 %v9624_v8 }
 0x6d7   :  { %9526 = vrot.lane.b32.xlu1 %v9525_v12, %s9965_s2  ;;  %4142 = vmatpush1.bf16.msra.mxu0 %v9622_v20  ;;  %v9627_v12 = vld [vmem:[%s12811_s6 + $0x14] ss:$8 sps:$4 sm:$0xff]  }
 0x6d8   :  { %4143 = vmatprep.subr.bf16.mxu0 %v9627_v12 }
 0x6da   :  { %v9517_v21 = vpop.permute.xlu1 %9516  ;;  %v9512_v47 = vpop.permute.xlu0 %9511 }
 0x6db   :  { %9531 = vrot.lane.b32.xlu1 %v9530_v56, %s9964_s28  ;;  %v9514_v29 = vunpack.i.h.bf16 %v9512_v47  ;;  %v9513_v31 = vunpack.i.l.bf16 %v9512_v47  ;;  %v9519_v55 = vunpack.i.h.bf16 %v9517_v21  ;;  %v9518_v23 = vunpack.i.l.bf16 %v9517_v21  ;;  %v9628_v56 = vld [vmem:[%s12811_s6 + $0x20] ss:$8 sps:$4 sm:$0xff]   ;;  %v9631_v21 = vld [vmem:[%s12811_s6 + $0x30] ss:$8 sps:$4 sm:$0xff]  }
 0x6dc   :  { %v9634_v47 = vld [vmem:[%s12811_s6 + $0x40] ss:$8 sps:$4 sm:$0xff]  }
 0x6dd   :  { %v3831_v40 = vsel %vm2325_vm2, %v3575_v16, %v9513_v31  ;;  %v3832_v37 = vsel %vm2325_vm2, %v3643_v52, %v9514_v29  ;;  %v9636_v29 = vld [vmem:[%s12811_s6 + $0x44] ss:$8 sps:$4 sm:$0xff]   ;;  %v9639_v31 = vld [vmem:[%s12811_s6 + $0x54] ss:$8 sps:$4 sm:$0xff]  }
 0x6de   :  { %v9522_v59 = vpop.permute.xlu0 %9521  ;;  %v3835_v0 = vsel %vm139_vm0, %v3831_v40, %v9518_v23  ;;  %v3836_v9 = vsel %vm139_vm0, %v3832_v37, %v9519_v55  ;;  %v9637_v55 = vld [vmem:[%s12811_s6 + $0x50] ss:$8 sps:$4 sm:$0xff]   ;;  %v9642_v23 = vld [vmem:[%s12811_s6 + $0x64] ss:$8 sps:$4 sm:$0xff]   ;;  %v9640_v40 = vld [vmem:[%s12811_s6 + $0x60] ss:$8 sps:$4 sm:$0xff]  }
 0x6df   :  { %9536 = vrot.lane.b32.xlu1 %v9535_v48, %s9963_s0  ;;  %v9524_v7 = vunpack.i.h.bf16 %v9522_v59  ;;  %v9523_v25 = vunpack.i.l.bf16 %v9522_v59  ;;  %v9630_v48 = vld [vmem:[%s12811_s6 + $0x24] ss:$8 sps:$4 sm:$0xff]   ;;  %v9645_v37 = vld [vmem:[%s12811_s6 + $0x74] ss:$8 sps:$4 sm:$0xff]   ;;  %v9643_v59 = vld [vmem:[%s12811_s6 + $0x70] ss:$8 sps:$4 sm:$0xff]  }
 0x6e1   :  { %v3840_v10 = vsel %vm3839_vm4, %v3835_v0, %v9523_v25  ;;  %v3841_v42 = vsel %vm3839_vm4, %v3836_v9, %v9524_v7 }
 0x6e2   :  { %v3844_v62 = vpack.c.bf16 %v3841_v42, %v3840_v10 }
 0x6e4   :  { %9359 = vmatprep.mubr.bf16.mxu1 %v3844_v62 }
 0x749   :  { %v9527_v16 = vpop.permute.xlu1 %9526 }
 0x74a   :  { %v9529_v32 = vunpack.i.h.bf16 %v9527_v16  ;;  %v9528_v52 = vunpack.i.l.bf16 %v9527_v16 }
 0x74c   :  { %v3833_v34 = vsel %vm2325_vm2, %v3711_v35, %v9528_v52  ;;  %v3834_v3 = vsel %vm2325_vm2, %v3779_v4, %v9529_v32 }
 0x74d   :  { %v9532_v63 = vpop.permute.xlu1 %9531 }
 0x74e   :  { %v9534_v49 = vunpack.i.h.bf16 %v9532_v63  ;;  %v9533_v17 = vunpack.i.l.bf16 %v9532_v63 }
 0x750   :  { %v3837_v44 = vsel %vm139_vm0, %v3833_v34, %v9533_v17  ;;  %v3838_v24 = vsel %vm139_vm0, %v3834_v3, %v9534_v49 }
 0x751   :  { %v9537_v27 = vpop.permute.xlu1 %9536 }
 0x752   :  { %v9539_v5 = vunpack.i.h.bf16 %v9537_v27  ;;  %v9538_v53 = vunpack.i.l.bf16 %v9537_v27 }
 0x754   :  { %v3842_v39 = vsel %vm3839_vm4, %v3837_v44, %v9538_v53  ;;  %v3843_v15 = vsel %vm3839_vm4, %v3838_v24, %v9539_v5 }
 0x755   :  { %v3845_v60 = vpack.c.bf16 %v3843_v15, %v3842_v39 }
 0x757   :  { %9360 = vmatmul.mubr.bf16.vlgmr.msra.gmra.mrb[48].mxu1 %v3845_v60 }
 0x82a   :  { %v9361_v19 = vpop.f32.mrb[48].mxu1 }
 0x82b   :  { %v3948_v46 = vpop.f32.mrb[49].mxu1  ;;  %v3957_v11 = vadd.f32 %v9361_v19, %v3865_v13 }
 0x82c   :  { %v3949_v35 = vadd.f32 %v3948_v46, %v3865_v13  ;;  %v9362_v28 = vpop.f32.mrb[50].mxu1 }
 0x82d   :  { %v3951_v14 = vpop.f32.mrb[51].mxu1  ;;  %v3960_v1 = vadd.f32 %v9362_v28, %v3865_v13  ;;  %v11287_v4 = vadd.f32 %v3957_v11, %v10115_v38  ;;  %v9625_v38 = vld [vmem:[%s12811_s6 + $0x10] ss:$8 sps:$4 sm:$0xff]  }
 0x82e   :  { %v11269_v22 = vadd.f32 %v3949_v35, %v10105_v30  ;;  %v3952_v45 = vadd.f32 %v3951_v14, %v3865_v13  ;;  %4144 = vmatpush1.bf16.msra.mxu0 %v9625_v38  ;;  %v12822_v35 = vsub.s32 4, %v10170_v18 }
 0x82f   :  { %v11279_v58 = vadd.f32 %v3960_v1, %v10117_v41  ;;  %v3981_v41 = vmul.f32 %v11287_v4, %v11287_v4  ;;  %4145 = vmatprep.subr.bf16.mxu0 %v9630_v48 }
 0x830   :  { %v11272_v43 = vadd.f32 %v3952_v45, %v10107_v33  ;;  %3967 = vadd.xlane.f32.xlu0 %v11269_v22  ;;  %v3979_v51 = vmul.f32 %v11269_v22, %v11269_v22  ;;  %v4022_v11 = vrot.slane %v11263_v6, %v12822_v35 }
 0x831   :  { %v3982_v33 = vmul.f32 %v11279_v58, %v11279_v58 }
 0x832   :  { %3969 = vadd.xlane.f32.xlu1 %v11272_v43  ;;  %v3980_v30 = vmul.f32 %v11272_v43, %v11272_v43  ;;  %4146 = vmatpush1.bf16.msra.mxu0 %v9628_v56 }
 0x833   :  { %4147 = vmatprep.subr.bf16.mxu0 %v9633_v36 }
 0x834   :  { %3983 = vadd.xlane.f32.xlu0 %v3979_v51 }
 0x836   :  { %3973 = vadd.xlane.f32.xlu1 %v11279_v58  ;;  %4148 = vmatpush1.bf16.msra.mxu0 %v9631_v21 }
 0x837   :  { %4149 = vmatprep.subr.bf16.mxu0 %v9636_v29 }
 0x838   :  { %3985 = vadd.xlane.f32.xlu0 %v3980_v30  ;;  %v12821_v30 = vsub.s32 5, %v10170_v18 }
 0x83a   :  { %3989 = vadd.xlane.f32.xlu1 %v3982_v33  ;;  %4150 = vmatpush1.bf16.msra.mxu0 %v9634_v47  ;;  %v4030_v38 = vrot.slane %v11263_v6, %v12821_v30 }
 0x83b   :  { %4151 = vmatprep.subr.bf16.mxu0 %v9639_v31 }
 0x83c   :  { %3971 = vadd.xlane.f32.xlu0 %v11287_v4 }
 0x83e   :  { %4152 = vmatpush1.bf16.msra.mxu0 %v9637_v55 }
 0x83f   :  { %4153 = vmatprep.subr.bf16.mxu0 %v9642_v23 }
 0x840   :  { %3987 = vadd.xlane.f32.xlu0 %v3981_v41 }
 0x842   :  { %4154 = vmatpush1.bf16.msra.mxu0 %v9640_v40 }
 0x843   :  { %4155 = vmatprep.subr.bf16.mxu0 %v9645_v37 }
 0x846   :  { %4156 = vmatpush1.bf16.msra.mxu0 %v9643_v59 }
 0x8bd   :  { %v3968_v7 = vpop.xlane.xlu0 %3967 }
 0x8be   :  { %v3975_v25 = vmul.f32 0.0078125, %v3968_v7 }
 0x8bf   :  { %v3970_v0 = vpop.xlane.xlu1 %3969 }
 0x8c0   :  { %v3995_v10 = vmul.f32 %v3975_v25, %v3975_v25  ;;  %v3976_v42 = vmul.f32 0.0078125, %v3970_v0  ;;  %v4003_v14 = vsub.f32 %v11269_v22, %v3975_v25  ;;  %v9646_v0 = vld [vmem:[%s12812_s7 + $0x40] sm:$0xff]  }
 0x8c1   :  { %v3984_v9 = vpop.xlane.xlu0 %3983  ;;  %9119 = vmatprep.subr.bf16.mxu1 %v9646_v0 }
 0x8c2   :  { %v3991_v62 = vmul.f32 0.0078125, %v3984_v9  ;;  %v3996_v49 = vmul.f32 %v3976_v42, %v3976_v42  ;;  %v4004_v33 = vsub.f32 %v11272_v43, %v3976_v42  ;;  %v9647_v9 = vld [vmem:[%s12812_s7] sm:$0xff]   ;;  %v9649_v42 = vld [vmem:[%s12812_s7 + $0x8] sm:$0xff]  }
 0x8c3   :  { %v3974_v16 = vpop.xlane.xlu1 %3973  ;;  %9120 = vmatpush3.bf16.msra.mxu1 %v9647_v9 }
 0x8c4   :  { %v3999_v63 = vsub.f32 %v3991_v62, %v3995_v10  ;;  %v3978_v32 = vmul.f32 0.0078125, %v3974_v16  ;;  %v9648_v10 = vld [vmem:[%s12812_s7 + $0x48] sm:$0xff]   ;;  %v9650_v62 = vld [vmem:[%s12812_s7 + $0x50] sm:$0xff]  }
 0x8c5   :  { %v3986_v52 = vpop.xlane.xlu0 %3985  ;;  %9121 = vmatprep.subr.bf16.mxu1 %v9648_v10  ;;  %v9651_v16 = vld [vmem:[%s12812_s7 + $0x10] sm:$0xff]  }
 0x8c6   :  { %v4007_v17 = vadd.f32 1e-06, %v3999_v63  ;;  %v3992_v27 = vmul.f32 0.0078125, %v3986_v52  ;;  %v3998_v3 = vmul.f32 %v3978_v32, %v3978_v32  ;;  %v4006_v56 = vsub.f32 %v11279_v58, %v3978_v32  ;;  %v9652_v63 = vld [vmem:[%s12812_s7 + $0x58] sm:$0xff]   ;;  %v9654_v52 = vld [vmem:[%s12812_s7 + $0x60] sm:$0xff]  }
 0x8c7   :  { %v3990_v34 = vpop.xlane.xlu1 %3989  ;;  %9122 = vmatpush3.bf16.msra.mxu1 %v9649_v42  ;;  %v9653_v32 = vld [vmem:[%s12812_s7 + $0x18] sm:$0xff]  }
 0x8c8   :  { %9814 = vrsqrt.f32 %v4007_v17  ;;  %v4000_v5 = vsub.f32 %v3992_v27, %v3996_v49  ;;  %v3994_v53 = vmul.f32 0.0078125, %v3990_v34  ;;  %9123 = vmatprep.subr.bf16.mxu1 %v9650_v62  ;;  %v9655_v49 = vld [vmem:[%s12812_s7 + $0x20] sm:$0xff]   ;;  %v9656_v17 = vld [vmem:[%s12812_s7 + $0x68] sm:$0xff]   ;;  %v9658_v34 = vld [vmem:[%s12812_s7 + $0x70] sm:$0xff]  }
 0x8c9   :  { %v3972_v44 = vpop.xlane.xlu0 %3971  ;;  %v9657_v27 = vld [vmem:[%s12812_s7 + $0x28] sm:$0xff]  }
 0x8ca   :  { %v4008_v24 = vadd.f32 1e-06, %v4000_v5  ;;  %v4002_v39 = vsub.f32 %v3994_v53, %v3998_v3  ;;  %v3977_v15 = vmul.f32 0.0078125, %v3972_v44  ;;  %v9659_v3 = vld [vmem:[%s12812_s7 + $0x30] sm:$0xff]   ;;  %v9660_v5 = vld [vmem:[%s12812_s7 + $0x78] sm:$0xff]   ;;  %v11403_v44 = vsub.s32 6, %v10170_v18 }
 0x8cb   :  { %9124 = vmatpush3.bf16.msra.mxu1 %v9651_v16  ;;  %v9661_v53 = vld [vmem:[%s12812_s7 + $0x38] sm:$0xff]  }
 0x8cc   :  { %9816 = vrsqrt.f32 %v4008_v24  ;;  %v4010_v60 = vadd.f32 1e-06, %v4002_v39  ;;  %v3997_v19 = vmul.f32 %v3977_v15, %v3977_v15  ;;  %v4005_v29 = vsub.f32 %v11287_v4, %v3977_v15  ;;  %9125 = vmatprep.subr.bf16.mxu1 %v9652_v63  ;;  %v9935_v39 = vld [vmem:[%s12808_s3 + $0x8] sm:$0xff] }
 0x8cd   :  { %v3988_v13 = vpop.xlane.xlu0 %3987  ;;  %v4056_v24 = vrot.slane %v11263_v6, %v11403_v44  ;;  %v4060_v15 = vrot.slane %v9935_v39, %v11403_v44 }
 0x8ce   :  { %9818 = vrsqrt.f32 %v4010_v60  ;;  %v3993_v46 = vmul.f32 0.0078125, %v3988_v13 }
 0x8cf   :  { %9126 = vmatpush3.bf16.msra.mxu1 %v9653_v32 }
 0x8d0   :  { %v4001_v28 = vsub.f32 %v3993_v46, %v3997_v19  ;;  %9127 = vmatprep.subr.bf16.mxu1 %v9654_v52 }
 0x8d2   :  { %v9815_v45 = vpop.eup %9814  ;;  %v4009_v1 = vadd.f32 1e-06, %v4001_v28 }
 0x8d3   :  { %v4015_v51 = vmul.f32 %v9815_v45, %v4003_v14  ;;  %9128 = vmatpush3.bf16.msra.mxu1 %v9655_v49 }
 0x8d4   :  { %9820 = vrsqrt.f32 %v4009_v1  ;;  %9129 = vmatprep.subr.bf16.mxu1 %v9656_v17 }
 0x8d5   :  { %v4023_v8 = vmul.f32 %v4022_v11, %v4015_v51 }
 0x8d6   :  { %v9817_v41 = vpop.eup %9816 }
 0x8d7   :  { %v4016_v20 = vmul.f32 %v9817_v41, %v4004_v33  ;;  %v4031_v36 = vadd.f32 %v4030_v38, %v4023_v8  ;;  %9130 = vmatpush3.bf16.msra.mxu1 %v9657_v27 }
 0x8d8   :  { %v9819_v12 = vpop.eup %9818  ;;  %9131 = vmatprep.subr.bf16.mxu1 %v9658_v34 }
 0x8d9   :  { %v4024_v48 = vmul.f32 %v4022_v11, %v4016_v20  ;;  %v4018_v47 = vmul.f32 %v9819_v12, %v4006_v56 }
 0x8db   :  { %v4032_v21 = vadd.f32 %v4030_v38, %v4024_v48  ;;  %v4026_v40 = vmul.f32 %v4022_v11, %v4018_v47  ;;  %9132 = vmatpush3.bf16.msra.mxu1 %v9659_v3 }
 0x8dc   :  { %9133 = vmatprep.subr.bf16.mxu1 %v9660_v5 }
 0x8dd   :  { %v4035_v31 = vpack.c.bf16 %v4032_v21, %v4031_v36  ;;  %v4034_v7 = vadd.f32 %v4030_v38, %v4026_v40 }
 0x8de   :  { %v9821_v55 = vpop.eup %9820 }
 0x8df   :  { %4174 = vmatmul.mubr.bf16.vlgmr.msra.gmra.mrb[36].mxu0 %v4035_v31  ;;  %v4017_v23 = vmul.f32 %v9821_v55, %v4005_v29  ;;  %9134 = vmatpush3.bf16.msra.mxu1 %v9661_v53 }
 0x8e0   :  { %4183 = vmatprep.mubr.bf16.mxu0 %v12838_v54 }
 0x8e1   :  { %v4025_v37 = vmul.f32 %v4022_v11, %v4017_v23 }
 0x8e3   :  { %v4033_v59 = vadd.f32 %v4030_v38, %v4025_v37 }
 0x8e5   :  { %v4036_v25 = vpack.c.bf16 %v4034_v7, %v4033_v59 }
 0x8e7   :  { %4184 = vmatmul.mubr.bf16.gmra.mrb[40].mxu0 %v4036_v25 }
 0x8e8   :  { %4734 = vmatprep.mubr.bf16.mxu0 %v12838_v54 }
 0x9b2   :  { %v4175_v60 = vpop.f32.mrb[36].mxu0 }
 0x9b3   :  { %v11411_v13 = vadd.f32 %v4175_v60, %v4056_v24  ;;  %v4177_v19 = vpop.f32.mrb[37].mxu0 }
 0x9b4   :  { %v11413_v46 = vadd.f32 %v4177_v19, %v4060_v15  ;;  %v4179_v28 = vpop.f32.mrb[38].mxu0 }
 0x9b5   :  { %v4202_v14 = vmul.f32 0.044715, %v11411_v13  ;;  %v11416_v45 = vadd.f32 %v4179_v28, %v4056_v24  ;;  %v4181_v1 = vpop.f32.mrb[39].mxu0 }
 0x9b6   :  { %v4203_v51 = vmul.f32 0.044715, %v11413_v46  ;;  %v11419_v11 = vadd.f32 %v4181_v1, %v4060_v15 }
 0x9b7   :  { %v4210_v33 = vmul.f32 %v4202_v14, %v11411_v13  ;;  %v4204_v41 = vmul.f32 0.044715, %v11416_v45 }
 0x9b8   :  { %v4211_v20 = vmul.f32 %v4203_v51, %v11413_v46  ;;  %v4205_v8 = vmul.f32 0.044715, %v11419_v11 }
 0x9b9   :  { %v4218_v38 = vmul.f32 %v4210_v33, %v11411_v13  ;;  %v4212_v12 = vmul.f32 %v4204_v41, %v11416_v45 }
 0x9ba   :  { %v4219_v56 = vmul.f32 %v4211_v20, %v11413_v46  ;;  %v4213_v48 = vmul.f32 %v4205_v8, %v11419_v11  ;;  %v4185_v36 = vpop.f32.mrb[40].mxu0 }
 0x9bb   :  { %v4226_v21 = vadd.f32 %v4218_v38, %v11411_v13  ;;  %v4220_v47 = vmul.f32 %v4212_v12, %v11416_v45  ;;  %v11431_v29 = vadd.f32 %v4185_v36, %v4056_v24  ;;  %v4187_v31 = vpop.f32.mrb[41].mxu0  ;;  %v4196_v36 = vmul.f32 0.5, %v11416_v45 }
 0x9bc   :  { %v4221_v55 = vmul.f32 %v4213_v48, %v11419_v11  ;;  %v11434_v23 = vadd.f32 %v4187_v31, %v4060_v15  ;;  %v4189_v40 = vpop.f32.mrb[42].mxu0  ;;  %v4227_v37 = vadd.f32 %v4219_v56, %v11413_v46  ;;  %v4194_v48 = vmul.f32 0.5, %v11411_v13 }
 0x9bd   :  { %v4234_v59 = vmul.f32 0.7978846, %v4226_v21  ;;  %v4228_v7 = vadd.f32 %v4220_v47, %v11416_v45  ;;  %v4206_v25 = vmul.f32 0.044715, %v11431_v29  ;;  %v4190_v0 = vadd.f32 %v4189_v40, %v4056_v24  ;;  %v4191_v9 = vpop.f32.mrb[43].mxu0 }
 0x9be   :  { %v4207_v10 = vmul.f32 0.044715, %v11434_v23  ;;  %v4192_v42 = vadd.f32 %v4191_v9, %v4060_v15  ;;  %v4229_v62 = vadd.f32 %v4221_v55, %v11419_v11  ;;  %v4235_v16 = vmul.f32 0.7978846, %v4227_v37 }
 0x9bf   :  { %9822 = vtanh.f32 %v4234_v59  ;;  %v4236_v63 = vmul.f32 0.7978846, %v4228_v7  ;;  %v4214_v32 = vmul.f32 %v4206_v25, %v11431_v29  ;;  %v4208_v52 = vmul.f32 0.044715, %v4190_v0 }
 0x9c0   :  { %v4215_v49 = vmul.f32 %v4207_v10, %v11434_v23  ;;  %v4209_v17 = vmul.f32 0.044715, %v4192_v42  ;;  %v4237_v27 = vmul.f32 0.7978846, %v4229_v62  ;;  %9824 = vtanh.f32 %v4235_v16 }
 0x9c1   :  { %9826 = vtanh.f32 %v4236_v63  ;;  %v4222_v34 = vmul.f32 %v4214_v32, %v11431_v29  ;;  %v4216_v3 = vmul.f32 %v4208_v52, %v4190_v0  ;;  %v4195_v47 = vmul.f32 0.5, %v11413_v46 }
 0x9c2   :  { %v4223_v5 = vmul.f32 %v4215_v49, %v11434_v23  ;;  %v4217_v53 = vmul.f32 %v4209_v17, %v4192_v42  ;;  %9828 = vtanh.f32 %v4237_v27  ;;  %v4197_v31 = vmul.f32 0.5, %v11419_v11 }
 0x9c3   :  { %v4224_v24 = vmul.f32 %v4216_v3, %v4190_v0  ;;  %v4230_v39 = vadd.f32 %v4222_v34, %v11431_v29  ;;  %v4198_v45 = vmul.f32 0.5, %v11431_v29  ;;  %v4200_v46 = vmul.f32 0.5, %v4190_v0  ;;  %v9664_v29 = vld [vmem:[%s12809_s4 + $0xc4] ss:$12 sps:$4 sm:$0xff]  }
 0x9c4   :  { %v4225_v15 = vmul.f32 %v4217_v53, %v4192_v42  ;;  %v4231_v60 = vadd.f32 %v4223_v5, %v11434_v23  ;;  %v4199_v11 = vmul.f32 0.5, %v11434_v23  ;;  %v4201_v49 = vmul.f32 0.5, %v4192_v42  ;;  %4702 = vmatprep.subr.bf16.mxu0 %v9664_v29 }
 0x9c5   :  { %v4232_v19 = vadd.f32 %v4224_v24, %v4190_v0  ;;  %v4238_v28 = vmul.f32 0.7978846, %v4230_v39  ;;  %v9662_v39 = vld [vmem:[%s12809_s4 + $0xc0] ss:$12 sps:$4 sm:$0xff]   ;;  %v12820_v23 = vsub.s32 7, %v10170_v18 }
 0x9c6   :  { %v4233_v14 = vadd.f32 %v4225_v15, %v4192_v42  ;;  %v4239_v1 = vmul.f32 0.7978846, %v4231_v60  ;;  %4703 = vmatpush1.bf16.msra.mxu0 %v9662_v39 }
 0x9c7   :  { %v4240_v51 = vmul.f32 0.7978846, %v4232_v19  ;;  %9830 = vtanh.f32 %v4238_v28  ;;  %v4305_v42 = vrot.slane %v11263_v6, %v12820_v23 }
 0x9c8   :  { %v4241_v33 = vmul.f32 0.7978846, %v4233_v14  ;;  %9832 = vtanh.f32 %v4239_v1 }
 0x9c9   :  { %v9823_v41 = vpop.eup %9822  ;;  %9834 = vtanh.f32 %v4240_v51 }
 0x9ca   :  { %v9825_v20 = vpop.eup %9824  ;;  %v4250_v8 = vadd.f32 1.0, %v9823_v41  ;;  %9836 = vtanh.f32 %v4241_v33 }
 0x9cb   :  { %v9827_v38 = vpop.eup %9826  ;;  %v4251_v12 = vadd.f32 1.0, %v9825_v20 }
 0x9cc   :  { %v9829_v56 = vpop.eup %9828  ;;  %v4252_v21 = vadd.f32 1.0, %v9827_v38  ;;  %v4258_v40 = vmul.f32 %v4250_v8, %v4194_v48 }
 0x9cd   :  { %v4253_v55 = vadd.f32 1.0, %v9829_v56  ;;  %v4259_v59 = vmul.f32 %v4251_v12, %v4195_v47 }
 0x9ce   :  { %v4260_v37 = vmul.f32 %v4252_v21, %v4196_v36 }
 0x9cf   :  { %v4261_v7 = vmul.f32 %v4253_v55, %v4197_v31 }
 0x9d0   :  { %v4266_v25 = vpack.c.bf16 %v4260_v37, %v4258_v40  ;;  %v9668_v40 = vld [vmem:[%s12809_s4 + $0xf0] ss:$12 sps:$4 sm:$0xff]   ;;  %v9670_v37 = vld [vmem:[%s12809_s4 + $0xf4] ss:$12 sps:$4 sm:$0xff]  }
 0x9d1   :  { %v9831_v9 = vpop.eup %9830  ;;  %v4267_v10 = vpack.c.bf16 %v4261_v7, %v4259_v59  ;;  %v9671_v59 = vld [vmem:[%s12809_s4 + $0xc8] ss:$12 sps:$4 sm:$0xff]   ;;  %v9674_v7 = vld [vmem:[%s12809_s4 + $0x10c] ss:$12 sps:$4 sm:$0xff]  }
 0x9d2   :  { %v9833_v62 = vpop.eup %9832  ;;  %v4254_v16 = vadd.f32 1.0, %v9831_v9  ;;  %9363 = vmatprep.subr.bf16.mxu1 %v9671_v59  ;;  %v9672_v9 = vld [vmem:[%s12809_s4 + $0x108] ss:$12 sps:$4 sm:$0xff]  }
 0x9d3   :  { %v9835_v63 = vpop.eup %9834  ;;  %4434 = vmatprep.mubr.bf16.mxu1 %v4267_v10  ;;  %v4255_v13 = vadd.f32 1.0, %v9833_v62  ;;  %v9678_v10 = vld [vmem:[%s12809_s4 + $0x124] ss:$12 sps:$4 sm:$0xff]  }
 0x9d4   :  { %v9837_v32 = vpop.eup %9836  ;;  %4435 = vmatmul.mubr.bf16.vlgmr.msra.gmra.mrb[52].mxu1 %v4266_v25  ;;  %v4256_v52 = vadd.f32 1.0, %v9835_v63  ;;  %v4262_v27 = vmul.f32 %v4254_v16, %v4198_v45  ;;  %v9675_v25 = vld [vmem:[%s12809_s4 + $0xe0] ss:$12 sps:$4 sm:$0xff]   ;;  %v9679_v62 = vld [vmem:[%s12809_s4 + $0xf8] ss:$12 sps:$4 sm:$0xff]  }
 0x9d5   :  { %v4257_v17 = vadd.f32 1.0, %v9837_v32  ;;  %v4263_v3 = vmul.f32 %v4255_v13, %v4199_v11  ;;  %9364 = vmatpush3.bf16.msra.mxu1 %v9671_v59  ;;  %v9676_v16 = vld [vmem:[%s12809_s4 + $0x120] ss:$12 sps:$4 sm:$0xff]   ;;  %v9682_v63 = vld [vmem:[%s12809_s4 + $0x13c] ss:$12 sps:$4 sm:$0xff]  }
 0x9d6   :  { %v4264_v34 = vmul.f32 %v4256_v52, %v4200_v46  ;;  %9365 = vmatprep.subr.bf16.mxu1 %v9675_v25  ;;  %v9683_v13 = vld [vmem:[%s12809_s4 + $0x110] ss:$12 sps:$4 sm:$0xff]   ;;  %v9680_v32 = vld [vmem:[%s12809_s4 + $0x138] ss:$12 sps:$4 sm:$0xff]   ;;  %v9686_v45 = vld [vmem:[%s12809_s4 + $0x154] ss:$12 sps:$4 sm:$0xff]  }
 0x9d7   :  { %v4265_v5 = vmul.f32 %v4257_v17, %v4201_v49  ;;  %v9687_v46 = vld [vmem:[%s12809_s4 + $0x128] ss:$12 sps:$4 sm:$0xff]   ;;  %v9684_v52 = vld [vmem:[%s12809_s4 + $0x150] ss:$12 sps:$4 sm:$0xff]   ;;  %v9690_v11 = vld [vmem:[%s12809_s4 + $0x16c] ss:$12 sps:$4 sm:$0xff]  }
 0x9d8   :  { %v4268_v53 = vpack.c.bf16 %v4264_v34, %v4262_v27  ;;  %v9691_v49 = vld [vmem:[%s12809_s4 + $0x140] ss:$12 sps:$4 sm:$0xff]   ;;  %v9688_v17 = vld [vmem:[%s12809_s4 + $0x168] ss:$12 sps:$4 sm:$0xff]   ;;  %v9692_v27 = vld [vmem:[%s12809_s4 + $0x158] ss:$12 sps:$4 sm:$0xff]  }
 0x9d9   :  { %v4269_v24 = vpack.c.bf16 %v4265_v5, %v4263_v3  ;;  %9366 = vmatpush3.bf16.msra.mxu1 %v9675_v25  ;;  %v9693_v34 = vld [vmem:[%s12809_s4 + $0x170] ss:$12 sps:$4 sm:$0xff]   ;;  %v12840_v25 = vsub.s32 1, %v10170_v18 }
 0x9da   :  { %9367 = vmatprep.subr.bf16.mxu1 %v9679_v62 }
 0x9db   :  { %4442 = vmatprep.mubr.bf16.mxu1 %v4269_v24 }
 0x9dc   :  { %4443 = vmatmul.mubr.bf16.gmra.mrb[56].mxu1 %v4268_v53 }
 0x9dd   :  { %9368 = vmatpush3.bf16.msra.mxu1 %v9679_v62 }
 0x9de   :  { %9369 = vmatprep.subr.bf16.mxu1 %v9683_v13 }
 0x9e1   :  { %9370 = vmatpush3.bf16.msra.mxu1 %v9683_v13 }
 0x9e2   :  { %9371 = vmatprep.subr.bf16.mxu1 %v9687_v46 }
 0x9e5   :  { %9372 = vmatpush3.bf16.msra.mxu1 %v9687_v46 }
 0x9e6   :  { %9373 = vmatprep.subr.bf16.mxu1 %v9691_v49 }
 0x9e9   :  { %9374 = vmatpush3.bf16.msra.mxu1 %v9691_v49 }
 0x9ea   :  { %9375 = vmatprep.subr.bf16.mxu1 %v9692_v27 }
 0x9ed   :  { %9376 = vmatpush3.bf16.msra.mxu1 %v9692_v27 }
 0x9ee   :  { %9377 = vmatprep.subr.bf16.mxu1 %v9693_v34 }
 0x9f1   :  { %9378 = vmatpush3.bf16.msra.mxu1 %v9693_v34 }
 0x9f2   :  { %9401 = vmatprep.subr.bf16.mxu1 %v12824_v61 }
 0xaa7   :  { %v9135_v0 = vpop.f32.mrb[52].mxu1 }
 0xaa8   :  { %v9136_v15 = vpop.f32.mrb[53].mxu1 }
 0xaa9   :  { %v9137_v60 = vadd.f32 %v9136_v15, %v9135_v0  ;;  %v9138_v19 = vpop.f32.mrb[54].mxu1 }
 0xaaa   :  { %v9139_v28 = vpop.f32.mrb[55].mxu1 }
 0xaab   :  { %v4437_v14 = vadd.f32 %v9137_v60, %v4305_v42  ;;  %v9140_v1 = vadd.f32 %v9139_v28, %v9138_v19 }
 0xaad   :  { %v11464_v51 = vadd.f32 %v4437_v14, %v11269_v22  ;;  %v4440_v33 = vadd.f32 %v9140_v1, %v4305_v42 }
 0xaaf   :  { %v11467_v41 = vadd.f32 %v4440_v33, %v11272_v43  ;;  %v9141_v20 = vpop.f32.mrb[56].mxu1  ;;  %4459 = vadd.xlane.f32.xlu0 %v11464_v51  ;;  %v4471_v6 = vmul.f32 %v11464_v51, %v11464_v51 }
 0xab0   :  { %v9142_v8 = vpop.f32.mrb[57].mxu1 }
 0xab1   :  { %v9143_v38 = vadd.f32 %v9142_v8, %v9141_v20  ;;  %v9144_v12 = vpop.f32.mrb[58].mxu1  ;;  %4461 = vadd.xlane.f32.xlu1 %v11467_v41  ;;  %v4472_v22 = vmul.f32 %v11467_v41, %v11467_v41 }
 0xab2   :  { %v9145_v56 = vpop.f32.mrb[59].mxu1 }
 0xab3   :  { %v4445_v48 = vadd.f32 %v9143_v38, %v4305_v42  ;;  %v9146_v36 = vadd.f32 %v9145_v56, %v9144_v12  ;;  %4475 = vadd.xlane.f32.xlu0 %v4471_v6 }
 0xab5   :  { %v11476_v43 = vadd.f32 %v4445_v48, %v11287_v4  ;;  %v4448_v21 = vadd.f32 %v9146_v36, %v4305_v42  ;;  %4477 = vadd.xlane.f32.xlu1 %v4472_v22  ;;  %v9665_v4 = vld [vmem:[%s12809_s4 + $0xd8] ss:$12 sps:$4 sm:$0xff]  }
 0xab7   :  { %v11479_v47 = vadd.f32 %v4448_v21, %v11279_v58  ;;  %4463 = vadd.xlane.f32.xlu0 %v11476_v43  ;;  %v4473_v31 = vmul.f32 %v11476_v43, %v11476_v43  ;;  %v9667_v58 = vld [vmem:[%s12809_s4 + $0xdc] ss:$12 sps:$4 sm:$0xff]  }
 0xab8   :  { %4704 = vmatprep.subr.bf16.mxu0 %v9667_v58 }
 0xab9   :  { %4465 = vadd.xlane.f32.xlu1 %v11479_v47  ;;  %v4474_v55 = vmul.f32 %v11479_v47, %v11479_v47  ;;  %4705 = vmatpush1.bf16.msra.mxu0 %v9665_v4 }
 0xaba   :  { %4706 = vmatprep.subr.bf16.mxu0 %v9670_v37 }
 0xabb   :  { %4479 = vadd.xlane.f32.xlu0 %v4473_v31  ;;  %v8856_v31 = vld [vmem:[%s12808_s3 + $0x18] sm:$0xff] }
 0xabd   :  { %4481 = vadd.xlane.f32.xlu1 %v4474_v55  ;;  %4707 = vmatpush1.bf16.msra.mxu0 %v9668_v40  ;;  %v12839_v40 = vsub.s32 0, %v10170_v18 }
 0xabe   :  { %4708 = vmatprep.subr.bf16.mxu0 %v9674_v7 }
 0xabf   :  { %v4514_v37 = vrot.slane %v8856_v31, %v12839_v40 }
 0xac1   :  { %4709 = vmatpush1.bf16.msra.mxu0 %v9672_v9  ;;  %v4522_v9 = vrot.slane %v8856_v31, %v12840_v25 }
 0xac2   :  { %4710 = vmatprep.subr.bf16.mxu0 %v9678_v10 }
 0xac5   :  { %4711 = vmatpush1.bf16.msra.mxu0 %v9676_v16 }
 0xac6   :  { %4712 = vmatprep.subr.bf16.mxu0 %v9682_v63 }
 0xac9   :  { %4713 = vmatpush1.bf16.msra.mxu0 %v9680_v32 }
 0xaca   :  { %4714 = vmatprep.subr.bf16.mxu0 %v9686_v45 }
 0xacd   :  { %4715 = vmatpush1.bf16.msra.mxu0 %v9684_v52 }
 0xace   :  { %4716 = vmatprep.subr.bf16.mxu0 %v9690_v11 }
 0xad1   :  { %4717 = vmatpush1.bf16.msra.mxu0 %v9688_v17 }
 0xad2   :  { %9383 = vmatprep.subr.bf16.mxu0 %v12824_v61 }
 0xb3c   :  { %v4460_v3 = vpop.xlane.xlu0 %4459 }
 0xb3d   :  { %v4467_v5 = vmul.f32 0.0078125, %v4460_v3 }
 0xb3e   :  { %v4462_v53 = vpop.xlane.xlu1 %4461 }
 0xb3f   :  { %v4468_v24 = vmul.f32 0.0078125, %v4462_v53  ;;  %v4487_v29 = vmul.f32 %v4467_v5, %v4467_v5  ;;  %v4495_v59 = vsub.f32 %v11464_v51, %v4467_v5 }
 0xb40   :  { %v4476_v39 = vpop.xlane.xlu0 %4475 }
 0xb41   :  { %v4483_v0 = vmul.f32 0.0078125, %v4476_v39  ;;  %v4488_v15 = vmul.f32 %v4468_v24, %v4468_v24  ;;  %v4496_v10 = vsub.f32 %v11467_v41, %v4468_v24 }
 0xb42   :  { %v4478_v42 = vpop.xlane.xlu1 %4477 }
 0xb43   :  { %v4491_v60 = vsub.f32 %v4483_v0, %v4487_v29  ;;  %v4484_v19 = vmul.f32 0.0078125, %v4478_v42  ;;  %v8857_v0 = vld [vmem:[%s12808_s3 + $0x20] sm:$0xff]  ;;  %v4565_v42 = vrot.slane %v8856_v31, %v10208_v2 }
 0xb44   :  { %v4464_v28 = vpop.xlane.xlu0 %4463 }
 0xb45   :  { %v4499_v14 = vadd.f32 1e-06, %v4491_v60  ;;  %v4492_v1 = vsub.f32 %v4484_v19, %v4488_v15  ;;  %v4469_v33 = vmul.f32 0.0078125, %v4464_v28  ;;  %v4569_v15 = vrot.slane %v8857_v0, %v10208_v2 }
 0xb46   :  { %v4466_v20 = vpop.xlane.xlu1 %4465 }
 0xb47   :  { %9838 = vrsqrt.f32 %v4499_v14  ;;  %v4500_v8 = vadd.f32 1e-06, %v4492_v1  ;;  %v4470_v38 = vmul.f32 0.0078125, %v4466_v20  ;;  %v4489_v6 = vmul.f32 %v4469_v33, %v4469_v33 }
 0xb48   :  { %v4480_v12 = vpop.xlane.xlu0 %4479  ;;  %v4497_v46 = vsub.f32 %v11476_v43, %v4469_v33  ;;  %v8858_v33 = vld [vmem:[%s12808_s3 + $0x28] sm:$0xff] }
 0xb49   :  { %9840 = vrsqrt.f32 %v4500_v8  ;;  %v4485_v56 = vmul.f32 0.0078125, %v4480_v12  ;;  %v4490_v36 = vmul.f32 %v4470_v38, %v4470_v38  ;;  %v4498_v49 = vsub.f32 %v11479_v47, %v4470_v38 }
 0xb4a   :  { %v4482_v48 = vpop.xlane.xlu1 %4481  ;;  %v4573_v8 = vrot.slane %v8858_v33, %v10208_v2 }
 0xb4b   :  { %v4493_v22 = vsub.f32 %v4485_v56, %v4489_v6  ;;  %v4486_v21 = vmul.f32 0.0078125, %v4482_v48 }
 0xb4d   :  { %v4501_v55 = vadd.f32 1e-06, %v4493_v22  ;;  %v4494_v4 = vsub.f32 %v4486_v21, %v4490_v36 }
 0xb4f   :  { %9842 = vrsqrt.f32 %v4501_v55  ;;  %v4502_v58 = vadd.f32 1e-06, %v4494_v4 }
 0xb51   :  { %v9839_v7 = vpop.eup %9838  ;;  %9844 = vrsqrt.f32 %v4502_v58 }
 0xb52   :  { %v4507_v62 = vmul.f32 %v9839_v7, %v4495_v59 }
 0xb53   :  { %v9841_v16 = vpop.eup %9840 }
 0xb54   :  { %v4508_v63 = vmul.f32 %v9841_v16, %v4496_v10  ;;  %v4515_v13 = vmul.f32 %v4514_v37, %v4507_v62 }
 0xb56   :  { %v4516_v32 = vmul.f32 %v4514_v37, %v4508_v63  ;;  %v4523_v45 = vadd.f32 %v4522_v9, %v4515_v13 }
 0xb58   :  { %v4524_v52 = vadd.f32 %v4522_v9, %v4516_v32 }
 0xb59   :  { %v9843_v11 = vpop.eup %9842 }
 0xb5a   :  { %v4527_v17 = vpack.c.bf16 %v4524_v52, %v4523_v45  ;;  %v4509_v27 = vmul.f32 %v9843_v11, %v4497_v46 }
 0xb5b   :  { %v9845_v34 = vpop.eup %9844 }
 0xb5c   :  { %4735 = vmatmul.mubr.bf16.vlgmr.msra.gmra.mrb[44].mxu0 %v4527_v17  ;;  %9379 = vmatprep.mubr.bf16.mxu1 %v4527_v17  ;;  %v4510_v3 = vmul.f32 %v9845_v34, %v4498_v49  ;;  %v4517_v5 = vmul.f32 %v4514_v37, %v4509_v27 }
 0xb5d   :  { %4744 = vmatprep.mubr.bf16.mxu0 %v12838_v54 }
 0xb5e   :  { %v4518_v53 = vmul.f32 %v4514_v37, %v4510_v3  ;;  %v4525_v24 = vadd.f32 %v4522_v9, %v4517_v5 }
 0xb60   :  { %v4526_v39 = vadd.f32 %v4522_v9, %v4518_v53 }
 0xb62   :  { %v4528_v29 = vpack.c.bf16 %v4526_v39, %v4525_v24 }
 0xb64   :  { %4745 = vmatmul.mubr.bf16.gmra.mrb[48].mxu0 %v4528_v29  ;;  %9380 = vmatmul.mubr.bf16.vlgmr.msra.gmra.mrb[60].mxu1 %v4528_v29 }
 0xb65   :  { %9385 = vmatprep.mubr.msk.bf16.mxu0 %vm9967_vm1, %v12824_v61  ;;  %9403 = vmatprep.mubr.msk.bf16.mxu1 %vm9967_vm1, %v12824_v61 }
 0xc2f   :  { %v4736_v60 = vpop.f32.mrb[44].mxu0 }
 0xc30   :  { %v11576_v19 = vadd.f32 %v4736_v60, %v4565_v42  ;;  %v4738_v28 = vpop.f32.mrb[45].mxu0 }
 0xc31   :  { %v11578_v14 = vadd.f32 %v4738_v28, %v4569_v15  ;;  %v4740_v1 = vpop.f32.mrb[46].mxu0 }
 0xc32   :  { %v4742_v20 = vpop.f32.mrb[47].mxu0  ;;  %4808 = vrot.lane.b32.xlu0 %v11576_v19, %s9963_s0  ;;  %v11588_v38 = vadd.f32 %v4740_v1, %v4565_v42 }
 0xc33   :  { %5412 = vrot.lane.b32.xlu1 %v11578_v14, %s9964_s28  ;;  %v11596_v22 = vadd.f32 %v4742_v20, %v4569_v15 }
 0xc36   :  { %5400 = vrot.lane.b32.xlu0 %v11578_v14, %s9963_s0 }
 0xc37   :  { %4810 = vrot.lane.b32.xlu1 %v11588_v38, %s9963_s0  ;;  %v4746_v12 = vpop.f32.mrb[48].mxu0  ;;  %v9381_v6 = vpop.f32.mrb[60].mxu1 }
 0xc38   :  { %v11594_v56 = vadd.f32 %v9381_v6, %v4573_v8  ;;  %v4748_v48 = vpop.f32.mrb[49].mxu0  ;;  %v4789_v36 = vpop.f32.mrb[61].mxu1  ;;  %v11612_v58 = vadd.f32 %v4746_v12, %v4565_v42 }
 0xc39   :  { %v4750_v21 = vpop.f32.mrb[50].mxu0  ;;  %v9382_v31 = vpop.f32.mrb[62].mxu1  ;;  %v11618_v40 = vadd.f32 %v4748_v48, %v4569_v15  ;;  %v11644_v7 = vadd.f32 %v4789_v36, %v4573_v8 }
 0xc3a   :  { %v11598_v55 = vadd.f32 %v9382_v31, %v4573_v8  ;;  %5424 = vrot.lane.b32.xlu0 %v11578_v14, %s9965_s2  ;;  %v4752_v2 = vpop.f32.mrb[51].mxu0  ;;  %v4792_v4 = vpop.f32.mrb[63].mxu1  ;;  %v11624_v37 = vadd.f32 %v4750_v21, %v4565_v42 }
 0xc3b   :  { %5402 = vrot.lane.b32.xlu1 %v11596_v22, %s9963_s0  ;;  %v11630_v59 = vadd.f32 %v4752_v2, %v4569_v15  ;;  %v11656_v25 = vadd.f32 %v4792_v4, %v4573_v8 }
 0xc3e   :  { %4820 = vrot.lane.b32.xlu0 %v11576_v19, %s9964_s28 }
 0xc3f   :  { %5414 = vrot.lane.b32.xlu1 %v11596_v22, %s9964_s28 }
 0xc42   :  { %4832 = vrot.lane.b32.xlu0 %v11576_v19, %s9965_s2 }
 0xc43   :  { %5426 = vrot.lane.b32.xlu1 %v11596_v22, %s9965_s2 }
 0xc46   :  { %4812 = vrot.lane.b32.xlu0 %v11612_v58, %s9963_s0 }
 0xc47   :  { %4822 = vrot.lane.b32.xlu1 %v11588_v38, %s9964_s28 }
 0xc4a   :  { %5404 = vrot.lane.b32.xlu0 %v11618_v40, %s9963_s0 }
 0xc4b   :  { %4834 = vrot.lane.b32.xlu1 %v11588_v38, %s9965_s2 }
 0xc4e   :  { %5416 = vrot.lane.b32.xlu0 %v11618_v40, %s9964_s28 }
 0xc4f   :  { %4814 = vrot.lane.b32.xlu1 %v11624_v37, %s9963_s0 }
 0xc52   :  { %5428 = vrot.lane.b32.xlu0 %v11618_v40, %s9965_s2 }
 0xc53   :  { %5406 = vrot.lane.b32.xlu1 %v11630_v59, %s9963_s0 }
 0xc56   :  { %4824 = vrot.lane.b32.xlu0 %v11612_v58, %s9964_s28 }
 0xc57   :  { %5418 = vrot.lane.b32.xlu1 %v11630_v59, %s9964_s28 }
 0xc5a   :  { %4836 = vrot.lane.b32.xlu0 %v11612_v58, %s9965_s2 }
 0xc5b   :  { %5430 = vrot.lane.b32.xlu1 %v11630_v59, %s9965_s2 }
 0xc5e   :  { %5992 = vrot.lane.b32.xlu0 %v11644_v7, %s9963_s0 }
 0xc5f   :  { %4826 = vrot.lane.b32.xlu1 %v11624_v37, %s9964_s28 }
 0xc62   :  { %6016 = vrot.lane.b32.xlu0 %v11644_v7, %s9965_s2 }
 0xc63   :  { %4838 = vrot.lane.b32.xlu1 %v11624_v37, %s9965_s2 }
 0xc67   :  { %6004 = vrot.lane.b32.xlu1 %v11644_v7, %s9964_s28 }
 0xc6b   :  { %5994 = vrot.lane.b32.xlu1 %v11656_v25, %s9963_s0 }
 0xc6f   :  { %6006 = vrot.lane.b32.xlu1 %v11656_v25, %s9964_s28 }
 0xc73   :  { %6018 = vrot.lane.b32.xlu1 %v11656_v25, %s9965_s2 }
 0xca4   :  { %v4809_v9 = vpop.permute.xlu0 %4808 }
 0xca5   :  { %v5413_v10 = vpop.permute.xlu1 %5412 }
 0xca6   :  { %v5436_v63 = vcombine.low %v11578_v14, %v5413_v10  ;;  %v5437_v13 = vcombine.high %v11578_v14, %v5413_v10 }
 0xca8   :  { %v5401_v62 = vpop.permute.xlu0 %5400  ;;  %v5444_v11 = vrot.slane %v5436_v63, %v10312_v50  ;;  %v5451_v49 = vrot.slane %v5437_v13, %v10312_v50 }
 0xca9   :  { %v11664_v16 = vpop.permute.xlu1 %4810 }
 0xcac   :  { %v5425_v32 = vpop.permute.xlu0 %5424 }
 0xcad   :  { %v5452_v45 = vcombine.low %v5401_v62, %v5425_v32  ;;  %v5453_v46 = vcombine.high %v5401_v62, %v5425_v32  ;;  %v5403_v52 = vpop.permute.xlu1 %5402 }
 0xcaf   :  { %v5460_v17 = vrot.slane %v5452_v45, %v10312_v50  ;;  %v5467_v27 = vrot.slane %v5453_v46, %v10312_v50 }
 0xcb0   :  { %v4821_v34 = vpop.permute.xlu0 %4820 }
 0xcb1   :  { %v5468_v3 = vcombine.low %v5444_v11, %v5460_v17  ;;  %v5469_v5 = vcombine.high %v5444_v11, %v5460_v17  ;;  %v5484_v53 = vcombine.low %v5451_v49, %v5467_v27  ;;  %v5485_v24 = vcombine.high %v5451_v49, %v5467_v27  ;;  %v5415_v39 = vpop.permute.xlu1 %5414 }
 0xcb2   :  { %v4844_v29 = vcombine.low %v11576_v19, %v4821_v34  ;;  %v4845_v0 = vcombine.high %v11576_v19, %v4821_v34  ;;  %v5504_v42 = vcombine.low %v11596_v22, %v5415_v39  ;;  %v5505_v15 = vcombine.high %v11596_v22, %v5415_v39 }
 0xcb3   :  { %v5476_v60 = vrot.slane %v5468_v3, %v10317_v57  ;;  %v5483_v28 = vrot.slane %v5469_v5, %v10317_v57  ;;  %v5492_v14 = vrot.slane %v5484_v53, %v10317_v57  ;;  %v5499_v1 = vrot.slane %v5485_v24, %v10317_v57 }
 0xcb4   :  { %v4833_v33 = vpop.permute.xlu0 %4832  ;;  %v4852_v22 = vrot.slane %v4844_v29, %v10312_v50  ;;  %v4859_v2 = vrot.slane %v4845_v0, %v10312_v50  ;;  %v5512_v4 = vrot.slane %v5504_v42, %v10312_v50  ;;  %v5519_v10 = vrot.slane %v5505_v15, %v10312_v50 }
 0xcb5   :  { %v5708_v20 = vcombine.low %v5476_v60, %v5483_v28  ;;  %v8923_v8 = vcombine.high %v5476_v60, %v5483_v28  ;;  %v5724_v12 = vcombine.low %v5492_v14, %v5499_v1  ;;  %v8924_v6 = vcombine.high %v5492_v14, %v5499_v1  ;;  %v5427_v48 = vpop.permute.xlu1 %5426 }
 0xcb6   :  { %v4860_v36 = vcombine.low %v4809_v9, %v4833_v33  ;;  %v4861_v19 = vcombine.high %v4809_v9, %v4833_v33  ;;  %v5520_v21 = vcombine.low %v5403_v52, %v5427_v48  ;;  %v5521_v31 = vcombine.high %v5403_v52, %v5427_v48 }
 0xcb7   :  { %v11691_v9 = vrot.slane %v5708_v20, %v10312_v50  ;;  %v11694_v46 = vrot.slane %v8923_v8, %v10312_v50  ;;  %v11697_v52 = vrot.slane %v5724_v12, %v10312_v50  ;;  %v11700_v11 = vrot.slane %v8924_v6, %v10312_v50 }
 0xcb8   :  { %v4868_v62 = vrot.slane %v4860_v36, %v10312_v50  ;;  %v4875_v63 = vrot.slane %v4861_v19, %v10312_v50  ;;  %v5528_v13 = vrot.slane %v5520_v21, %v10312_v50  ;;  %v5535_v32 = vrot.slane %v5521_v31, %v10312_v50  ;;  %v11688_v45 = vpop.permute.xlu0 %4812 }
 0xcb9   :  { %v4823_v49 = vpop.permute.xlu1 %4822 }
 0xcba   :  { %v4876_v17 = vcombine.low %v4852_v22, %v4868_v62  ;;  %v4877_v27 = vcombine.high %v4852_v22, %v4868_v62  ;;  %v4892_v34 = vcombine.low %v4859_v2, %v4875_v63  ;;  %v4893_v3 = vcombine.high %v4859_v2, %v4875_v63 }
 0xcbb   :  { %v5536_v5 = vcombine.low %v5512_v4, %v5528_v13  ;;  %v5537_v53 = vcombine.high %v5512_v4, %v5528_v13  ;;  %v5552_v24 = vcombine.low %v5519_v10, %v5535_v32  ;;  %v5553_v39 = vcombine.high %v5519_v10, %v5535_v32 }
 0xcbc   :  { %v4884_v29 = vrot.slane %v4876_v17, %v10317_v57  ;;  %v4891_v0 = vrot.slane %v4877_v27, %v10317_v57  ;;  %v4900_v42 = vrot.slane %v4892_v34, %v10317_v57  ;;  %v4907_v15 = vrot.slane %v4893_v3, %v10317_v57  ;;  %v5405_v60 = vpop.permute.xlu0 %5404 }
 0xcbd   :  { %v5544_v28 = vrot.slane %v5536_v5, %v10317_v57  ;;  %v5551_v14 = vrot.slane %v5537_v53, %v10317_v57  ;;  %v5560_v1 = vrot.slane %v5552_v24, %v10317_v57  ;;  %v5567_v33 = vrot.slane %v5553_v39, %v10317_v57  ;;  %v4835_v20 = vpop.permute.xlu1 %4834 }
 0xcbe   :  { %v5116_v8 = vcombine.low %v4884_v29, %v4891_v0  ;;  %v8915_v12 = vcombine.high %v4884_v29, %v4891_v0  ;;  %v5132_v6 = vcombine.low %v4900_v42, %v4907_v15  ;;  %v8916_v48 = vcombine.high %v4900_v42, %v4907_v15 }
 0xcbf   :  { %v5776_v36 = vcombine.low %v5544_v28, %v5551_v14  ;;  %v8925_v19 = vcombine.high %v5544_v28, %v5551_v14  ;;  %v5792_v21 = vcombine.low %v5560_v1, %v5567_v33  ;;  %v8926_v31 = vcombine.high %v5560_v1, %v5567_v33 }
 0xcc0   :  { %v11711_v22 = vrot.slane %v5116_v8, %v10312_v50  ;;  %v11714_v2 = vrot.slane %v8915_v12, %v10312_v50  ;;  %v11717_v4 = vrot.slane %v5132_v6, %v10312_v50  ;;  %v11720_v10 = vrot.slane %v8916_v48, %v10312_v50  ;;  %v5417_v62 = vpop.permute.xlu0 %5416 }
 0xcc1   :  { %v11722_v63 = vpop.permute.xlu1 %4814  ;;  %v5740_v13 = vcombine.low %v11691_v9, %v11694_v46  ;;  %v5756_v32 = vcombine.low %v11697_v52, %v11700_v11  ;;  %v5741_v17 = vcombine.high %v11691_v9, %v11694_v46  ;;  %v5757_v27 = vcombine.high %v11697_v52, %v11700_v11 }
 0xcc2   :  { %v5148_v34 = vcombine.low %v11711_v22, %v11714_v2  ;;  %v11735_v3 = vrot.slane %v5776_v36, %v10312_v50  ;;  %v11738_v5 = vrot.slane %v8925_v19, %v10312_v50  ;;  %v11741_v53 = vrot.slane %v5792_v21, %v10312_v50 }
 0xcc3   :  { %v4912_v24 = vcombine.low %v11588_v38, %v4823_v49  ;;  %v4913_v39 = vcombine.high %v11588_v38, %v4823_v49  ;;  %v4928_v29 = vcombine.low %v11664_v16, %v4835_v20  ;;  %v4929_v0 = vcombine.high %v11664_v16, %v4835_v20 }
 0xcc4   :  { %v5149_v42 = vcombine.high %v11711_v22, %v11714_v2  ;;  %v5164_v15 = vcombine.low %v11717_v4, %v11720_v10  ;;  %v5165_v28 = vcombine.high %v11717_v4, %v11720_v10  ;;  %v11754_v14 = vrot.slane %v8926_v31, %v10312_v50  ;;  %v5429_v1 = vpop.permute.xlu0 %5428 }
 0xcc5   :  { %v4920_v33 = vrot.slane %v4912_v24, %v10312_v50  ;;  %v4927_v38 = vrot.slane %v4913_v39, %v10312_v50  ;;  %v4936_v49 = vrot.slane %v4928_v29, %v10312_v50  ;;  %v4943_v16 = vrot.slane %v4929_v0, %v10312_v50  ;;  %v11760_v20 = vpop.permute.xlu1 %5406 }
 0xcc6   :  { %v11763_v8 = vrot.slane %v5148_v34, %v10317_v57  ;;  %v5572_v12 = vcombine.low %v11618_v40, %v5417_v62  ;;  %v5573_v6 = vcombine.high %v11618_v40, %v5417_v62  ;;  %v5588_v48 = vcombine.low %v5405_v60, %v5429_v1 }
 0xcc7   :  { %v4944_v36 = vcombine.low %v4920_v33, %v4936_v49  ;;  %v4945_v19 = vcombine.high %v4920_v33, %v4936_v49  ;;  %v4960_v21 = vcombine.low %v4927_v38, %v4943_v16  ;;  %v4961_v31 = vcombine.high %v4927_v38, %v4943_v16 }
 0xcc8   :  { %v11768_v22 = vrot.slane %v5164_v15, %v10317_v57  ;;  %v5580_v2 = vrot.slane %v5572_v12, %v10312_v50  ;;  %v5589_v4 = vcombine.high %v5405_v60, %v5429_v1  ;;  %v5596_v10 = vrot.slane %v5588_v48, %v10312_v50 }
 0xcc9   :  { %v4952_v34 = vrot.slane %v4944_v36, %v10317_v57  ;;  %v4959_v24 = vrot.slane %v4945_v19, %v10317_v57  ;;  %v4968_v39 = vrot.slane %v4960_v21, %v10317_v57  ;;  %v4975_v40 = vrot.slane %v4961_v31, %v10317_v57  ;;  %v5419_v1 = vpop.permute.xlu1 %5418  ;;  %v4825_v19 = vpop.permute.xlu0 %4824 }
 0xcca   :  { %v5587_v62 = vrot.slane %v5573_v6, %v10312_v50  ;;  %v5603_v29 = vrot.slane %v5589_v4, %v10312_v50  ;;  %v5604_v0 = vcombine.low %v5580_v2, %v5596_v10  ;;  %v5605_v15 = vcombine.high %v5580_v2, %v5596_v10 }
 0xccb   :  { %v5184_v33 = vcombine.low %v4952_v34, %v4959_v24  ;;  %v8917_v38 = vcombine.high %v4952_v34, %v4959_v24  ;;  %v5200_v49 = vcombine.low %v4968_v39, %v4975_v40  ;;  %v8918_v60 = vcombine.high %v4968_v39, %v4975_v40 }
 0xccc   :  { %v5612_v16 = vrot.slane %v5604_v0, %v10317_v57  ;;  %v5619_v12 = vrot.slane %v5605_v15, %v10317_v57  ;;  %v5620_v48 = vcombine.low %v5587_v62, %v5603_v29  ;;  %v5621_v36 = vcombine.high %v5587_v62, %v5603_v29 }
 0xccd   :  { %v5191_v21 = vrot.slane %v5184_v33, %v10312_v50  ;;  %v5199_v6 = vrot.slane %v8917_v38, %v10312_v50  ;;  %v11783_v31 = vrot.slane %v5200_v49, %v10312_v50  ;;  %v11786_v2 = vrot.slane %v8918_v60, %v10312_v50 }
 0xcce   :  { %v11789_v4 = vrot.slane %v5620_v48, %v10317_v57  ;;  %v11792_v10 = vrot.slane %v5621_v36, %v10317_v57  ;;  %v5844_v34 = vcombine.low %v5612_v16, %v5619_v12  ;;  %v8927_v24 = vcombine.high %v5612_v16, %v5619_v12 }
 0xccf   :  { %v5216_v39 = vcombine.low %v5191_v21, %v5199_v6  ;;  %v5217_v40 = vcombine.high %v5191_v21, %v5199_v6  ;;  %v5232_v62 = vcombine.low %v11783_v31, %v11786_v2  ;;  %v4980_v29 = vcombine.low %v11612_v58, %v4825_v19 }
 0xcd0   :  { %v11798_v0 = vrot.slane %v5149_v42, %v10317_v57  ;;  %v11801_v15 = vrot.slane %v5165_v28, %v10317_v57  ;;  %v11814_v16 = vrot.slane %v5844_v34, %v10312_v50  ;;  %v11817_v42 = vrot.slane %v8927_v24, %v10312_v50  ;;  %v5431_v28 = vpop.permute.xlu1 %5430 }
 0xcd1   :  { %v11808_v49 = vrot.slane %v5216_v39, %v10317_v57  ;;  %v11811_v60 = vrot.slane %v5232_v62, %v10317_v57  ;;  %v11820_v12 = vrot.slane %v5217_v40, %v10317_v57  ;;  %v4981_v21 = vcombine.high %v11612_v58, %v4825_v19 }
 0xcd2   :  { %v4988_v6 = vrot.slane %v4980_v29, %v10312_v50  ;;  %v5640_v34 = vcombine.low %v11630_v59, %v5419_v1  ;;  %v5641_v39 = vcombine.high %v11630_v59, %v5419_v1  ;;  %v11834_v24 = vrot.slane %v5740_v13, %v10317_v57  ;;  %v4837_v1 = vpop.permute.xlu0 %4836 }
 0xcd3   :  { %v11842_v58 = vrot.slane %v5756_v32, %v10317_v57  ;;  %v5808_v19 = vcombine.low %v11735_v3, %v11738_v5  ;;  %v5824_v59 = vcombine.low %v11741_v53, %v11754_v14  ;;  %v4995_v62 = vrot.slane %v4981_v21, %v10312_v50 }
 0xcd4   :  { %v5648_v13 = vrot.slane %v5640_v34, %v10312_v50  ;;  %v11854_v29 = vrot.slane %v5741_v17, %v10317_v57  ;;  %v11860_v32 = vrot.slane %v5757_v27, %v10317_v57  ;;  %v5655_v23 = vrot.slane %v5641_v39, %v10312_v50  ;;  %v11877_v17 = vpop.permute.xlu1 %4826 }
 0xcd5   :  { %v11864_v30 = vrot.slane %v5808_v19, %v10317_v57  ;;  %v11867_v21 = vrot.slane %v5824_v59, %v10317_v57  ;;  %v5809_v34 = vcombine.high %v11735_v3, %v11738_v5  ;;  %v5772_v9 = vcombine.low %v11834_v24, %v11842_v58 }
 0xcd6   :  { %v5825_v46 = vcombine.high %v11741_v53, %v11754_v14  ;;  %v4996_v52 = vcombine.low %v11688_v45, %v4837_v1  ;;  %v4997_v11 = vcombine.high %v11688_v45, %v4837_v1  ;;  %v5656_v3 = vcombine.low %v11760_v20, %v5431_v28  ;;  %v5993_v38 = vpop.permute.xlu0 %5992 }
 0xcd7   :  { %v5840_v27 = vcombine.low %v11864_v30, %v11867_v21  ;;  %v11882_v39 = vrot.slane %v5809_v34, %v10317_v57  ;;  %v5657_v5 = vcombine.high %v11760_v20, %v5431_v28  ;;  %v5775_v19 = vcombine.high %v11854_v29, %v11860_v32 }
 0xcd8   :  { %v11889_v53 = vrot.slane %v5825_v46, %v10317_v57  ;;  %v5004_v45 = vrot.slane %v4996_v52, %v10312_v50  ;;  %v5011_v14 = vrot.slane %v4997_v11, %v10312_v50  ;;  %v5664_v1 = vrot.slane %v5656_v3, %v10312_v50 }
 0xcd9   :  { %v5980_v59 = vpack.c.bf16 %v5840_v27, %v5772_v9  ;;  %v5671_v34 = vrot.slane %v5657_v5, %v10312_v50  ;;  %v5048_v35 = vcombine.low %v11624_v37, %v11877_v17 }
 0xcda   :  { %v5843_v20 = vcombine.high %v11882_v39, %v11889_v53  ;;  %v5012_v28 = vcombine.low %v4988_v6, %v5004_v45  ;;  %v5013_v26 = vcombine.high %v4988_v6, %v5004_v45  ;;  %v5028_v40 = vcombine.low %v4995_v62, %v5011_v14 }
 0xcdb   :  { %v6584_v46 = vsel %vm2325_vm2, %v5980_v59, 0  ;;  %v5029_v33 = vcombine.high %v4995_v62, %v5011_v14  ;;  %v5672_v52 = vcombine.low %v5648_v13, %v5664_v1  ;;  %v5673_v36 = vcombine.high %v5648_v13, %v5664_v1  ;;  %v4839_v62 = vpop.permute.xlu1 %4838 }
 0xcdc   :  { %9384 = vmatpush3.bf16.xpose.msra.mxu0 %v6584_v46  ;;  %v5983_v9 = vpack.c.bf16 %v5843_v20, %v5775_v19  ;;  %v5020_v11 = vrot.slane %v5012_v28, %v10317_v57  ;;  %v5027_v27 = vrot.slane %v5013_v26, %v10317_v57  ;;  %v5036_v3 = vrot.slane %v5028_v40, %v10317_v57 }
 0xcdd   :  { %v5043_v5 = vrot.slane %v5029_v33, %v10317_v57  ;;  %v5680_v48 = vrot.slane %v5672_v52, %v10317_v57  ;;  %v5687_v6 = vrot.slane %v5673_v36, %v10317_v57  ;;  %v5688_v45 = vcombine.low %v5655_v23, %v5671_v34  ;;  %9389 = vmatprep.subr.bf16.mxu0 %v12824_v61 }
 0xcde   :  { %v6725_v13 = vsel %vm2325_vm2, %v5983_v9, 0  ;;  %v5252_v19 = vcombine.low %v5020_v11, %v5027_v27  ;;  %v8919_v14 = vcombine.high %v5020_v11, %v5027_v27  ;;  %v5689_v59 = vcombine.high %v5655_v23, %v5671_v34 }
 0xcdf   :  { %9402 = vmatpush3.bf16.xpose.msra.mxu1 %v6725_v13  ;;  %v5268_v26 = vcombine.low %v5036_v3, %v5043_v5  ;;  %v8920_v1 = vcombine.high %v5036_v3, %v5043_v5  ;;  %v11909_v40 = vrot.slane %v5688_v45, %v10317_v57  ;;  %v5912_v33 = vcombine.low %v5680_v48, %v5687_v6  ;;  %v6017_v13 = vpop.permute.xlu0 %6016 }
 0xce0   :  { %v5259_v20 = vrot.slane %v5252_v19, %v10312_v50  ;;  %v5267_v36 = vrot.slane %v8919_v14, %v10312_v50  ;;  %v11914_v28 = vrot.slane %v5689_v59, %v10317_v57  ;;  %v8929_v46 = vcombine.high %v5680_v48, %v5687_v6  ;;  %9413 = vmatprep.subr.bf16.mxu1 %v12824_v61  ;;  %v6005_v19 = vpop.permute.xlu1 %6004 }
 0xce1   :  { %v12841_v23 = vcombine.high %v11783_v31, %v11786_v2  ;;  %v11924_v52 = vrot.slane %v5268_v26, %v10312_v50  ;;  %v11927_v9 = vrot.slane %v8920_v1, %v10312_v50  ;;  %v5049_v11 = vcombine.high %v11624_v37, %v11877_v17 }
 0xce2   :  { %v12842_v48 = vcombine.low %v11789_v4, %v11792_v10  ;;  %v12843_v31 = vcombine.high %v11789_v4, %v11792_v10  ;;  %v5284_v3 = vcombine.low %v5259_v20, %v5267_v36  ;;  %v5285_v5 = vcombine.high %v5259_v20, %v5267_v36 }
 0xce3   :  { %v11921_v34 = vrot.slane %v12841_v23, %v10317_v57  ;;  %v11944_v6 = vrot.slane %v5912_v33, %v10312_v50  ;;  %v11947_v45 = vrot.slane %v8929_v46, %v10312_v50  ;;  %v5928_v37 = vcombine.low %v11909_v40, %v11914_v28 }
 0xce4   :  { %v11935_v27 = vrot.slane %v12842_v48, %v10312_v50  ;;  %v11941_v2 = vrot.slane %v12843_v31, %v10312_v50  ;;  %v5056_v17 = vrot.slane %v5048_v35, %v10312_v50  ;;  %v5300_v4 = vcombine.low %v11924_v52, %v11927_v9 }
 0xce5   :  { %v5301_v10 = vcombine.high %v11924_v52, %v11927_v9  ;;  %v12844_v59 = vcombine.low %v11763_v8, %v11768_v22  ;;  %v12845_v26 = vcombine.low %v11808_v49, %v11811_v60  ;;  %v11965_v35 = vrot.slane %v5284_v3, %v10317_v57 }
 0xce6   :  { %v11968_v33 = vrot.slane %v5285_v5, %v10317_v57  ;;  %v5063_v20 = vrot.slane %v5049_v11, %v10312_v50  ;;  %v5183_v36 = vcombine.high %v11798_v0, %v11801_v15  ;;  %v5251_v46 = vcombine.high %v11820_v12, %v11921_v34 }
 0xce7   :  { %v5388_v1 = vpack.c.bf16 %v12845_v26, %v12844_v59  ;;  %v5773_v23 = vcombine.high %v11834_v24, %v11842_v58  ;;  %v5841_v48 = vcombine.high %v11864_v30, %v11867_v21  ;;  %v6044_v31 = vcombine.low %v5993_v38, %v6017_v13  ;;  %v11993_v21 = vpop.permute.xlu1 %5994 }
 0xce8   :  { %v6045_v3 = vcombine.high %v5993_v38, %v6017_v13  ;;  %v5064_v5 = vcombine.low %v11722_v63, %v4839_v62  ;;  %v5065_v11 = vcombine.high %v11722_v63, %v4839_v62  ;;  %v6028_v59 = vcombine.low %v11644_v7, %v6005_v19 }
 0xce9   :  { %9386 = vmatmul.mubr.msk.bf16.vlgmr.msra.gmra.mrb[52].mxu0 %vm2325_vm2, %v5388_v1  ;;  %v11986_v26 = vrot.slane %v5928_v37, %v10312_v50  ;;  %v5391_v1 = vpack.c.bf16 %v5251_v46, %v5183_v36  ;;  %v5981_v14 = vpack.c.bf16 %v5841_v48, %v5773_v23  ;;  %v6029_v24 = vcombine.high %v11644_v7, %v6005_v19 }
 0xcea   :  { %9391 = vmatprep.mubr.msk.bf16.mxu0 %vm9967_vm1, %v12824_v61  ;;  %v6052_v30 = vrot.slane %v6044_v31, %v10312_v50  ;;  %v5072_v38 = vrot.slane %v5064_v5, %v10312_v50  ;;  %v5079_v58 = vrot.slane %v5065_v11, %v10312_v50  ;;  %v6036_v63 = vrot.slane %v6028_v59, %v10312_v50 }
 0xceb   :  { %9404 = vmatmul.mubr.msk.bf16.vlgmr.msra.gmra.mrb[64].mxu1 %vm2325_vm2, %v5391_v1  ;;  %v6631_v62 = vsel %vm2325_vm2, %v5981_v14, 0  ;;  %v6059_v37 = vrot.slane %v6045_v3, %v10312_v50  ;;  %v6043_v13 = vrot.slane %v6029_v24, %v10312_v50  ;;  %v5249_v7 = vcombine.high %v11808_v49, %v11811_v60 }
 0xcec   :  { %9390 = vmatpush3.bf16.xpose.msra.mxu0 %v6631_v62  ;;  %v5080_v19 = vcombine.low %v5056_v17, %v5072_v38  ;;  %v5081_v36 = vcombine.high %v5056_v17, %v5072_v38  ;;  %v5096_v46 = vcombine.low %v5063_v20, %v5079_v58  ;;  %v5097_v23 = vcombine.high %v5063_v20, %v5079_v58 }
 0xced   :  { %v6060_v48 = vcombine.low %v6036_v63, %v6052_v30  ;;  %v6061_v31 = vcombine.high %v6036_v63, %v6052_v30  ;;  %v6076_v5 = vcombine.low %v6043_v13, %v6059_v37  ;;  %v6077_v11 = vcombine.high %v6043_v13, %v6059_v37  ;;  %9395 = vmatprep.subr.bf16.mxu0 %v12824_v61  ;;  %v6007_v63 = vpop.permute.xlu1 %6006 }
 0xcee   :  { %v5088_v14 = vrot.slane %v5080_v19, %v10317_v57  ;;  %v5095_v3 = vrot.slane %v5081_v36, %v10317_v57  ;;  %v5104_v59 = vrot.slane %v5096_v46, %v10317_v57  ;;  %v5111_v1 = vrot.slane %v5097_v23, %v10317_v57  ;;  %9415 = vmatprep.mubr.msk.bf16.mxu1 %vm9967_vm1, %v12824_v61 }
 0xcef   :  { %v6068_v49 = vrot.slane %v6060_v48, %v10317_v57  ;;  %v6075_v60 = vrot.slane %v6061_v31, %v10317_v57  ;;  %v6084_v17 = vrot.slane %v6076_v5, %v10317_v57  ;;  %v6091_v20 = vrot.slane %v6077_v11, %v10317_v57 }
 0xcf0   :  { %v5320_v24 = vcombine.low %v5088_v14, %v5095_v3  ;;  %v8921_v30 = vcombine.high %v5088_v14, %v5095_v3  ;;  %v5336_v38 = vcombine.low %v5104_v59, %v5111_v1  ;;  %v8922_v58 = vcombine.high %v5104_v59, %v5111_v1 }
 0xcf1   :  { %v6300_v62 = vcombine.low %v6068_v49, %v6075_v60  ;;  %v8931_v37 = vcombine.high %v6068_v49, %v6075_v60  ;;  %v6316_v13 = vcombine.low %v6084_v17, %v6091_v20  ;;  %v8932_v19 = vcombine.high %v6084_v17, %v6091_v20 }
 0xcf2   :  { %v12013_v36 = vrot.slane %v5320_v24, %v10312_v50  ;;  %v12016_v46 = vrot.slane %v8921_v30, %v10312_v50  ;;  %v12019_v23 = vrot.slane %v5336_v38, %v10312_v50  ;;  %v12022_v48 = vrot.slane %v8922_v58, %v10312_v50 }
 0xcf3   :  { %v12028_v31 = vrot.slane %v5300_v4, %v10317_v57  ;;  %v12034_v5 = vrot.slane %v5301_v10, %v10317_v57  ;;  %v12846_v11 = vcombine.high %v11909_v40, %v11914_v28  ;;  %v5181_v3 = vcombine.high %v11763_v8, %v11768_v22 }
 0xcf4   :  { %v5352_v59 = vcombine.low %v12013_v36, %v12016_v46  ;;  %v5368_v4 = vcombine.low %v12019_v23, %v12022_v48  ;;  %v12049_v1 = vrot.slane %v6300_v62, %v10312_v50  ;;  %v12052_v52 = vrot.slane %v8931_v37, %v10312_v50 }
 0xcf5   :  { %v12040_v14 = vrot.slane %v12846_v11, %v10312_v50  ;;  %v5389_v9 = vpack.c.bf16 %v5249_v7, %v5181_v3  ;;  %v5774_v40 = vcombine.low %v11854_v29, %v11860_v32  ;;  %v5842_v28 = vcombine.low %v11882_v39, %v11889_v53  ;;  %v6019_v7 = vpop.permute.xlu1 %6018 }
 0xcf6   :  { %v6096_v8 = vcombine.low %v11656_v25, %v6007_v63  ;;  %v5353_v22 = vcombine.high %v12013_v36, %v12016_v46  ;;  %v5369_v10 = vcombine.high %v12019_v23, %v12022_v48  ;;  %v12064_v49 = vrot.slane %v6316_v13, %v10312_v50 }
 0xcf7   :  { %v12067_v60 = vrot.slane %v8932_v19, %v10312_v50  ;;  %v12070_v29 = vrot.slane %v5352_v59, %v10317_v57  ;;  %v12073_v32 = vrot.slane %v5368_v4, %v10317_v57  ;;  %9392 = vmatmul.mubr.msk.bf16.vlgmr.msra.gmra.mrb[56].mxu0 %vm2325_vm2, %v5389_v9  ;;  %v5982_v39 = vpack.c.bf16 %v5842_v28, %v5774_v40 }
 0xcf8   :  { %v6097_v53 = vcombine.high %v11656_v25, %v6007_v63  ;;  %9397 = vmatprep.mubr.msk.bf16.mxu0 %vm9967_vm1, %v12824_v61  ;;  %v5250_v17 = vcombine.low %v11820_v12, %v11921_v34  ;;  %v5876_v20 = vcombine.low %v11814_v16, %v11817_v42  ;;  %v5892_v24 = vcombine.low %v11935_v27, %v11941_v2 }
 0xcf9   :  { %v5944_v30 = vcombine.low %v11944_v6, %v11947_v45  ;;  %v6678_v38 = vsel %vm2325_vm2, %v5982_v39, 0  ;;  %v6104_v58 = vrot.slane %v6096_v8, %v10312_v50  ;;  %v5960_v25 = vcombine.low %v11986_v26, %v12040_v14 }
 0xcfa   :  { %v6112_v63 = vcombine.low %v11993_v21, %v6019_v7  ;;  %9396 = vmatpush3.bf16.xpose.msra.mxu0 %v6678_v38  ;;  %v5182_v12 = vcombine.low %v11798_v0, %v11801_v15  ;;  %v5884_v34 = vrot.slane %v5876_v20, %v10317_v57  ;;  %v5900_v62 = vrot.slane %v5892_v24, %v10317_v57 }
 0xcfb   :  { %v5952_v37 = vrot.slane %v5944_v30, %v10317_v57  ;;  %v6111_v13 = vrot.slane %v6097_v53, %v10312_v50  ;;  %9407 = vmatprep.subr.bf16.mxu0 %v12824_v61  ;;  %v5968_v19 = vrot.slane %v5960_v25, %v10317_v57  ;;  %v6113_v11 = vcombine.high %v11993_v21, %v6019_v7 }
 0xcfc   :  { %v6120_v3 = vrot.slane %v6112_v63, %v10312_v50  ;;  %v5390_v59 = vpack.c.bf16 %v5250_v17, %v5182_v12  ;;  %v5908_v4 = vcombine.low %v5884_v34, %v5900_v62  ;;  %v5909_v9 = vcombine.high %v5884_v34, %v5900_v62 }
 0xcfd   :  { %v5316_v0 = vcombine.low %v11965_v35, %v12028_v31  ;;  %v5976_v15 = vcombine.low %v5952_v37, %v5968_v19  ;;  %v5977_v40 = vcombine.high %v5952_v37, %v5968_v19  ;;  %v6127_v28 = vrot.slane %v6113_v11, %v10312_v50 }
 0xcfe   :  { %v6128_v8 = vcombine.low %v6104_v58, %v6120_v3  ;;  %v6129_v39 = vcombine.high %v6104_v58, %v6120_v3  ;;  %v5384_v53 = vcombine.low %v12070_v29, %v12073_v32  ;;  %v5317_v21 = vcombine.high %v11965_v35, %v12028_v31 }
 0xcff   :  { %v5877_v7 = vcombine.high %v11814_v16, %v11817_v42  ;;  %v5984_v17 = vpack.c.bf16 %v5976_v15, %v5908_v4  ;;  %v5985_v20 = vpack.c.bf16 %v5977_v40, %v5909_v9  ;;  %v6144_v30 = vcombine.low %v6111_v13, %v6127_v28 }
 0xd00   :  { %v6136_v24 = vrot.slane %v6128_v8, %v10317_v57  ;;  %v6143_v38 = vrot.slane %v6129_v39, %v10317_v57  ;;  %v6145_v25 = vcombine.high %v6111_v13, %v6127_v28  ;;  %v5385_v58 = vcombine.high %v12070_v29, %v12073_v32 }
 0xd01   :  { %v5891_v63 = vrot.slane %v5877_v7, %v10317_v57  ;;  %9398 = vmatmul.mubr.msk.bf16.vlgmr.msra.gmra.mrb[60].mxu0 %vm2325_vm2, %v5390_v59  ;;  %v6772_v35 = vsel %vm2325_vm2, %v5984_v17, 0  ;;  %v6819_v31 = vsel %vm2325_vm2, %v5985_v20, 0  ;;  %v6152_v16 = vrot.slane %v6144_v30, %v10317_v57 }
 0xd02   :  { %v5893_v42 = vcombine.high %v11935_v27, %v11941_v2  ;;  %9408 = vmatpush3.bf16.xpose.msra.mxu0 %v6772_v35  ;;  %9414 = vmatpush3.bf16.xpose.msra.mxu1 %v6819_v31  ;;  %v6159_v12 = vrot.slane %v6145_v25, %v10317_v57  ;;  %v6368_v34 = vcombine.low %v6136_v24, %v6143_v38 }
 0xd03   :  { %v8933_v62 = vcombine.high %v6136_v24, %v6143_v38  ;;  %9409 = vmatprep.mubr.msk.bf16.mxu0 %vm9967_vm1, %v12824_v61  ;;  %9419 = vmatprep.subr.bf16.mxu0 %v12824_v61  ;;  %v5945_v32 = vcombine.high %v11944_v6, %v11947_v45  ;;  %v5961_v37 = vcombine.high %v11986_v26, %v12040_v14 }
 0xd04   :  { %v5907_v29 = vrot.slane %v5893_v42, %v10317_v57  ;;  %v6375_v27 = vrot.slane %v6368_v34, %v10312_v50  ;;  %v6384_v13 = vcombine.low %v6152_v16, %v6159_v12  ;;  %v8934_v19 = vcombine.high %v6152_v16, %v6159_v12  ;;  %9425 = vmatprep.subr.bf16.mxu1 %v12824_v61 }
 0xd05   :  { %v6383_v2 = vrot.slane %v8933_v62, %v10312_v50  ;;  %v5392_v11 = vpack.c.bf16 %v5384_v53, %v5316_v0  ;;  %v5393_v3 = vpack.c.bf16 %v5385_v58, %v5317_v21  ;;  %v5959_v59 = vrot.slane %v5945_v32, %v10317_v57 }
 0xd06   :  { %v5975_v4 = vrot.slane %v5961_v37, %v10317_v57  ;;  %v5367_v6 = vrot.slane %v5353_v22, %v10317_v57  ;;  %v5910_v45 = vcombine.low %v5891_v63, %v5907_v29  ;;  %v5911_v26 = vcombine.high %v5891_v63, %v5907_v29 }
 0xd07   :  { %v6391_v14 = vrot.slane %v6384_v13, %v10312_v50  ;;  %v6399_v9 = vrot.slane %v8934_v19, %v10312_v50  ;;  %v5383_v0 = vrot.slane %v5369_v10, %v10317_v57  ;;  %v6332_v28 = vcombine.low %v12049_v1, %v12052_v52 }
 0xd08   :  { %v5978_v15 = vcombine.low %v5959_v59, %v5975_v4  ;;  %v5979_v40 = vcombine.high %v5959_v59, %v5975_v4  ;;  %v6348_v36 = vcombine.low %v12064_v49, %v12067_v60  ;;  %v6400_v46 = vcombine.low %v6375_v27, %v6383_v2 }
 0xd09   :  { %9410 = vmatmul.mubr.msk.bf16.vlgmr.msra.gmra.mrb[64].mxu0 %vm2325_vm2, %v5392_v11  ;;  %9416 = vmatmul.mubr.msk.bf16.vlgmr.msra.gmra.mrb[68].mxu1 %vm2325_vm2, %v5393_v3  ;;  %v5318_v39 = vcombine.low %v11968_v33, %v12034_v5  ;;  %v6340_v23 = vrot.slane %v6332_v28, %v10317_v57  ;;  %v6416_v7 = vcombine.low %v6391_v14, %v6399_v9 }
 0xd0a   :  { %v5986_v22 = vpack.c.bf16 %v5978_v15, %v5910_v45  ;;  %v5987_v8 = vpack.c.bf16 %v5979_v40, %v5911_v26  ;;  %9421 = vmatprep.mubr.msk.bf16.mxu0 %vm9967_vm1, %v12824_v61  ;;  %9427 = vmatprep.mubr.msk.bf16.mxu1 %vm9967_vm1, %v12824_v61  ;;  %v6356_v48 = vrot.slane %v6348_v36, %v10317_v57 }
 0xd0b   :  { %v6408_v10 = vrot.slane %v6400_v46, %v10317_v57  ;;  %v6333_v17 = vcombine.high %v12049_v1, %v12052_v52  ;;  %v5386_v20 = vcombine.low %v5367_v6, %v5383_v0  ;;  %v5387_v24 = vcombine.high %v5367_v6, %v5383_v0 }
 0xd0c   :  { %v6866_v53 = vsel %vm2325_vm2, %v5986_v22, 0  ;;  %v6913_v21 = vsel %vm2325_vm2, %v5987_v8, 0  ;;  %v6349_v30 = vcombine.high %v12064_v49, %v12067_v60  ;;  %v6424_v38 = vrot.slane %v6416_v7, %v10317_v57 }
 0xd0d   :  { %9420 = vmatpush3.bf16.xpose.msra.mxu0 %v6866_v53  ;;  %9426 = vmatpush3.bf16.xpose.msra.mxu1 %v6913_v21  ;;  %v6347_v25 = vrot.slane %v6333_v17, %v10317_v57  ;;  %v6401_v58 = vcombine.high %v6375_v27, %v6383_v2  ;;  %v5319_v63 = vcombine.high %v11968_v33, %v12034_v5 }
 0xd0e   :  { %9431 = vmatprep.subr.bf16.mxu0 %v12824_v61  ;;  %9437 = vmatprep.subr.bf16.mxu1 %v12824_v61  ;;  %v6364_v1 = vcombine.low %v6340_v23, %v6356_v48  ;;  %v6363_v52 = vrot.slane %v6349_v30, %v10317_v57  ;;  %v6417_v35 = vcombine.high %v6391_v14, %v6399_v9 }
 0xd0f   :  { %v6432_v31 = vcombine.low %v6408_v10, %v6424_v38  ;;  %v6365_v16 = vcombine.high %v6340_v23, %v6356_v48  ;;  %v6433_v42 = vcombine.high %v6408_v10, %v6424_v38  ;;  %v6415_v49 = vrot.slane %v6401_v58, %v10317_v57 }
 0xd10   :  { %v6366_v60 = vcombine.low %v6347_v25, %v6363_v52  ;;  %v6431_v12 = vrot.slane %v6417_v35, %v10317_v57  ;;  %v6367_v34 = vcombine.high %v6347_v25, %v6363_v52  ;;  %v5394_v62 = vpack.c.bf16 %v5386_v20, %v5318_v39 }
 0xd11   :  { %v5395_v29 = vpack.c.bf16 %v5387_v24, %v5319_v63  ;;  %v6572_v32 = vpack.c.bf16 %v6432_v31, %v6364_v1  ;;  %v6573_v37 = vpack.c.bf16 %v6433_v42, %v6365_v16 }
 0xd12   :  { %v6434_v27 = vcombine.low %v6415_v49, %v6431_v12  ;;  %v6435_v2 = vcombine.high %v6415_v49, %v6431_v12 }
 0xd14   :  { %9422 = vmatmul.mubr.msk.bf16.vlgmr.msra.gmra.mrb[68].mxu0 %vm2325_vm2, %v5394_v62  ;;  %9428 = vmatmul.mubr.msk.bf16.vlgmr.msra.gmra.mrb[72].mxu1 %vm2325_vm2, %v5395_v29  ;;  %v12178_v33 = vpack.c.bf16 %v6434_v27, %v6366_v60  ;;  %v12180_v5 = vpack.c.bf16 %v6435_v2, %v6367_v34 }
 0xd15   :  { %9432 = vmatpush3.bf16.msra.mxu0 %v6572_v32  ;;  %9438 = vmatpush3.bf16.msra.mxu1 %v6573_v37 }
 0xd16   :  { %9433 = vmatprep.mubr.msk.bf16.mxu0 %vm9967_vm1, %v12824_v61  ;;  %9443 = vmatprep.subr.bf16.mxu0 %v12824_v61 }
 0xd17   :  { %9439 = vmatprep.mubr.msk.bf16.mxu1 %vm9967_vm1, %v12824_v61  ;;  %9449 = vmatprep.subr.bf16.mxu1 %v12824_v61 }
 0xdbc   :  { %v12188_v13 = vpop.f32.mrb[52].mxu0 }
 0xdbd   :  { %v9387_v19 = vpop.f32.mrb[53].mxu0  ;;  %v6956_v11 = vsel %vm2702_vm3, %v12188_v13, -inf }
 0xdbe   :  { %6957 = vmax.xlane.f32.xlu0 %v6956_v11  ;;  %v12192_v3 = vpop.f32.mrb[54].mxu0  ;;  %v12196_v6 = vpop.f32.mrb[64].mxu1 }
 0xdbf   :  { %v9388_v59 = vpop.f32.mrb[55].mxu0  ;;  %v6959_v4 = vsel %vm2702_vm3, %v12192_v3, -inf  ;;  %v9405_v45 = vpop.f32.mrb[65].mxu1  ;;  %v6974_v26 = vsel %vm2702_vm3, %v12196_v6, -inf }
 0xdc0   :  { %6960 = vmax.xlane.f32.xlu1 %v6959_v4  ;;  %v12200_v14 = vpop.f32.mrb[66].mxu1 }
 0xdc1   :  { %v9406_v9 = vpop.f32.mrb[67].mxu1  ;;  %v6977_v15 = vsel %vm2702_vm3, %v12200_v14, -inf }
 0xdc2   :  { %6975 = vmax.xlane.f32.xlu0 %v6974_v26 }
 0xdc4   :  { %6978 = vmax.xlane.f32.xlu1 %v6977_v15 }
 0xdca   :  { %v12204_v40 = vpop.f32.mrb[56].mxu0 }
 0xdcb   :  { %v9393_v0 = vpop.f32.mrb[57].mxu0  ;;  %v6962_v28 = vsel %vm2702_vm3, %v12204_v40, -inf }
 0xdcc   :  { %6963 = vmax.xlane.f32.xlu0 %v6962_v28  ;;  %v12208_v36 = vpop.f32.mrb[58].mxu0 }
 0xdcd   :  { %v9394_v46 = vpop.f32.mrb[59].mxu0  ;;  %v6965_v25 = vsel %vm2702_vm3, %v12208_v36, -inf }
 0xdd4   :  { %v12210_v22 = vpop.f32.mrb[60].mxu0 }
 0xdd5   :  { %v9399_v8 = vpop.f32.mrb[61].mxu0  ;;  %v6968_v63 = vsel %vm2702_vm3, %v12210_v22, -inf }
 0xdd6   :  { %v12212_v39 = vpop.f32.mrb[62].mxu0 }
 0xdd7   :  { %v9400_v23 = vpop.f32.mrb[63].mxu0  ;;  %v6971_v58 = vsel %vm2702_vm3, %v12212_v39, -inf }
 0xddc   :  { %v12214_v48 = vpop.f32.mrb[64].mxu0  ;;  %v12216_v10 = vpop.f32.mrb[68].mxu1 }
 0xddd   :  { %v9411_v53 = vpop.f32.mrb[65].mxu0  ;;  %v9417_v21 = vpop.f32.mrb[69].mxu1  ;;  %v6986_v7 = vsel %vm2702_vm3, %v12216_v10, -inf  ;;  %v6980_v62 = vsel %vm2702_vm3, %v12214_v48, -inf }
 0xdde   :  { %6987 = vmax.xlane.f32.xlu0 %v6986_v7  ;;  %v12220_v17 = vpop.f32.mrb[66].mxu0  ;;  %v12222_v20 = vpop.f32.mrb[70].mxu1 }
 0xddf   :  { %v9412_v24 = vpop.f32.mrb[67].mxu0  ;;  %v9418_v30 = vpop.f32.mrb[71].mxu1  ;;  %v6989_v38 = vsel %vm2702_vm3, %v12222_v20, -inf  ;;  %v6983_v29 = vsel %vm2702_vm3, %v12220_v17, -inf }
 0xde0   :  { %6990 = vmax.xlane.f32.xlu1 %v6989_v38 }
 0xde2   :  { %6966 = vmax.xlane.f32.xlu0 %v6965_v25 }
 0xde4   :  { %6972 = vmax.xlane.f32.xlu1 %v6971_v58 }
 0xde6   :  { %6969 = vmax.xlane.f32.xlu0 %v6968_v63 }
 0xde7   :  { %v12232_v1 = vpop.f32.mrb[68].mxu0  ;;  %v12234_v52 = vpop.f32.mrb[72].mxu1 }
 0xde8   :  { %v9423_v35 = vpop.f32.mrb[69].mxu0  ;;  %v9429_v31 = vpop.f32.mrb[73].mxu1  ;;  %v6998_v34 = vsel %vm2702_vm3, %v12234_v52, -inf  ;;  %v6992_v32 = vsel %vm2702_vm3, %v12232_v1, -inf }
 0xde9   :  { %v12236_v16 = vpop.f32.mrb[70].mxu0  ;;  %v12238_v42 = vpop.f32.mrb[74].mxu1 }
 0xdea   :  { %v9424_v49 = vpop.f32.mrb[71].mxu0  ;;  %v9430_v60 = vpop.f32.mrb[75].mxu1  ;;  %v7001_v12 = vsel %vm2702_vm3, %v12238_v42, -inf  ;;  %6999 = vmax.xlane.f32.xlu0 %v6998_v34  ;;  %v6995_v37 = vsel %vm2702_vm3, %v12236_v16, -inf }
 0xdeb   :  { %7002 = vmax.xlane.f32.xlu1 %v7001_v12 }
 0xdee   :  { %6981 = vmax.xlane.f32.xlu0 %v6980_v62 }
 0xdfc   :  { %5998 = vrot.lane.b32.xlu1 %v11598_v55, %s9963_s0 }
 0xe00   :  { %6008 = vrot.lane.b32.xlu1 %v11594_v56, %s9964_s28 }
 0xe04   :  { %5996 = vrot.lane.b32.xlu0 %v11594_v56, %s9963_s0 }
 0xe23   :  { %6993 = vmax.xlane.f32.xlu0 %v6992_v32 }
 0xe24   :  { %6984 = vmax.xlane.f32.xlu1 %v6983_v29 }
 0xe28   :  { %6996 = vmax.xlane.f32.xlu1 %v6995_v37 }
 0xe39   :  { %6010 = vrot.lane.b32.xlu1 %v11598_v55, %s9964_s28  ;;  %6020 = vrot.lane.b32.xlu0 %v11594_v56, %s9965_s2 }
 0xe4b   :  { %v6958_v27 = vpop.xlane.xlu0 %6957 }
 0xe4c   :  { %v7004_v2 = vsub.f32 %v12188_v13, %v6958_v27 }
 0xe4d   :  { %v6961_v19 = vpop.xlane.xlu1 %6960 }
 0xe4e   :  { %v7020_v11 = vmul.f32 1.442695, %v7004_v2  ;;  %v7005_v59 = vsub.f32 %v12192_v3, %v6961_v19 }
 0xe4f   :  { %v6976_v4 = vpop.xlane.xlu0 %6975 }
 0xe50   :  { %9846 = vpow2.f32 %v7020_v11  ;;  %v7022_v45 = vmul.f32 1.442695, %v7005_v59  ;;  %v7010_v26 = vsub.f32 %v12196_v6, %v6976_v4 }
 0xe51   :  { %v6979_v9 = vpop.xlane.xlu1 %6978 }
 0xe52   :  { %9848 = vpow2.f32 %v7022_v45  ;;  %v7032_v15 = vmul.f32 1.442695, %v7010_v26  ;;  %v7011_v0 = vsub.f32 %v12200_v14, %v6979_v9 }
 0xe54   :  { %9850 = vpow2.f32 %v7032_v15  ;;  %v7034_v28 = vmul.f32 1.442695, %v7011_v0 }
 0xe56   :  { %9852 = vpow2.f32 %v7034_v28 }
 0xe59   :  { %v6964_v13 = vpop.xlane.xlu0 %6963 }
 0xe5a   :  { %v12266_v46 = vpop.eup %9846  ;;  %v7006_v23 = vsub.f32 %v12204_v40, %v6964_v13 }
 0xe5b   :  { %v7052_v8 = vsel %vm2702_vm3, %v12266_v46, 0.0 }
 0xe5c   :  { %v12270_v3 = vpop.eup %9848  ;;  %7053 = vadd.xlane.f32.xlu0 %v7052_v8  ;;  %v7024_v14 = vmul.f32 1.442695, %v7006_v23 }
 0xe5d   :  { %v7055_v6 = vsel %vm2702_vm3, %v12270_v3, 0.0 }
 0xe5e   :  { %v12275_v53 = vpop.eup %9850  ;;  %7056 = vadd.xlane.f32.xlu1 %v7055_v6  ;;  %9854 = vpow2.f32 %v7024_v14 }
 0xe5f   :  { %v7070_v21 = vsel %vm2702_vm3, %v12275_v53, 0.0 }
 0xe60   :  { %v12279_v7 = vpop.eup %9852  ;;  %7071 = vadd.xlane.f32.xlu0 %v7070_v21 }
 0xe61   :  { %v7073_v24 = vsel %vm2702_vm3, %v12279_v7, 0.0 }
 0xe64   :  { %7074 = vadd.xlane.f32.xlu0 %v7073_v24 }
 0xe68   :  { %v12283_v40 = vpop.eup %9854 }
 0xe69   :  { %v7058_v30 = vsel %vm2702_vm3, %v12283_v40, 0.0 }
 0xe6a   :  { %7059 = vadd.xlane.f32.xlu0 %v7058_v30 }
 0xe6b   :  { %v6988_v38 = vpop.xlane.xlu0 %6987 }
 0xe6c   :  { %v7014_v25 = vsub.f32 %v12216_v10, %v6988_v38 }
 0xe6d   :  { %v6991_v58 = vpop.xlane.xlu1 %6990 }
 0xe6e   :  { %v7040_v63 = vmul.f32 1.442695, %v7014_v25  ;;  %v7015_v35 = vsub.f32 %v12222_v20, %v6991_v58 }
 0xe6f   :  { %v6967_v31 = vpop.xlane.xlu0 %6966 }
 0xe70   :  { %9856 = vpow2.f32 %v7040_v63  ;;  %v7007_v49 = vsub.f32 %v12208_v36, %v6967_v31  ;;  %v7042_v12 = vmul.f32 1.442695, %v7015_v35 }
 0xe71   :  { %v6973_v60 = vpop.xlane.xlu1 %6972 }
 0xe72   :  { %v7026_v34 = vmul.f32 1.442695, %v7007_v49  ;;  %v7009_v62 = vsub.f32 %v12212_v39, %v6973_v60 }
 0xe73   :  { %v6970_v29 = vpop.xlane.xlu0 %6969 }
 0xe74   :  { %9858 = vpow2.f32 %v7026_v34  ;;  %v7008_v32 = vsub.f32 %v12210_v22, %v6970_v29  ;;  %v7030_v37 = vmul.f32 1.442695, %v7009_v62 }
 0xe75   :  { %9860 = vpow2.f32 %v7042_v12 }
 0xe76   :  { %v7028_v10 = vmul.f32 1.442695, %v7008_v32 }
 0xe77   :  { %v7000_v27 = vpop.xlane.xlu0 %6999 }
 0xe78   :  { %9862 = vpow2.f32 %v7028_v10  ;;  %v7003_v28 = vpop.xlane.xlu1 %7002  ;;  %v7018_v6 = vsub.f32 %v12234_v52, %v7000_v27 }
 0xe79   :  { %9864 = vpow2.f32 %v7030_v37  ;;  %v7019_v35 = vsub.f32 %v12238_v42, %v7003_v28 }
 0xe7a   :  { %v12292_v2 = vpop.eup %9856  ;;  %v7048_v31 = vmul.f32 1.442695, %v7018_v6 }
 0xe7b   :  { %v6982_v20 = vpop.xlane.xlu0 %6981  ;;  %v7082_v36 = vsel %vm2702_vm3, %v12292_v2, 0.0  ;;  %v7050_v62 = vmul.f32 1.442695, %v7019_v35 }
 0xe7c   :  { %v7012_v19 = vsub.f32 %v12214_v48, %v6982_v20  ;;  %7083 = vadd.xlane.f32.xlu0 %v7082_v36  ;;  %v12317_v13 = vpop.permute.xlu1 %5998 }
 0xe7e   :  { %v12297_v39 = vpop.eup %9858  ;;  %v7036_v11 = vmul.f32 1.442695, %v7012_v19 }
 0xe7f   :  { %v7061_v22 = vsel %vm2702_vm3, %v12297_v39, 0.0  ;;  %v12301_v59 = vpop.eup %9860  ;;  %v5997_v23 = vpop.permute.xlu0 %5996 }
 0xe80   :  { %9866 = vpow2.f32 %v7036_v11  ;;  %7062 = vadd.xlane.f32.xlu1 %v7061_v22  ;;  %v7085_v45 = vsel %vm2702_vm3, %v12301_v59, 0.0  ;;  %v6009_v8 = vpop.permute.xlu1 %6008 }
 0xe81   :  { %v6164_v38 = vcombine.low %v11594_v56, %v6009_v8  ;;  %v6165_v25 = vcombine.high %v11594_v56, %v6009_v8 }
 0xe82   :  { %v12303_v4 = vpop.eup %9862 }
 0xe83   :  { %v7064_v26 = vsel %vm2702_vm3, %v12303_v4, 0.0  ;;  %v12309_v48 = vpop.eup %9864  ;;  %v6172_v52 = vrot.slane %v6164_v38, %v10312_v50 }
 0xe84   :  { %7086 = vadd.xlane.f32.xlu1 %v7085_v45  ;;  %7065 = vadd.xlane.f32.xlu0 %v7064_v26  ;;  %v7067_v9 = vsel %vm2702_vm3, %v12309_v48, 0.0 }
 0xe88   :  { %7068 = vadd.xlane.f32.xlu1 %v7067_v9 }
 0xe8a   :  { %v12313_v15 = vpop.eup %9866 }
 0xe8b   :  { %v7076_v0 = vsel %vm2702_vm3, %v12313_v15, 0.0 }
 0xe8c   :  { %7077 = vadd.xlane.f32.xlu0 %v7076_v0 }
 0xeb0   :  { %v6994_v21 = vpop.xlane.xlu0 %6993 }
 0xeb1   :  { %v6985_v14 = vpop.xlane.xlu1 %6984  ;;  %v7016_v30 = vsub.f32 %v12232_v1, %v6994_v21 }
 0xeb2   :  { %v7013_v24 = vsub.f32 %v12220_v17, %v6985_v14  ;;  %v6179_v17 = vrot.slane %v6165_v25, %v10312_v50 }
 0xeb3   :  { %v7044_v63 = vmul.f32 1.442695, %v7016_v30 }
 0xeb4   :  { %v7038_v58 = vmul.f32 1.442695, %v7013_v24  ;;  %v6021_v49 = vpop.permute.xlu0 %6020 }
 0xeb5   :  { %v6180_v60 = vcombine.low %v5997_v23, %v6021_v49  ;;  %v6181_v12 = vcombine.high %v5997_v23, %v6021_v49 }
 0xeb6   :  { %9868 = vpow2.f32 %v7038_v58 }
 0xeb7   :  { %9870 = vpow2.f32 %v7044_v63  ;;  %v6188_v1 = vrot.slane %v6180_v60, %v10312_v50  ;;  %v6195_v34 = vrot.slane %v6181_v12, %v10312_v50 }
 0xeb8   :  { %9872 = vpow2.f32 %v7048_v31 }
 0xeb9   :  { %v6196_v56 = vcombine.low %v6172_v52, %v6188_v1  ;;  %v6197_v29 = vcombine.high %v6172_v52, %v6188_v1  ;;  %v6212_v32 = vcombine.low %v6179_v17, %v6195_v34  ;;  %v6213_v42 = vcombine.high %v6179_v17, %v6195_v34  ;;  %v6997_v34 = vpop.xlane.xlu1 %6996 }
 0xeba   :  { %9874 = vpow2.f32 %v7050_v62  ;;  %v7017_v62 = vsub.f32 %v12236_v16, %v6997_v34 }
 0xebb   :  { %v6204_v37 = vrot.slane %v6196_v56, %v10317_v57  ;;  %v6211_v10 = vrot.slane %v6197_v29, %v10317_v57  ;;  %v6220_v27 = vrot.slane %v6212_v32, %v10317_v57  ;;  %v6227_v20 = vrot.slane %v6213_v42, %v10317_v57 }
 0xebc   :  { %v7046_v56 = vmul.f32 1.442695, %v7017_v62 }
 0xebd   :  { %v6436_v36 = vcombine.low %v6204_v37, %v6211_v10  ;;  %v8935_v19 = vcombine.high %v6204_v37, %v6211_v10  ;;  %v6452_v11 = vcombine.low %v6220_v27, %v6227_v20  ;;  %v8936_v22 = vcombine.high %v6220_v27, %v6227_v20  ;;  %v12376_v29 = vpop.permute.xlu1 %6010 }
 0xebe   :  { %9876 = vpow2.f32 %v7046_v56 }
 0xebf   :  { %v6443_v26 = vrot.slane %v6436_v36, %v10312_v50  ;;  %v6451_v9 = vrot.slane %v8935_v19, %v10312_v50  ;;  %v6459_v28 = vrot.slane %v6452_v11, %v10312_v50  ;;  %v6467_v8 = vrot.slane %v8936_v22, %v10312_v50 }
 0xec0   :  { %v12333_v45 = vpop.eup %9868 }
 0xec1   :  { %v12337_v0 = vpop.eup %9870  ;;  %v7079_v23 = vsel %vm2702_vm3, %v12333_v45, 0.0  ;;  %v6468_v14 = vcombine.low %v6443_v26, %v6451_v9  ;;  %v6469_v21 = vcombine.high %v6443_v26, %v6451_v9  ;;  %v6484_v30 = vcombine.low %v6459_v28, %v6467_v8 }
 0xec2   :  { %7080 = vadd.xlane.f32.xlu1 %v7079_v23  ;;  %v7088_v6 = vsel %vm2702_vm3, %v12337_v0, 0.0  ;;  %v12345_v24 = vpop.eup %9872  ;;  %v6485_v38 = vcombine.high %v6459_v28, %v6467_v8 }
 0xec3   :  { %7089 = vadd.xlane.f32.xlu0 %v7088_v6  ;;  %v12348_v25 = vrot.slane %v6468_v14, %v10317_v57  ;;  %v12351_v58 = vrot.slane %v6469_v21, %v10317_v57  ;;  %v12354_v63 = vrot.slane %v6484_v30, %v10317_v57  ;;  %v7094_v31 = vsel %vm2702_vm3, %v12345_v24, 0.0 }
 0xec4   :  { %v12357_v35 = vrot.slane %v6485_v38, %v10317_v57  ;;  %v12361_v49 = vpop.eup %9874 }
 0xec5   :  { %v6500_v60 = vcombine.low %v12348_v25, %v12354_v63  ;;  %v6501_v12 = vcombine.high %v12348_v25, %v12354_v63  ;;  %v7097_v1 = vsel %vm2702_vm3, %v12361_v49, 0.0 }
 0xec6   :  { %v6502_v52 = vcombine.low %v12351_v58, %v12357_v35  ;;  %v6503_v17 = vcombine.high %v12351_v58, %v12357_v35 }
 0xec7   :  { %7095 = vadd.xlane.f32.xlu0 %v7094_v31 }
 0xec8   :  { %v12378_v37 = vpop.eup %9876 }
 0xec9   :  { %v7091_v19 = vsel %vm2702_vm3, %v12378_v37, 0.0 }
 0xecb   :  { %7098 = vadd.xlane.f32.xlu0 %v7097_v1 }
 0xed3   :  { %6022 = vrot.lane.b32.xlu1 %v11598_v55, %s9965_s2 }
 0xee9   :  { %v7054_v32 = vpop.xlane.xlu0 %7053 }
 0xeea   :  { %9878 = vrcp.f32 %v7054_v32 }
 0xeeb   :  { %v7057_v42 = vpop.xlane.xlu1 %7056 }
 0xeec   :  { %9880 = vrcp.f32 %v7057_v42 }
 0xeed   :  { %v7072_v11 = vpop.xlane.xlu0 %7071 }
 0xef1   :  { %v7075_v22 = vpop.xlane.xlu0 %7074 }
 0xef4   :  { %v9879_v10 = vpop.eup %9878 }
 0xef5   :  { %v7116_v20 = vmul.f32 %v9879_v10, %v12266_v46 }
 0xef6   :  { %v9881_v27 = vpop.eup %9880 }
 0xef7   :  { %v7117_v36 = vmul.f32 %v9881_v27, %v12270_v3  ;;  %7092 = vadd.xlane.f32.xlu1 %v7091_v19  ;;  %v7060_v26 = vpop.xlane.xlu0 %7059 }
 0xef8   :  { %9882 = vrcp.f32 %v7060_v26 }
 0xef9   :  { %v7132_v16 = vpack.c.bf16 %v7117_v36, %v7116_v20 }
 0xefb   :  { %9434 = vmatmul.mubr.msk.bf16.vlgmr.msra.gmra.mrb[72].mxu0 %vm2702_vm3, %v7132_v16 }
 0xefc   :  { %9444 = vmatpush3.bf16.msra.mxu0 %v12178_v33  ;;  %9445 = vmatprep.mubr.msk.bf16.mxu0 %vm9967_vm1, %v12824_v61 }
 0xefd   :  { %9455 = vmatprep.subr.bf16.mxu0 %v12824_v61 }
 0xf02   :  { %v9883_v8 = vpop.eup %9882 }
 0xf03   :  { %v7118_v6 = vmul.f32 %v9883_v8, %v12283_v40 }
 0xf09   :  { %v7084_v46 = vpop.xlane.xlu0 %7083 }
 0xf0d   :  { %v7063_v3 = vpop.xlane.xlu1 %7062 }
 0xf0e   :  { %9884 = vrcp.f32 %v7063_v3 }
 0xf0f   :  { %9886 = vrcp.f32 %v7084_v46 }
 0xf10   :  { %9888 = vrcp.f32 %v7075_v22 }
 0xf11   :  { %v7087_v9 = vpop.xlane.xlu1 %7086  ;;  %v7066_v28 = vpop.xlane.xlu0 %7065 }
 0xf12   :  { %9890 = vrcp.f32 %v7087_v9 }
 0xf13   :  { %9892 = vrcp.f32 %v7072_v11 }
 0xf14   :  { %9894 = vrcp.f32 %v7066_v28 }
 0xf15   :  { %v7069_v33 = vpop.xlane.xlu1 %7068 }
 0xf16   :  { %9896 = vrcp.f32 %v7069_v33 }
 0xf18   :  { %v9885_v23 = vpop.eup %9884 }
 0xf19   :  { %v7119_v14 = vmul.f32 %v9885_v23, %v12297_v39  ;;  %v9887_v21 = vpop.eup %9886 }
 0xf1a   :  { %v9889_v30 = vpop.eup %9888  ;;  %v12392_v34 = vmul.f32 %v9887_v21, %v12292_v2 }
 0xf1b   :  { %v7133_v38 = vpack.c.bf16 %v7119_v14, %v7118_v6  ;;  %v7123_v40 = vmul.f32 %v9889_v30, %v12279_v7 }
 0xf1c   :  { %v9891_v31 = vpop.eup %9890 }
 0xf1d   :  { %v9893_v1 = vpop.eup %9892  ;;  %v12395_v62 = vmul.f32 %v9891_v31, %v12301_v59  ;;  %9440 = vmatmul.mubr.msk.bf16.vlgmr.msra.gmra.mrb[76].mxu1 %vm2702_vm3, %v7133_v38 }
 0xf1e   :  { %v9895_v56 = vpop.eup %9894  ;;  %9450 = vmatpush3.bf16.msra.mxu1 %v12180_v5  ;;  %9451 = vmatprep.mubr.msk.bf16.mxu1 %vm9967_vm1, %v12824_v61  ;;  %v7122_v32 = vmul.f32 %v9893_v1, %v12275_v53  ;;  %v7078_v5 = vpop.xlane.xlu0 %7077  ;;  %v6232_v53 = vcombine.low %v11598_v55, %v12376_v29 }
 0xf1f   :  { %9461 = vmatprep.subr.bf16.mxu1 %v12824_v61  ;;  %v7137_v39 = vpack.c.bf16 %v12395_v62, %v12392_v34  ;;  %v7120_v59 = vmul.f32 %v9895_v56, %v12303_v4  ;;  %v6233_v4 = vcombine.high %v11598_v55, %v12376_v29 }
 0xf20   :  { %v9897_v2 = vpop.eup %9896  ;;  %v7135_v27 = vpack.c.bf16 %v7123_v40, %v7122_v32  ;;  %v6240_v16 = vrot.slane %v6232_v53, %v10312_v50 }
 0xf21   :  { %v7121_v42 = vmul.f32 %v9897_v2, %v12309_v48  ;;  %v6247_v11 = vrot.slane %v6233_v4, %v10312_v50 }
 0xf23   :  { %v7134_v10 = vpack.c.bf16 %v7121_v42, %v7120_v59 }
 0xf25   :  { %9446 = vmatmul.mubr.msk.bf16.vlgmr.msra.gmra.mrb[76].mxu0 %vm2702_vm3, %v7134_v10  ;;  %9452 = vmatmul.mubr.msk.bf16.vlgmr.msra.gmra.mrb[80].mxu1 %vm2702_vm3, %v7135_v27 }
 0xf26   :  { %9457 = vmatprep.mubr.msk.bf16.mxu0 %vm9967_vm1, %v12824_v61  ;;  %9463 = vmatprep.mubr.msk.bf16.mxu1 %vm9967_vm1, %v12824_v61 }
 0xf4f   :  { %v7081_v7 = vpop.xlane.xlu1 %7080 }
 0xf50   :  { %v12418_v48 = vpop.xlane.xlu0 %7089  ;;  %9898 = vrcp.f32 %v7081_v7 }
 0xf51   :  { %9900 = vrcp.f32 %v7078_v5 }
 0xf53   :  { %v6023_v20 = vpop.permute.xlu1 %6022 }
 0xf54   :  { %v6248_v36 = vcombine.low %v12317_v13, %v6023_v20  ;;  %v6249_v19 = vcombine.high %v12317_v13, %v6023_v20  ;;  %v7096_v55 = vpop.xlane.xlu0 %7095 }
 0xf56   :  { %v6256_v22 = vrot.slane %v6248_v36, %v10312_v50  ;;  %v6263_v26 = vrot.slane %v6249_v19, %v10312_v50 }
 0xf58   :  { %v6264_v46 = vcombine.low %v6240_v16, %v6256_v22  ;;  %v6265_v3 = vcombine.high %v6240_v16, %v6256_v22  ;;  %v6280_v9 = vcombine.low %v6247_v11, %v6263_v26  ;;  %v6281_v28 = vcombine.high %v6247_v11, %v6263_v26  ;;  %v7099_v1 = vpop.xlane.xlu0 %7098 }
 0xf59   :  { %9902 = vrcp.f32 %v7099_v1 }
 0xf5a   :  { %v6272_v29 = vrot.slane %v6264_v46, %v10317_v57  ;;  %v6279_v33 = vrot.slane %v6265_v3, %v10317_v57  ;;  %v6288_v13 = vrot.slane %v6280_v9, %v10317_v57  ;;  %v6295_v8 = vrot.slane %v6281_v28, %v10317_v57  ;;  %v9899_v27 = vpop.eup %9898 }
 0xf5b   :  { %9904 = vrcp.f32 %v7096_v55  ;;  %v9901_v53 = vpop.eup %9900  ;;  %v7125_v16 = vmul.f32 %v9899_v27, %v12333_v45 }
 0xf5c   :  { %v6504_v23 = vcombine.low %v6272_v29, %v6279_v33  ;;  %v8937_v6 = vcombine.high %v6272_v29, %v6279_v33  ;;  %v6520_v14 = vcombine.low %v6288_v13, %v6295_v8  ;;  %v8938_v21 = vcombine.high %v6288_v13, %v6295_v8 }
 0xf5d   :  { %v7124_v3 = vmul.f32 %v9901_v53, %v12313_v15  ;;  %9906 = vrcp.f32 %v12418_v48 }
 0xf5e   :  { %v6511_v30 = vrot.slane %v6504_v23, %v10312_v50  ;;  %v6519_v38 = vrot.slane %v8937_v6, %v10312_v50  ;;  %v6527_v31 = vrot.slane %v6520_v14, %v10312_v50  ;;  %v6535_v56 = vrot.slane %v8938_v21, %v10312_v50 }
 0xf5f   :  { %v7136_v45 = vpack.c.bf16 %v7125_v16, %v7124_v3 }
 0xf60   :  { %v6536_v40 = vcombine.low %v6511_v30, %v6519_v38  ;;  %v6537_v2 = vcombine.high %v6511_v30, %v6519_v38  ;;  %v6552_v32 = vcombine.low %v6527_v31, %v6535_v56  ;;  %v6553_v59 = vcombine.high %v6527_v31, %v6535_v56 }
 0xf62   :  { %v6544_v42 = vrot.slane %v6536_v40, %v10317_v57  ;;  %v6551_v10 = vrot.slane %v6537_v2, %v10317_v57  ;;  %v6560_v5 = vrot.slane %v6552_v32, %v10317_v57  ;;  %v6567_v7 = vrot.slane %v6553_v59, %v10317_v57 }
 0xf64   :  { %v6568_v4 = vcombine.low %v6544_v42, %v6560_v5  ;;  %v6569_v20 = vcombine.high %v6544_v42, %v6560_v5  ;;  %v6570_v36 = vcombine.low %v6551_v10, %v6567_v7  ;;  %v6571_v19 = vcombine.high %v6551_v10, %v6567_v7 }
 0xf66   :  { %v6576_v11 = vpack.c.bf16 %v6568_v4, %v6500_v60  ;;  %v6577_v22 = vpack.c.bf16 %v6569_v20, %v6501_v12  ;;  %v6578_v26 = vpack.c.bf16 %v6570_v36, %v6502_v52  ;;  %v6579_v46 = vpack.c.bf16 %v6571_v19, %v6503_v17  ;;  %v9903_v60 = vpop.eup %9902 }
 0xf67   :  { %v9905_v25 = vpop.eup %9904  ;;  %v7131_v15 = vmul.f32 %v9903_v60, %v12361_v49 }
 0xf68   :  { %9456 = vmatpush3.bf16.msra.mxu0 %v6576_v11  ;;  %9462 = vmatpush3.bf16.msra.mxu1 %v6577_v22  ;;  %v7130_v58 = vmul.f32 %v9905_v25, %v12345_v24  ;;  %v9907_v12 = vpop.eup %9906 }
 0xf69   :  { %9467 = vmatprep.subr.bf16.mxu0 %v12824_v61  ;;  %9473 = vmatprep.subr.bf16.mxu1 %v12824_v61  ;;  %v7128_v49 = vmul.f32 %v9907_v12, %v12337_v0 }
 0xf6a   :  { %v7139_v63 = vpack.c.bf16 %v7131_v15, %v7130_v58 }
 0xf6b   :  { %9458 = vmatmul.mubr.msk.bf16.vlgmr.msra.gmra.mrb[80].mxu0 %vm2702_vm3, %v7136_v45  ;;  %9464 = vmatmul.mubr.msk.bf16.vlgmr.msra.gmra.mrb[84].mxu1 %vm2702_vm3, %v7137_v39 }
 0xf6c   :  { %9468 = vmatpush3.bf16.msra.mxu0 %v6578_v26  ;;  %9474 = vmatpush3.bf16.msra.mxu1 %v6579_v46 }
 0xf6d   :  { %9475 = vmatprep.mubr.msk.bf16.mxu1 %vm9967_vm1, %v12824_v61  ;;  %9469 = vmatprep.mubr.msk.bf16.mxu0 %vm9967_vm1, %v12824_v61 }
 0xf73   :  { %9476 = vmatmul.mubr.msk.bf16.vlgmr.msra.gmra.mrb[88].mxu1 %vm2702_vm3, %v7139_v63 }
 0xf74   :  { %8427 = vmatprep.mubr.bf16.mxu1 %v12838_v54 }
 0xf84   :  { %v7093_v35 = vpop.xlane.xlu1 %7092 }
 0xf85   :  { %9908 = vrcp.f32 %v7093_v35 }
 0xf8f   :  { %v9909_v52 = vpop.eup %9908 }
 0xf90   :  { %v7129_v17 = vmul.f32 %v9909_v52, %v12378_v37 }
 0xf92   :  { %v7138_v34 = vpack.c.bf16 %v7129_v17, %v7128_v49 }
 0xf94   :  { %9470 = vmatmul.mubr.msk.bf16.vlgmr.msra.gmra.mrb[84].mxu0 %vm2702_vm3, %v7138_v34 }
 0xfce   :  { %v7177_v61 = vpop.f32.mrb[72].mxu0 }
 0xfcf   :  { %v9435_v24 = vpop.f32.mrb[73].mxu0 }
 0xfd0   :  { %v7180_v62 = vpop.f32.mrb[74].mxu0 }
 0xfd1   :  { %v9436_v39 = vpop.f32.mrb[75].mxu0 }
 0xff0   :  { %v7221_v9 = vpop.f32.mrb[76].mxu1 }
 0xff1   :  { %v9441_v28 = vpop.f32.mrb[77].mxu1 }
 0xff2   :  { %v7224_v55 = vpop.f32.mrb[78].mxu1 }
 0xff3   :  { %v9442_v29 = vpop.f32.mrb[79].mxu1 }
 0xff8   :  { %v7265_v48 = vpop.f32.mrb[76].mxu0  ;;  %v7309_v33 = vpop.f32.mrb[80].mxu1 }
 0xff9   :  { %v7492_v13 = vcombine.low %v7177_v61, %v7265_v48  ;;  %v7493_v8 = vcombine.high %v7177_v61, %v7265_v48  ;;  %v7508_v23 = vcombine.low %v7221_v9, %v7309_v33  ;;  %v7509_v6 = vcombine.high %v7221_v9, %v7309_v33  ;;  %v9447_v0 = vpop.f32.mrb[77].mxu0  ;;  %v9453_v14 = vpop.f32.mrb[81].mxu1 }
 0xffa   :  { %v7268_v37 = vpop.f32.mrb[78].mxu0  ;;  %v7312_v21 = vpop.f32.mrb[82].mxu1 }
 0xffb   :  { %v7500_v30 = vrot.slane %v7492_v13, %v10312_v50  ;;  %v7507_v38 = vrot.slane %v7493_v8, %v10312_v50  ;;  %v7516_v31 = vrot.slane %v7508_v23, %v10312_v50  ;;  %v7523_v1 = vrot.slane %v7509_v6, %v10312_v50  ;;  %v9448_v56 = vpop.f32.mrb[79].mxu0  ;;  %v9454_v40 = vpop.f32.mrb[83].mxu1 }
 0xffc   :  { %v7560_v2 = vcombine.low %v7180_v62, %v7268_v37  ;;  %v7561_v32 = vcombine.high %v7180_v62, %v7268_v37  ;;  %v7576_v59 = vcombine.low %v7224_v55, %v7312_v21  ;;  %v7577_v42 = vcombine.high %v7224_v55, %v7312_v21 }
 0xffd   :  { %v7524_v10 = vcombine.low %v7500_v30, %v7516_v31  ;;  %v7525_v27 = vcombine.high %v7500_v30, %v7516_v31  ;;  %v7540_v5 = vcombine.low %v7507_v38, %v7523_v1  ;;  %v7541_v7 = vcombine.high %v7507_v38, %v7523_v1 }
 0xffe   :  { %v7568_v53 = vrot.slane %v7560_v2, %v10312_v50  ;;  %v7575_v4 = vrot.slane %v7561_v32, %v10312_v50  ;;  %v7584_v20 = vrot.slane %v7576_v59, %v10312_v50  ;;  %v7591_v36 = vrot.slane %v7577_v42, %v10312_v50 }
 0xfff   :  { %v7532_v19 = vrot.slane %v7524_v10, %v10317_v57  ;;  %v7539_v16 = vrot.slane %v7525_v27, %v10317_v57  ;;  %v7548_v11 = vrot.slane %v7540_v5, %v10317_v57  ;;  %v7555_v22 = vrot.slane %v7541_v7, %v10317_v57 }
0x1000   :  { %v7592_v26 = vcombine.low %v7568_v53, %v7584_v20  ;;  %v7593_v46 = vcombine.high %v7568_v53, %v7584_v20  ;;  %v7608_v3 = vcombine.low %v7575_v4, %v7591_v36  ;;  %v7609_v45 = vcombine.high %v7575_v4, %v7591_v36  ;;  %v9694_v4 = vld [vmem:[%s12810_s5 + $0x40] sm:$0xff]   ;;  %v9695_v20 = vld [vmem:[%s12810_s5 + $0x48] sm:$0xff]  }
0x1001   :  { %v7764_v60 = vcombine.low %v7532_v19, %v7539_v16  ;;  %v8955_v25 = vcombine.high %v7532_v19, %v7539_v16  ;;  %v7780_v15 = vcombine.low %v7548_v11, %v7555_v22  ;;  %v8956_v58 = vcombine.high %v7548_v11, %v7555_v22  ;;  %9479 = vmatprep.subr.bf16.mxu0 %v9694_v4  ;;  %v9696_v11 = vld [vmem:[%s12810_s5 + $0x50] sm:$0xff]   ;;  %v9697_v22 = vld [vmem:[%s12810_s5 + $0x58] sm:$0xff]  }
0x1002   :  { %v7600_v63 = vrot.slane %v7592_v26, %v10317_v57  ;;  %v7607_v35 = vrot.slane %v7593_v46, %v10317_v57  ;;  %v7616_v12 = vrot.slane %v7608_v3, %v10317_v57  ;;  %v7623_v52 = vrot.slane %v7609_v45, %v10317_v57  ;;  %9480 = vmatpush3.bf16.msra.mxu0 %v9694_v4  ;;  %v9698_v26 = vld [vmem:[%s12810_s5 + $0x60] sm:$0xff]  }
0x1003   :  { %v7771_v49 = vrot.slane %v7764_v60, %v10312_v50  ;;  %v7779_v17 = vrot.slane %v8955_v25, %v10312_v50  ;;  %v7787_v34 = vrot.slane %v7780_v15, %v10312_v50  ;;  %v7795_v61 = vrot.slane %v8956_v58, %v10312_v50  ;;  %9481 = vmatprep.subr.bf16.mxu0 %v9695_v20 }
0x1004   :  { %v7832_v24 = vcombine.low %v7600_v63, %v7607_v35  ;;  %v8957_v62 = vcombine.high %v7600_v63, %v7607_v35  ;;  %v7848_v39 = vcombine.low %v7616_v12, %v7623_v52  ;;  %v8958_v9 = vcombine.high %v7616_v12, %v7623_v52 }
0x1005   :  { %v7797_v28 = vcombine.high %v7771_v49, %v7779_v17  ;;  %v7813_v55 = vcombine.high %v7787_v34, %v7795_v61  ;;  %v7796_v29 = vcombine.low %v7771_v49, %v7779_v17  ;;  %v7812_v48 = vcombine.low %v7787_v34, %v7795_v61 }
0x1006   :  { %v7839_v33 = vrot.slane %v7832_v24, %v10312_v50  ;;  %v7847_v13 = vrot.slane %v8957_v62, %v10312_v50  ;;  %v7855_v8 = vrot.slane %v7848_v39, %v10312_v50  ;;  %v7863_v23 = vrot.slane %v8958_v9, %v10312_v50  ;;  %9482 = vmatpush3.bf16.msra.mxu0 %v9695_v20 }
0x1007   :  { %v7811_v6 = vrot.slane %v7797_v28, %v10317_v57  ;;  %v7827_v0 = vrot.slane %v7813_v55, %v10317_v57  ;;  %v12498_v14 = vrot.slane %v7796_v29, %v10317_v57  ;;  %v12501_v37 = vrot.slane %v7812_v48, %v10317_v57  ;;  %9483 = vmatprep.subr.bf16.mxu0 %v9696_v11 }
0x1008   :  { %v7865_v21 = vcombine.high %v7839_v33, %v7847_v13  ;;  %v7881_v30 = vcombine.high %v7855_v8, %v7863_v23  ;;  %v7864_v38 = vcombine.low %v7839_v33, %v7847_v13  ;;  %v7880_v31 = vcombine.low %v7855_v8, %v7863_v23 }
0x1009   :  { %v7830_v1 = vcombine.low %v7811_v6, %v7827_v0  ;;  %v7829_v56 = vcombine.high %v12498_v14, %v12501_v37  ;;  %v7831_v40 = vcombine.high %v7811_v6, %v7827_v0  ;;  %v7828_v2 = vcombine.low %v12498_v14, %v12501_v37 }
0x100a   :  { %v7879_v32 = vrot.slane %v7865_v21, %v10317_v57  ;;  %v7895_v59 = vrot.slane %v7881_v30, %v10317_v57  ;;  %v12510_v42 = vrot.slane %v7864_v38, %v10317_v57  ;;  %v12513_v10 = vrot.slane %v7880_v31, %v10317_v57  ;;  %9484 = vmatpush3.bf16.msra.mxu0 %v9696_v11 }
0x100b   :  { %9485 = vmatprep.subr.bf16.mxu0 %v9697_v22 }
0x100c   :  { %v7898_v27 = vcombine.low %v7879_v32, %v7895_v59  ;;  %v7897_v5 = vcombine.high %v12510_v42, %v12513_v10  ;;  %v7899_v7 = vcombine.high %v7879_v32, %v7895_v59  ;;  %v7896_v53 = vcombine.low %v12510_v42, %v12513_v10 }
0x100e   :  { %v9545_v36 = vpack.i.bf16 %v7898_v27, %v7830_v1  ;;  %v9540_v19 = vpack.i.bf16 %v7897_v5, %v7829_v56  ;;  %v9550_v16 = vpack.i.bf16 %v7899_v7, %v7831_v40  ;;  %9486 = vmatpush3.bf16.msra.mxu0 %v9697_v22 }
0x100f   :  { %9487 = vmatprep.subr.bf16.mxu0 %v9698_v26 }
0x1010   :  { %9546 = vrot.lane.b32.xlu1 %v9545_v36, %s9964_s28  ;;  %9541 = vrot.lane.b32.xlu0 %v9540_v19, %s9965_s2 }
0x1012   :  { %9488 = vmatpush3.bf16.msra.mxu0 %v9698_v26 }
0x1014   :  { %9551 = vrot.lane.b32.xlu0 %v9550_v16, %s9963_s0 }
0x103e   :  { %v7353_v46 = vpop.f32.mrb[80].mxu0  ;;  %v7397_v3 = vpop.f32.mrb[84].mxu1 }
0x103f   :  { %v9459_v45 = vpop.f32.mrb[81].mxu0  ;;  %v9465_v60 = vpop.f32.mrb[85].mxu1 }
0x1040   :  { %v7356_v25 = vpop.f32.mrb[82].mxu0  ;;  %v7400_v15 = vpop.f32.mrb[86].mxu1 }
0x1041   :  { %v9460_v58 = vpop.f32.mrb[83].mxu0  ;;  %v9466_v63 = vpop.f32.mrb[87].mxu1 }
0x1046   :  { %v7485_v35 = vpop.f32.mrb[88].mxu1 }
0x1047   :  { %v7644_v12 = vcombine.low %v7397_v3, %v7485_v35  ;;  %v7645_v52 = vcombine.high %v7397_v3, %v7485_v35  ;;  %v9477_v49 = vpop.f32.mrb[89].mxu1 }
0x1048   :  { %v7488_v17 = vpop.f32.mrb[90].mxu1 }
0x1049   :  { %v7712_v34 = vcombine.low %v7400_v15, %v7488_v17  ;;  %v7713_v61 = vcombine.high %v7400_v15, %v7488_v17  ;;  %v9478_v24 = vpop.f32.mrb[91].mxu1  ;;  %v7652_v55 = vrot.slane %v7644_v12, %v10312_v50  ;;  %v7659_v29 = vrot.slane %v7645_v52, %v10312_v50 }
0x104a   :  { %v9699_v24 = vld [vmem:[%s12810_s5 + $0x68] sm:$0xff]  }
0x104b   :  { %v7720_v31 = vrot.slane %v7712_v34, %v10312_v50  ;;  %v7727_v1 = vrot.slane %v7713_v61, %v10312_v50  ;;  %9489 = vmatprep.subr.bf16.mxu0 %v9699_v24 }
0x104c   :  { %9490 = vmatpush3.bf16.msra.mxu0 %v9699_v24 }
0x1067   :  { %v7441_v62 = vpop.f32.mrb[84].mxu0 }
0x1068   :  { %v7628_v39 = vcombine.low %v7353_v46, %v7441_v62  ;;  %v7629_v9 = vcombine.high %v7353_v46, %v7441_v62  ;;  %v9471_v28 = vpop.f32.mrb[85].mxu0 }
0x1069   :  { %v7444_v48 = vpop.f32.mrb[86].mxu0 }
0x106a   :  { %v7636_v33 = vrot.slane %v7628_v39, %v10312_v50  ;;  %v7643_v13 = vrot.slane %v7629_v9, %v10312_v50  ;;  %v7696_v8 = vcombine.low %v7356_v25, %v7444_v48  ;;  %v7697_v23 = vcombine.high %v7356_v25, %v7444_v48  ;;  %v9472_v6 = vpop.f32.mrb[87].mxu0 }
0x106c   :  { %v7660_v0 = vcombine.low %v7636_v33, %v7652_v55  ;;  %v7661_v21 = vcombine.high %v7636_v33, %v7652_v55  ;;  %v7676_v30 = vcombine.low %v7643_v13, %v7659_v29  ;;  %v7677_v38 = vcombine.high %v7643_v13, %v7659_v29 }
0x106d   :  { %v7704_v56 = vrot.slane %v7696_v8, %v10312_v50  ;;  %v7711_v40 = vrot.slane %v7697_v23, %v10312_v50 }
0x106e   :  { %v7668_v32 = vrot.slane %v7660_v0, %v10317_v57  ;;  %v7675_v59 = vrot.slane %v7661_v21, %v10317_v57  ;;  %v7684_v27 = vrot.slane %v7676_v30, %v10317_v57  ;;  %v7691_v5 = vrot.slane %v7677_v38, %v10317_v57 }
0x106f   :  { %v7728_v7 = vcombine.low %v7704_v56, %v7720_v31  ;;  %v7729_v4 = vcombine.high %v7704_v56, %v7720_v31  ;;  %v7744_v20 = vcombine.low %v7711_v40, %v7727_v1  ;;  %v7745_v36 = vcombine.high %v7711_v40, %v7727_v1 }
0x1070   :  { %v7900_v19 = vcombine.low %v7668_v32, %v7675_v59  ;;  %v8959_v16 = vcombine.high %v7668_v32, %v7675_v59  ;;  %v7916_v11 = vcombine.low %v7684_v27, %v7691_v5  ;;  %v8960_v22 = vcombine.high %v7684_v27, %v7691_v5 }
0x1071   :  { %v7736_v26 = vrot.slane %v7728_v7, %v10317_v57  ;;  %v7743_v46 = vrot.slane %v7729_v4, %v10317_v57  ;;  %v7752_v3 = vrot.slane %v7744_v20, %v10317_v57  ;;  %v7759_v45 = vrot.slane %v7745_v36, %v10317_v57  ;;  %v9701_v36 = vld [vmem:[%s12810_s5 + $0x78] sm:$0xff]  }
0x1072   :  { %v7907_v60 = vrot.slane %v7900_v19, %v10312_v50  ;;  %v7915_v25 = vrot.slane %v8959_v16, %v10312_v50  ;;  %v7923_v15 = vrot.slane %v7916_v11, %v10312_v50  ;;  %v7931_v58 = vrot.slane %v8960_v22, %v10312_v50 }
0x1073   :  { %v7968_v63 = vcombine.low %v7736_v26, %v7743_v46  ;;  %v8961_v35 = vcombine.high %v7736_v26, %v7743_v46  ;;  %v7984_v12 = vcombine.low %v7752_v3, %v7759_v45  ;;  %v8962_v52 = vcombine.high %v7752_v3, %v7759_v45 }
0x1074   :  { %v7932_v49 = vcombine.low %v7907_v60, %v7915_v25  ;;  %v7948_v17 = vcombine.low %v7923_v15, %v7931_v58  ;;  %v7933_v34 = vcombine.high %v7907_v60, %v7915_v25  ;;  %v7949_v61 = vcombine.high %v7923_v15, %v7931_v58 }
0x1075   :  { %v7975_v62 = vrot.slane %v7968_v63, %v10312_v50  ;;  %v7983_v39 = vrot.slane %v8961_v35, %v10312_v50  ;;  %v7991_v9 = vrot.slane %v7984_v12, %v10312_v50  ;;  %v7999_v28 = vrot.slane %v8962_v52, %v10312_v50  ;;  %v9700_v50 = vld [vmem:[%s12810_s5 + $0x70] sm:$0xff]  }
0x1076   :  { %v7940_v55 = vrot.slane %v7932_v49, %v10317_v57  ;;  %v7956_v29 = vrot.slane %v7948_v17, %v10317_v57  ;;  %v7947_v48 = vrot.slane %v7933_v34, %v10317_v57  ;;  %v7963_v33 = vrot.slane %v7949_v61, %v10317_v57  ;;  %9491 = vmatprep.subr.bf16.mxu0 %v9700_v50 }
0x1077   :  { %v8000_v13 = vcombine.low %v7975_v62, %v7983_v39  ;;  %v8016_v8 = vcombine.low %v7991_v9, %v7999_v28  ;;  %v8001_v23 = vcombine.high %v7975_v62, %v7983_v39  ;;  %v8017_v6 = vcombine.high %v7991_v9, %v7999_v28  ;;  %9492 = vmatpush3.bf16.msra.mxu0 %v9700_v50 }
0x1078   :  { %v7965_v0 = vcombine.high %v7940_v55, %v7956_v29  ;;  %v7966_v21 = vcombine.low %v7947_v48, %v7963_v33  ;;  %v7967_v30 = vcombine.high %v7947_v48, %v7963_v33  ;;  %v7964_v38 = vcombine.low %v7940_v55, %v7956_v29  ;;  %9493 = vmatprep.subr.bf16.mxu0 %v9701_v36  ;;  %v12602_v55 = vld [vmem:[%s12808_s3 + $0x18] sm:$0xff] }
0x1079   :  { %v8008_v31 = vrot.slane %v8000_v13, %v10317_v57  ;;  %v8024_v1 = vrot.slane %v8016_v8, %v10317_v57  ;;  %v8015_v56 = vrot.slane %v8001_v23, %v10317_v57  ;;  %v8031_v40 = vrot.slane %v8017_v6, %v10317_v57 }
0x107a   :  { %v12847_v29 = vsub.s32 3, %v10170_v18 }
0x107b   :  { %v8033_v32 = vcombine.high %v8008_v31, %v8024_v1  ;;  %v8034_v59 = vcombine.low %v8015_v56, %v8031_v40  ;;  %v8035_v27 = vcombine.high %v8015_v56, %v8031_v40  ;;  %v8032_v5 = vcombine.low %v8008_v31, %v8024_v1  ;;  %9494 = vmatpush3.bf16.msra.mxu0 %v9701_v36  ;;  %v9702_v40 = vld [vmem:[%s12811_s6 + $0x80] ss:$8 sps:$4 sm:$0xff]   ;;  %v9716_v36 = vld [vmem:[%s12811_s6 + $0xc4] ss:$8 sps:$4 sm:$0xff]  }
0x107c   :  { %v8118_v48 = vrot.slane %v12602_v55, %v12847_v29 }
0x107d   :  { %v9555_v7 = vpack.i.bf16 %v8033_v32, %v7965_v0  ;;  %v9560_v4 = vpack.i.bf16 %v8034_v59, %v7966_v21  ;;  %v9565_v20 = vpack.i.bf16 %v8035_v27, %v7967_v30  ;;  %v9704_v32 = vld [vmem:[%s12811_s6 + $0x84] ss:$8 sps:$4 sm:$0xff]   ;;  %v9707_v59 = vld [vmem:[%s12811_s6 + $0x94] ss:$8 sps:$4 sm:$0xff]   ;;  %v9708_v27 = vld [vmem:[%s12811_s6 + $0xa0] ss:$8 sps:$4 sm:$0xff]  }
0x107e   :  { %8395 = vmatprep.subr.bf16.mxu1 %v9704_v32 }
0x107f   :  { %9556 = vrot.lane.b32.xlu1 %v9555_v7, %s9965_s2  ;;  %8396 = vmatpush1.bf16.msra.mxu1 %v9702_v40  ;;  %v9713_v7 = vld [vmem:[%s12811_s6 + $0xb4] ss:$8 sps:$4 sm:$0xff]  }
0x1080   :  { %8397 = vmatprep.subr.bf16.mxu1 %v9707_v59 }
0x1082   :  { %v9547_v57 = vpop.permute.xlu1 %9546  ;;  %v9542_v19 = vpop.permute.xlu0 %9541 }
0x1083   :  { %9561 = vrot.lane.b32.xlu1 %v9560_v4, %s9964_s28  ;;  %v9544_v16 = vunpack.i.h.bf16 %v9542_v19  ;;  %v9543_v11 = vunpack.i.l.bf16 %v9542_v19  ;;  %v9549_v22 = vunpack.i.h.bf16 %v9547_v57  ;;  %v9548_v26 = vunpack.i.l.bf16 %v9547_v57  ;;  %v9711_v4 = vld [vmem:[%s12811_s6 + $0xb0] ss:$8 sps:$4 sm:$0xff]   ;;  %v9719_v57 = vld [vmem:[%s12811_s6 + $0xd4] ss:$8 sps:$4 sm:$0xff]  }
0x1084   :  { %v9717_v19 = vld [vmem:[%s12811_s6 + $0xd0] ss:$8 sps:$4 sm:$0xff]  }
0x1085   :  { %v8085_v46 = vsel %vm2325_vm2, %v7896_v53, %v9544_v16  ;;  %v8084_v3 = vsel %vm2325_vm2, %v7828_v2, %v9543_v11  ;;  %v9722_v16 = vld [vmem:[%s12811_s6 + $0xe4] ss:$8 sps:$4 sm:$0xff]   ;;  %v9720_v11 = vld [vmem:[%s12811_s6 + $0xe0] ss:$8 sps:$4 sm:$0xff]  }
0x1086   :  { %v9552_v45 = vpop.permute.xlu0 %9551  ;;  %v8088_v15 = vsel %vm139_vm0, %v8084_v3, %v9548_v26  ;;  %v8089_v58 = vsel %vm139_vm0, %v8085_v46, %v9549_v22  ;;  %v9725_v22 = vld [vmem:[%s12811_s6 + $0xf4] ss:$8 sps:$4 sm:$0xff]   ;;  %v9723_v26 = vld [vmem:[%s12811_s6 + $0xf0] ss:$8 sps:$4 sm:$0xff]  }
0x1087   :  { %9566 = vrot.lane.b32.xlu1 %v9565_v20, %s9963_s0  ;;  %v9554_v60 = vunpack.i.h.bf16 %v9552_v45  ;;  %v9553_v25 = vunpack.i.l.bf16 %v9552_v45  ;;  %v9714_v20 = vld [vmem:[%s12811_s6 + $0xc0] ss:$8 sps:$4 sm:$0xff]  }
0x1089   :  { %v8092_v63 = vsel %vm3839_vm4, %v8088_v15, %v9553_v25  ;;  %v8093_v42 = vsel %vm3839_vm4, %v8089_v58, %v9554_v60 }
0x108a   :  { %v8096_v10 = vpack.c.bf16 %v8093_v42, %v8092_v63 }
0x108c   :  { %9495 = vmatprep.mubr.bf16.mxu0 %v8096_v10 }
0x10f1   :  { %v9557_v53 = vpop.permute.xlu1 %9556 }
0x10f2   :  { %v9559_v14 = vunpack.i.h.bf16 %v9557_v53  ;;  %v9558_v37 = vunpack.i.l.bf16 %v9557_v53 }
0x10f4   :  { %v8086_v49 = vsel %vm2325_vm2, %v7964_v38, %v9558_v37  ;;  %v8087_v17 = vsel %vm2325_vm2, %v8032_v5, %v9559_v14  ;;  %v9710_v5 = vld [vmem:[%s12811_s6 + $0xa4] ss:$8 sps:$4 sm:$0xff]  }
0x10f5   :  { %v9562_v35 = vpop.permute.xlu1 %9561 }
0x10f6   :  { %v9564_v2 = vunpack.i.h.bf16 %v9562_v35  ;;  %v9563_v12 = vunpack.i.l.bf16 %v9562_v35 }
0x10f8   :  { %v8090_v24 = vsel %vm139_vm0, %v8086_v49, %v9563_v12  ;;  %v8091_v62 = vsel %vm139_vm0, %v8087_v17, %v9564_v2 }
0x10f9   :  { %v9567_v52 = vpop.permute.xlu1 %9566 }
0x10fa   :  { %v9569_v34 = vunpack.i.h.bf16 %v9567_v52  ;;  %v9568_v61 = vunpack.i.l.bf16 %v9567_v52 }
0x10fc   :  { %v8094_v39 = vsel %vm3839_vm4, %v8090_v24, %v9568_v61  ;;  %v8095_v9 = vsel %vm3839_vm4, %v8091_v62, %v9569_v34 }
0x10fd   :  { %v8097_v28 = vpack.c.bf16 %v8095_v9, %v8094_v39 }
0x10ff   :  { %9496 = vmatmul.mubr.bf16.vlgmr.msra.gmra.mrb[88].mxu0 %v8097_v28 }
0x11d2   :  { %v9497_v33 = vpop.f32.mrb[88].mxu0 }
0x11d3   :  { %v8201_v13 = vpop.f32.mrb[89].mxu0  ;;  %v8210_v1 = vadd.f32 %v9497_v33, %v8118_v48 }
0x11d4   :  { %v8202_v8 = vadd.f32 %v8201_v13, %v8118_v48  ;;  %v9498_v23 = vpop.f32.mrb[90].mxu0 }
0x11d5   :  { %v8204_v6 = vpop.f32.mrb[91].mxu0  ;;  %v8213_v30 = vadd.f32 %v9498_v23, %v8118_v48  ;;  %v12626_v56 = vadd.f32 %v8210_v1, %v11476_v43  ;;  %v9705_v43 = vld [vmem:[%s12811_s6 + $0x90] ss:$8 sps:$4 sm:$0xff]   ;;  %v12848_v23 = vsub.s32 4, %v10170_v18 }
0x11d6   :  { %v12608_v0 = vadd.f32 %v8202_v8, %v11464_v51  ;;  %v8205_v21 = vadd.f32 %v8204_v6, %v8118_v48  ;;  %8398 = vmatpush1.bf16.msra.mxu1 %v9705_v43 }
0x11d7   :  { %v12618_v31 = vadd.f32 %v8213_v30, %v11479_v47  ;;  %v8234_v47 = vmul.f32 %v12626_v56, %v12626_v56  ;;  %8399 = vmatprep.subr.bf16.mxu1 %v9710_v5  ;;  %v8275_v6 = vrot.slane %v12602_v55, %v12848_v23 }
0x11d8   :  { %v12611_v38 = vadd.f32 %v8205_v21, %v11467_v41  ;;  %8220 = vadd.xlane.f32.xlu0 %v12608_v0  ;;  %v8232_v50 = vmul.f32 %v12608_v0, %v12608_v0 }
0x11d9   :  { %v8235_v41 = vmul.f32 %v12618_v31, %v12618_v31 }
0x11da   :  { %8222 = vadd.xlane.f32.xlu1 %v12611_v38  ;;  %v8233_v51 = vmul.f32 %v12611_v38, %v12611_v38  ;;  %8400 = vmatpush1.bf16.msra.mxu1 %v9708_v27 }
0x11db   :  { %8401 = vmatprep.subr.bf16.mxu1 %v9713_v7 }
0x11dc   :  { %8236 = vadd.xlane.f32.xlu0 %v8232_v50 }
0x11de   :  { %8226 = vadd.xlane.f32.xlu1 %v12618_v31  ;;  %8402 = vmatpush1.bf16.msra.mxu1 %v9711_v4 }
0x11df   :  { %8403 = vmatprep.subr.bf16.mxu1 %v9716_v36 }
0x11e0   :  { %8238 = vadd.xlane.f32.xlu0 %v8233_v51  ;;  %v12849_v51 = vsub.s32 5, %v10170_v18 }
0x11e2   :  { %8242 = vadd.xlane.f32.xlu1 %v8235_v41  ;;  %8404 = vmatpush1.bf16.msra.mxu1 %v9714_v20  ;;  %v8283_v41 = vrot.slane %v12602_v55, %v12849_v51 }
0x11e3   :  { %8405 = vmatprep.subr.bf16.mxu1 %v9719_v57 }
0x11e4   :  { %8224 = vadd.xlane.f32.xlu0 %v12626_v56 }
0x11e6   :  { %8406 = vmatpush1.bf16.msra.mxu1 %v9717_v19 }
0x11e7   :  { %8407 = vmatprep.subr.bf16.mxu1 %v9722_v16 }
0x11e8   :  { %8240 = vadd.xlane.f32.xlu0 %v8234_v47 }
0x11ea   :  { %8408 = vmatpush1.bf16.msra.mxu1 %v9720_v11 }
0x11eb   :  { %8409 = vmatprep.subr.bf16.mxu1 %v9725_v22  ;;  %v9726_v22 = vld [vmem:[%s12812_s7 + $0xc0] sm:$0xff]  }
0x11ec   :  { %9199 = vmatprep.subr.bf16.mxu0 %v9726_v22 }
0x11ee   :  { %8410 = vmatpush1.bf16.msra.mxu1 %v9723_v26  ;;  %v9727_v26 = vld [vmem:[%s12812_s7 + $0x80] sm:$0xff]  }
0x11ef   :  { %9200 = vmatpush3.bf16.msra.mxu0 %v9727_v26 }
0x1265   :  { %v8221_v46 = vpop.xlane.xlu0 %8220 }
0x1266   :  { %v8228_v3 = vmul.f32 0.0078125, %v8221_v46  ;;  %v9728_v46 = vld [vmem:[%s12812_s7 + $0xc8] sm:$0xff]  }
0x1267   :  { %v8223_v45 = vpop.xlane.xlu1 %8222  ;;  %9201 = vmatprep.subr.bf16.mxu0 %v9728_v46 }
0x1268   :  { %v8248_v25 = vmul.f32 %v8228_v3, %v8228_v3  ;;  %v8229_v15 = vmul.f32 0.0078125, %v8223_v45  ;;  %v8256_v48 = vsub.f32 %v12608_v0, %v8228_v3  ;;  %v9730_v3 = vld [vmem:[%s12812_s7 + $0xd0] sm:$0xff]  }
0x1269   :  { %v8237_v60 = vpop.xlane.xlu0 %8236  ;;  %v9731_v45 = vld [vmem:[%s12812_s7 + $0x90] sm:$0xff]  }
0x126a   :  { %v8244_v58 = vmul.f32 0.0078125, %v8237_v60  ;;  %v8249_v35 = vmul.f32 %v8229_v15, %v8229_v15  ;;  %v8257_v21 = vsub.f32 %v12611_v38, %v8229_v15  ;;  %v9732_v60 = vld [vmem:[%s12812_s7 + $0xd8] sm:$0xff]   ;;  %v9734_v15 = vld [vmem:[%s12812_s7 + $0xe0] sm:$0xff]  }
0x126b   :  { %v8227_v63 = vpop.xlane.xlu1 %8226 }
0x126c   :  { %v8252_v42 = vsub.f32 %v8244_v58, %v8248_v25  ;;  %v8231_v10 = vmul.f32 0.0078125, %v8227_v63  ;;  %v9733_v25 = vld [vmem:[%s12812_s7 + $0x98] sm:$0xff]   ;;  %v9735_v58 = vld [vmem:[%s12812_s7 + $0xa0] sm:$0xff]   ;;  %v9736_v63 = vld [vmem:[%s12812_s7 + $0xe8] sm:$0xff]  }
0x126d   :  { %v8239_v53 = vpop.xlane.xlu0 %8238 }
0x126e   :  { %v8260_v14 = vadd.f32 1e-06, %v8252_v42  ;;  %v8245_v37 = vmul.f32 0.0078125, %v8239_v53  ;;  %v8251_v12 = vmul.f32 %v8231_v10, %v8231_v10  ;;  %v8259_v40 = vsub.f32 %v12618_v31, %v8231_v10  ;;  %v9737_v42 = vld [vmem:[%s12812_s7 + $0xa8] sm:$0xff]   ;;  %v9738_v10 = vld [vmem:[%s12812_s7 + $0xf0] sm:$0xff]  }
0x126f   :  { %v8243_v2 = vpop.xlane.xlu1 %8242  ;;  %v9739_v53 = vld [vmem:[%s12812_s7 + $0xb0] sm:$0xff]  }
0x1270   :  { %9910 = vrsqrt.f32 %v8260_v14  ;;  %v8253_v52 = vsub.f32 %v8245_v37, %v8249_v35  ;;  %v8247_v49 = vmul.f32 0.0078125, %v8243_v2  ;;  %v9740_v35 = vld [vmem:[%s12812_s7 + $0xf8] sm:$0xff]   ;;  %v8310_v37 = vrot.slane %v12602_v55, %v11403_v44  ;;  %v9937_v2 = vld [vmem:[%s12808_s3 + $0x20] sm:$0xff]  ;;  %s9970_s3 = smov [#allocation2]  }
0x1271   :  { %v8225_v17 = vpop.xlane.xlu0 %8224  ;;  %v9741_v14 = vld [vmem:[%s12812_s7 + $0xb8] sm:$0xff]  }
0x1272   :  { %v8261_v34 = vadd.f32 1e-06, %v8253_v52  ;;  %v8255_v61 = vsub.f32 %v8247_v49, %v8251_v12  ;;  %v8230_v24 = vmul.f32 0.0078125, %v8225_v17  ;;  %v8314_v12 = vrot.slane %v9937_v2, %v11403_v44 }
0x1274   :  { %9912 = vrsqrt.f32 %v8261_v34  ;;  %v8263_v62 = vadd.f32 1e-06, %v8255_v61  ;;  %v8250_v9 = vmul.f32 %v8230_v24, %v8230_v24  ;;  %v8258_v5 = vsub.f32 %v12626_v56, %v8230_v24 }
0x1275   :  { %v8241_v39 = vpop.xlane.xlu0 %8240 }
0x1276   :  { %9914 = vrsqrt.f32 %v8263_v62  ;;  %v8246_v28 = vmul.f32 0.0078125, %v8241_v39 }
0x1278   :  { %v8254_v29 = vsub.f32 %v8246_v28, %v8250_v9 }
0x127a   :  { %v9911_v33 = vpop.eup %9910  ;;  %v8262_v13 = vadd.f32 1e-06, %v8254_v29 }
0x127b   :  { %v8268_v8 = vmul.f32 %v9911_v33, %v8256_v48 }
0x127c   :  { %9916 = vrsqrt.f32 %v8262_v13 }
0x127d   :  { %v8276_v1 = vmul.f32 %v8275_v6, %v8268_v8 }
0x127e   :  { %v9913_v30 = vpop.eup %9912 }
0x127f   :  { %v8269_v50 = vmul.f32 %v9913_v30, %v8257_v21  ;;  %v8284_v43 = vadd.f32 %v8283_v41, %v8276_v1 }
0x1280   :  { %v9915_v47 = vpop.eup %9914 }
0x1281   :  { %v8277_v32 = vmul.f32 %v8275_v6, %v8269_v50  ;;  %v8271_v27 = vmul.f32 %v9915_v47, %v8259_v40 }
0x1283   :  { %v8285_v59 = vadd.f32 %v8283_v41, %v8277_v32  ;;  %v8279_v36 = vmul.f32 %v8275_v6, %v8271_v27 }
0x1285   :  { %v8288_v7 = vpack.c.bf16 %v8285_v59, %v8284_v43  ;;  %v8287_v16 = vadd.f32 %v8283_v41, %v8279_v36 }
0x1286   :  { %v9917_v4 = vpop.eup %9916 }
0x1287   :  { %8428 = vmatmul.mubr.bf16.vlgmr.msra.gmra.mrb[92].mxu1 %v8288_v7  ;;  %v8270_v20 = vmul.f32 %v9917_v4, %v8258_v5 }
0x1288   :  { %8437 = vmatprep.mubr.bf16.mxu1 %v12838_v54  ;;  %v9729_v54 = vld [vmem:[%s12812_s7 + $0x88] sm:$0xff]   ;;  %s8719_s7 = sshll.u32 %s9970_s3, 4  ;;  %s8720_s7 = int_to_ptr.vmem [resolvable:$true] %s8719_s7 }
0x1289   :  { %v8278_v57 = vmul.f32 %v8275_v6, %v8270_v20  ;;  %9202 = vmatpush3.bf16.msra.mxu0 %v9729_v54  ;;  %s9938_s15 = scalar_lea.vmem %s8720_s7, 512  ;;  %p9943_p1 = scmp.lt.s32.totalorder %s8720_s7, %s8720_s7 }
0x128a   :  { %9203 = vmatprep.subr.bf16.mxu0 %v9730_v3  ;;  %p9939_p0 = scmp.ne.s32.totalorder %s8720_s7, %s9938_s15  ;;  %p9944_p2 = scmp.lt.s32.totalorder %s9938_s15, %s9938_s15 }
0x128b   :  { %v8286_v19 = vadd.f32 %v8283_v41, %v8278_v57 }
0x128c   :  { %p9945_p3 = por %p9944_p2, %p9943_p1 }
0x128d   :  { %v8289_v11 = vpack.c.bf16 %v8287_v16, %v8286_v19  ;;  %9204 = vmatpush3.bf16.msra.mxu0 %v9731_v45 }
0x128e   :  { %9205 = vmatprep.subr.bf16.mxu0 %v9732_v60  ;;  %p9946_p4 = pnand %p9945_p3, %p9939_p0 }
0x128f   :  { %8438 = vmatmul.mubr.bf16.gmra.mrb[96].mxu1 %v8289_v11 }
0x1291   :  { %9206 = vmatpush3.bf16.msra.mxu0 %v9733_v25 }
0x1292   :  { %9207 = vmatprep.subr.bf16.mxu0 %v9734_v15 }
0x1295   :  { %9208 = vmatpush3.bf16.msra.mxu0 %v9735_v58 }
0x1296   :  { %9209 = vmatprep.subr.bf16.mxu0 %v9736_v63 }
0x1299   :  { %9210 = vmatpush3.bf16.msra.mxu0 %v9737_v42 }
0x129a   :  { %9211 = vmatprep.subr.bf16.mxu0 %v9738_v10 }
0x129d   :  { %9212 = vmatpush3.bf16.msra.mxu0 %v9739_v53 }
0x129e   :  { %9213 = vmatprep.subr.bf16.mxu0 %v9740_v35 }
0x12a1   :  { %9214 = vmatpush3.bf16.msra.mxu0 %v9741_v14 }
0x135a   :  { %v8429_v52 = vpop.f32.mrb[92].mxu1 }
0x135b   :  { %v12744_v49 = vadd.f32 %v8429_v52, %v8310_v37  ;;  %v8431_v17 = vpop.f32.mrb[93].mxu1 }
0x135c   :  { %v12746_v34 = vadd.f32 %v8431_v17, %v8314_v12  ;;  %v8433_v61 = vpop.f32.mrb[94].mxu1 }
0x135d   :  { %v8456_v24 = vmul.f32 0.044715, %v12744_v49  ;;  %v12749_v62 = vadd.f32 %v8433_v61, %v8310_v37  ;;  %v8435_v39 = vpop.f32.mrb[95].mxu1 }
0x135e   :  { %v8457_v9 = vmul.f32 0.044715, %v12746_v34  ;;  %v12752_v28 = vadd.f32 %v8435_v39, %v8314_v12  ;;  %v8448_v39 = vmul.f32 0.5, %v12744_v49 }
0x135f   :  { %v8464_v29 = vmul.f32 %v8456_v24, %v12744_v49  ;;  %v8458_v44 = vmul.f32 0.044715, %v12749_v62 }
0x1360   :  { %v8465_v48 = vmul.f32 %v8457_v9, %v12746_v34  ;;  %v8459_v33 = vmul.f32 0.044715, %v12752_v28  ;;  %v8450_v9 = vmul.f32 0.5, %v12749_v62 }
0x1361   :  { %v8472_v13 = vmul.f32 %v8464_v29, %v12744_v49  ;;  %v8466_v8 = vmul.f32 %v8458_v44, %v12749_v62  ;;  %v8449_v44 = vmul.f32 0.5, %v12746_v34 }
0x1362   :  { %v8473_v23 = vmul.f32 %v8465_v48, %v12746_v34  ;;  %v8467_v6 = vmul.f32 %v8459_v33, %v12752_v28  ;;  %v8439_v21 = vpop.f32.mrb[96].mxu1  ;;  %v8451_v48 = vmul.f32 0.5, %v12752_v28 }
0x1363   :  { %v8480_v30 = vadd.f32 %v8472_v13, %v12744_v49  ;;  %v8474_v50 = vmul.f32 %v8466_v8, %v12749_v62  ;;  %v12764_v1 = vadd.f32 %v8439_v21, %v8310_v37  ;;  %v8441_v51 = vpop.f32.mrb[97].mxu1 }
0x1364   :  { %v8475_v41 = vmul.f32 %v8467_v6, %v12752_v28  ;;  %v12767_v47 = vadd.f32 %v8441_v51, %v8314_v12  ;;  %v8443_v40 = vpop.f32.mrb[98].mxu1  ;;  %v8481_v32 = vadd.f32 %v8473_v23, %v12746_v34 }
0x1365   :  { %v8488_v43 = vmul.f32 0.7978846, %v8480_v30  ;;  %v8482_v59 = vadd.f32 %v8474_v50, %v12749_v62  ;;  %v8460_v27 = vmul.f32 0.044715, %v12764_v1  ;;  %v8444_v5 = vadd.f32 %v8443_v40, %v8310_v37  ;;  %v8445_v7 = vpop.f32.mrb[99].mxu1 }
0x1366   :  { %v8461_v4 = vmul.f32 0.044715, %v12767_v47  ;;  %v8446_v20 = vadd.f32 %v8445_v7, %v8314_v12  ;;  %v8483_v36 = vadd.f32 %v8475_v41, %v12752_v28  ;;  %v8489_v57 = vmul.f32 0.7978846, %v8481_v32 }
0x1367   :  { %9918 = vtanh.f32 %v8488_v43  ;;  %v8490_v19 = vmul.f32 0.7978846, %v8482_v59  ;;  %v8468_v16 = vmul.f32 %v8460_v27, %v12764_v1  ;;  %v8462_v11 = vmul.f32 0.044715, %v8444_v5 }
0x1368   :  { %v8469_v22 = vmul.f32 %v8461_v4, %v12767_v47  ;;  %v8463_v26 = vmul.f32 0.044715, %v8446_v20  ;;  %v8491_v46 = vmul.f32 0.7978846, %v8483_v36  ;;  %9920 = vtanh.f32 %v8489_v57 }
0x1369   :  { %9922 = vtanh.f32 %v8490_v19  ;;  %v8476_v54 = vmul.f32 %v8468_v16, %v12764_v1  ;;  %v8470_v3 = vmul.f32 %v8462_v11, %v8444_v5  ;;  %v8452_v62 = vmul.f32 0.5, %v12764_v1 }
0x136a   :  { %v8477_v45 = vmul.f32 %v8469_v22, %v12767_v47  ;;  %v8471_v60 = vmul.f32 %v8463_v26, %v8446_v20  ;;  %9924 = vtanh.f32 %v8491_v46  ;;  %v8454_v34 = vmul.f32 0.5, %v8444_v5 }
0x136b   :  { %v8478_v25 = vmul.f32 %v8470_v3, %v8444_v5  ;;  %v8484_v15 = vadd.f32 %v8476_v54, %v12764_v1  ;;  %v8453_v28 = vmul.f32 0.5, %v12767_v47  ;;  %v8455_v59 = vmul.f32 0.5, %v8446_v20 }
0x136c   :  { %v8479_v58 = vmul.f32 %v8471_v60, %v8446_v20  ;;  %v8485_v63 = vadd.f32 %v8477_v45, %v12767_v47  ;;  %v12850_v22 = vsub.s32 7, %v10170_v18 }
0x136d   :  { %v8486_v42 = vadd.f32 %v8478_v25, %v8444_v5  ;;  %v8492_v10 = vmul.f32 0.7978846, %v8484_v15 }
0x136e   :  { %v8487_v53 = vadd.f32 %v8479_v58, %v8446_v20  ;;  %v8493_v35 = vmul.f32 0.7978846, %v8485_v63  ;;  %v8560_v26 = vrot.slane %v12602_v55, %v12850_v22 }
0x136f   :  { %v8494_v14 = vmul.f32 0.7978846, %v8486_v42  ;;  %9926 = vtanh.f32 %v8492_v10 }
0x1370   :  { %v8495_v37 = vmul.f32 0.7978846, %v8487_v53  ;;  %9928 = vtanh.f32 %v8493_v35 }
0x1371   :  { %v9919_v2 = vpop.eup %9918  ;;  %9930 = vtanh.f32 %v8494_v14 }
0x1372   :  { %v9921_v12 = vpop.eup %9920  ;;  %v8504_v52 = vadd.f32 1.0, %v9919_v2  ;;  %9932 = vtanh.f32 %v8495_v37 }
0x1373   :  { %v9923_v17 = vpop.eup %9922  ;;  %v8505_v61 = vadd.f32 1.0, %v9921_v12 }
0x1374   :  { %v9925_v24 = vpop.eup %9924  ;;  %v8506_v29 = vadd.f32 1.0, %v9923_v17  ;;  %v8512_v13 = vmul.f32 %v8504_v52, %v8448_v39 }
0x1375   :  { %v8507_v33 = vadd.f32 1.0, %v9925_v24  ;;  %v8513_v23 = vmul.f32 %v8505_v61, %v8449_v44 }
0x1376   :  { %v8514_v8 = vmul.f32 %v8506_v29, %v8450_v9 }
0x1377   :  { %v8515_v6 = vmul.f32 %v8507_v33, %v8451_v48 }
0x1378   :  { %v8520_v21 = vpack.c.bf16 %v8514_v8, %v8512_v13 }
0x1379   :  { %v9927_v30 = vpop.eup %9926  ;;  %v8521_v50 = vpack.c.bf16 %v8515_v6, %v8513_v23 }
0x137a   :  { %v9929_v51 = vpop.eup %9928  ;;  %v8508_v41 = vadd.f32 1.0, %v9927_v30 }
0x137b   :  { %v9931_v40 = vpop.eup %9930  ;;  %8689 = vmatprep.mubr.bf16.mxu0 %v8521_v50  ;;  %v8509_v49 = vadd.f32 1.0, %v9929_v51 }
0x137c   :  { %v9933_v32 = vpop.eup %9932  ;;  %8690 = vmatmul.mubr.bf16.vlgmr.msra.gmra.mrb[92].mxu0 %v8520_v21  ;;  %v8510_v43 = vadd.f32 1.0, %v9931_v40  ;;  %v8516_v7 = vmul.f32 %v8508_v41, %v8452_v62 }
0x137d   :  { %v8511_v27 = vadd.f32 1.0, %v9933_v32  ;;  %v8517_v36 = vmul.f32 %v8509_v49, %v8453_v28 }
0x137e   :  { %v8518_v4 = vmul.f32 %v8510_v43, %v8454_v34 }
0x137f   :  { %v8519_v57 = vmul.f32 %v8511_v27, %v8455_v59 }
0x1380   :  { %v8522_v19 = vpack.c.bf16 %v8518_v4, %v8516_v7 }
0x1381   :  { %v8523_v16 = vpack.c.bf16 %v8519_v57, %v8517_v36 }
0x1383   :  { %8697 = vmatprep.mubr.bf16.mxu0 %v8523_v16 }
0x1384   :  { %8698 = vmatmul.mubr.bf16.gmra.mrb[96].mxu0 %v8522_v19 }
0x144f   :  { %v9215_v11 = vpop.f32.mrb[92].mxu0 }
0x1450   :  { %v9216_v1 = vpop.f32.mrb[93].mxu0 }
0x1451   :  { %v9217_v5 = vadd.f32 %v9216_v1, %v9215_v11  ;;  %v9218_v46 = vpop.f32.mrb[94].mxu0 }
0x1452   :  { %v9219_v54 = vpop.f32.mrb[95].mxu0 }
0x1453   :  { %v8692_v47 = vadd.f32 %v9217_v5, %v8560_v26  ;;  %v9220_v20 = vadd.f32 %v9219_v54, %v9218_v46 }
0x1455   :  { %v8706_v3 = vadd.f32 %v8692_v47, %v12608_v0  ;;  %v8695_v45 = vadd.f32 %v9220_v20, %v8560_v26 }
0x1457   :  { %8710 = vst [vmem:[#allocation2] sm:$0xff] %v8706_v3  ;;  %v8707_v60 = vadd.f32 %v8695_v45, %v12611_v38  ;;  %v9221_v25 = vpop.f32.mrb[96].mxu0 }
0x1458   :  { %v9222_v15 = vpop.f32.mrb[97].mxu0 }
0x1459   :  { %8711 = vst [vmem:[#allocation2 + $0x8] sm:$0xff] %v8707_v60  ;;  %v9223_v58 = vadd.f32 %v9222_v15, %v9221_v25  ;;  %v9224_v63 = vpop.f32.mrb[98].mxu0 }
0x145a   :  { %v9225_v18 = vpop.f32.mrb[99].mxu0 }
0x145b   :  { %v8700_v42 = vadd.f32 %v9223_v58, %v8560_v26  ;;  %v9226_v55 = vadd.f32 %v9225_v18, %v9224_v63 }
0x145d   :  { %v8708_v10 = vadd.f32 %v8700_v42, %v12626_v56  ;;  %v8703_v53 = vadd.f32 %v9226_v55, %v8560_v26 }
0x145f   :  { %8712 = vst [vmem:[#allocation2 + $0x10] sm:$0xff] %v8708_v10  ;;  %v8709_v0 = vadd.f32 %v8703_v53, %v12618_v31 }
0x1461   :  { %8713 = vst [vmem:[#allocation2 + $0x18] sm:$0xff] %v8709_v0 }
0x1462   :  { %9949 = shalt.err (!%p9946_p4)
}
0x1463   :  { %s9950_s18 = scalar_lea.hbm %s12813_s8, 512 }
0x1464   :  { %p9951_p5 = scmp.ne.s32.totalorder %s12813_s8, %s9950_s18  ;;  %p9954_p6 = scmp.lt.u32.totalorder %s9950_s18, %s12813_s8 }
0x1466   :  { %p9956_p7 = pnand %p9954_p6, %p9951_p5 }
0x1468   :  { %9959 = shalt.err (!%p9956_p7)
}
0x1469   :  { %s9971_s22 = smov 128   ;;  %s9972_s23 = smov 8  }
0x146a   :  { %8725 = dma.vmem_to_hbm [thread:$0]  %s8720_s7, 512, %s12813_s8, [#allocation3], %s9971_s22, %s9971_s22, %s9972_s23  }
0x146b   :  { %9960 = dma.done.wait [#allocation3], 512  }
0x146c   :  { %9961 = vsyncadd [#allocation3], 4294966784 }
0x146d   :  { %8729 = vsyncpa [#allocation3], 1 }

</bundles_post_ra>
